<compile_context>
chip_gen: v6e
topology: v6e:2x2x1
jax: 0.10.0
libtpu: 0.0.40
codegen_flags: <defaults>
</compile_context>

<pallas_src>
import math

import jax
import jax.numpy as jnp
from jax.experimental import pallas as pl
from jax.experimental.pallas import tpu as pltpu

LN_EPS = 1e-12  # RobertaConfig.layer_norm_eps default


def _tensorcores_per_chip():
    """v7x exposes 2 TensorCores per chip; earlier generations expose 1."""
    try:
        kind = jax.devices()[0].device_kind.lower()
    except Exception:
        return 1
    return 2 if ("v7" in kind or "7x" in kind) else 1


def make_attn_kernel(num_heads, head_dim, batch_tile, seq, hidden, hidden_pad,
                     compute_dtype, use_approx_recip):
    rows = batch_tile * seq
    groups = batch_tile * num_heads
    inv_h = 1.0 / hidden

    def kernel(x_ref, wq_ref, bq_ref, wk_ref, bk_ref, wv_ref, bv_ref,
               wo_ref, bo_ref, g_ref, beta_ref, o_ref):
        x = x_ref[...]                       # (rows, Hp) f32, padded cols are zero
        xm = x.astype(compute_dtype)

        # --- Q/K/V projections: lane-aligned (rows,Hp)x(Hp,H) matmuls on MXU.
        #     softmax scale is already folded into wq / bq (wrapper).
        q = jnp.dot(xm, wq_ref[...], preferred_element_type=jnp.float32) + bq_ref[...]
        k = jnp.dot(xm, wk_ref[...], preferred_element_type=jnp.float32) + bk_ref[...]
        v = jnp.dot(xm, wv_ref[...], preferred_element_type=jnp.float32) + bv_ref[...]

        # --- head-batched attention: a single relayout per tensor, then two
        #     batched einsums over the (batch*heads) axis.
        def to_heads(t):                      # (rows, H) -> (Bt*nH, S, hd)
            return (t.reshape(batch_tile, seq, num_heads, head_dim)
                     .transpose(0, 2, 1, 3)
                     .reshape(groups, seq, head_dim))

        qh = to_heads(q)
        kh = to_heads(k)
        vh = to_heads(v)

        s = jnp.einsum("gqd,gkd->gqk", qh, kh, preferred_element_type=jnp.float32)
        s = s - jnp.max(s, axis=-1, keepdims=True)
        e = jnp.exp(s)
        denom = jnp.sum(e, axis=-1, keepdims=True)
        if use_approx_recip:
            p = e * pl.reciprocal(denom, approx=True)
        else:
            p = e / denom
        ctx = jnp.einsum("gqk,gkd->gqd", p, vh, preferred_element_type=jnp.float32)

        # merge heads back with one relayout (no per-head slices / concat)
        ctx_f = (ctx.reshape(batch_tile, num_heads, seq, head_dim)
                    .transpose(0, 2, 1, 3)
                    .reshape(rows, hidden))

        # --- RobertaSelfOutput: dense (lane-dense N=Hp) + residual + LayerNorm
        out = jnp.dot(ctx_f.astype(compute_dtype), wo_ref[...],
                      preferred_element_type=jnp.float32) + bo_ref[...]
        y = out + x                            # padded columns stay exactly zero

        mu = jnp.sum(y, axis=-1, keepdims=True) * inv_h      # true-H mean
        col = jax.lax.broadcasted_iota(jnp.int32, (rows, hidden_pad), 1)
        d = jnp.where(col < hidden, y - mu, 0.0)
        var = jnp.sum(d * d, axis=-1, keepdims=True) * inv_h  # true-H variance
        yn = (y - mu) * jax.lax.rsqrt(var + LN_EPS)
        o_ref[...] = (yn * g_ref[...] + beta_ref[...]).astype(o_ref.dtype)

    return kernel


def roberta_attention_pallas(x, params, num_heads, *, compute_dtype=jnp.bfloat16):
    B, S, H = x.shape
    hd = H // num_heads
    assert hd * num_heads == H
    Hp = ((H + 127) // 128) * 128
    pad = Hp - H
    scale = 1.0 / math.sqrt(hd)

    # Batch tiling: one batch element per TensorCore on v7x, otherwise collapse
    # the whole batch into a single grid step (the grid is a serial loop on
    # 1-TC chips, so extra steps are pure per-step overhead).
    n_tc = _tensorcores_per_chip()
    grid_b = n_tc if (n_tc > 1 and B % n_tc == 0) else 1
    Bt = B // grid_b
    rows = Bt * S

    use_approx_recip = jnp.dtype(compute_dtype) != jnp.dtype(jnp.float32)

    # --- wrapper-side layout prep: flatten batch into rows, pad H -> Hp,
    #     fold the softmax scale into Wq/bq, cast matmul weights.
    xr = jnp.pad(x.reshape(B * S, H), ((0, 0), (0, pad)))            # (B*S, Hp) f32

    def pad_rows(w):   # (H, H) -> (Hp, H): pad the contraction dim only
        return jnp.pad(w, ((0, pad), (0, 0))).astype(compute_dtype)

    wq = pad_rows(params["wq"] * scale)
    wk = pad_rows(params["wk"])
    wv = pad_rows(params["wv"])
    bq = params["bq"] * scale                                        # (1, H) f32
    bk = params["bk"]
    bv = params["bv"]
    wo = jnp.pad(params["wo"], ((0, 0), (0, pad))).astype(compute_dtype)   # (H, Hp)
    bo = jnp.pad(params["bo"], ((0, 0), (0, pad)))                   # (1, Hp) f32
    gamma = jnp.pad(params["gamma"], ((0, 0), (0, pad)))
    beta = jnp.pad(params["beta"], ((0, 0), (0, pad)))

    kernel = make_attn_kernel(num_heads, hd, Bt, S, H, Hp, compute_dtype,
                              use_approx_recip)

    def const_spec(shape):
        nd = len(shape)
        return pl.BlockSpec(shape, lambda b, _n=nd: (0,) * _n)

    in_specs = [
        pl.BlockSpec((rows, Hp), lambda b: (b, 0)),   # rows of x for this step
        const_spec(wq.shape), const_spec(bq.shape),
        const_spec(wk.shape), const_spec(bk.shape),
        const_spec(wv.shape), const_spec(bv.shape),
        const_spec(wo.shape), const_spec(bo.shape),
        const_spec(gamma.shape), const_spec(beta.shape),
    ]
    out_spec = pl.BlockSpec((rows, Hp), lambda b: (b, 0))

    out = pl.pallas_call(
        kernel,
        out_shape=jax.ShapeDtypeStruct((B * S, Hp), x.dtype),
        grid_spec=pltpu.PrefetchScalarGridSpec(
            num_scalar_prefetch=0,
            grid=(grid_b,),
            in_specs=in_specs,
            out_specs=out_spec,
        ),
        compiler_params=pltpu.CompilerParams(
            dimension_semantics=("parallel",),
        ),
    )(xr, wq, bq, wk, bk, wv, bv, wo, bo, gamma, beta)

    return out.reshape(B, S, Hp)[:, :, :H]


def roberta_attention_ref(x, params, num_heads):
    """Pure-JAX f32 reference with identical math (for correctness check)."""
    B, S, H = x.shape
    hd = H // num_heads
    q = x @ params["wq"] + params["bq"]
    k = x @ params["wk"] + params["bk"]
    v = x @ params["wv"] + params["bv"]

    def split_heads(t):
        return t.reshape(B, S, num_heads, hd).transpose(0, 2, 1, 3)

    qh, kh, vh = split_heads(q), split_heads(k), split_heads(v)
    scores = jnp.einsum("bhqd,bhkd->bhqk", qh, kh) / math.sqrt(hd)
    probs = jax.nn.softmax(scores, axis=-1)
    ctx = jnp.einsum("bhqk,bhkd->bhqd", probs, vh)
    ctx = ctx.transpose(0, 2, 1, 3).reshape(B, S, H)
    out = ctx @ params["wo"] + params["bo"]
    y = out + x
    mu = jnp.mean(y, axis=-1, keepdims=True)
    var = jnp.mean((y - mu) ** 2, axis=-1, keepdims=True)
    yn = (y - mu) * jax.lax.rsqrt(var + LN_EPS)
    return yn * params["gamma"] + params["beta"]


def init_attn_params(key, hidden):
    ks = jax.random.split(key, 8)

    def lin_w(k, fan_in, fan_out):
        return (jax.random.normal(k, (fan_in, fan_out), jnp.float32)
                * (1.0 / math.sqrt(fan_in)))

    def lin_b(k, fan_out):
        return jax.random.normal(k, (1, fan_out), jnp.float32) * 0.02

    return {
        "wq": lin_w(ks[0], hidden, hidden), "bq": lin_b(ks[1], hidden),
        "wk": lin_w(ks[2], hidden, hidden), "bk": lin_b(ks[3], hidden),
        "wv": lin_w(ks[4], hidden, hidden), "bv": lin_b(ks[5], hidden),
        "wo": lin_w(ks[6], hidden, hidden), "bo": lin_b(ks[7], hidden),
        "gamma": jnp.ones((1, hidden), jnp.float32),
        "beta": jnp.zeros((1, hidden), jnp.float32),
    }


if __name__ == "__main__":
    key = jax.random.PRNGKey(0)
    k_x, k_y, k_p0, k_p1 = jax.random.split(key, 4)

    # attn0: hidden=192, heads=16 ; attn1: hidden=66, heads=6
    B, S = 2, 8
    x = jax.random.normal(k_x, (B, S, 192), jnp.float32)
    y = jax.random.normal(k_y, (B, S, 66), jnp.float32)

    params0 = init_attn_params(k_p0, 192)
    params1 = init_attn_params(k_p1, 66)

    ref0 = roberta_attention_ref(x, params0, num_heads=16)
    ref1 = roberta_attention_ref(y, params1, num_heads=6)

    # Exact-math path (f32 matmuls, exact reciprocal) -> tight check of the
    # head mapping / softmax / LayerNorm logic.
    out0_f32 = roberta_attention_pallas(x, params0, num_heads=16,
                                        compute_dtype=jnp.float32)
    out1_f32 = roberta_attention_pallas(y, params1, num_heads=6,
                                        compute_dtype=jnp.float32)
    jax.block_until_ready((out0_f32, out1_f32))
    assert jnp.allclose(out0_f32, ref0, atol=2e-4, rtol=2e-4), "attn0 f32 mismatch"
    assert jnp.allclose(out1_f32, ref1, atol=2e-4, rtol=2e-4), "attn1 f32 mismatch"

    # Default fast path (bf16 matmul inputs + approximate reciprocal) -> looser
    # tolerance against the f32 reference.
    out0 = roberta_attention_pallas(x, params0, num_heads=16)
    out1 = roberta_attention_pallas(y, params1, num_heads=6)
    jax.block_until_ready((out0, out1))
    assert jnp.allclose(out0, ref0, atol=1e-1, rtol=1e-1), "attn0 bf16 mismatch"
    assert jnp.allclose(out1, ref1, atol=1e-1, rtol=1e-1), "attn1 bf16 mismatch"

    print("KERNEL_OK")
</pallas_src>

<mosaic_0001>
module attributes {stable_mosaic.version = 11 : i64} {
  func.func @kernel(%arg0: i32, %arg1: memref<16x256xf32, #tpu.memory_space<vmem>>, %arg2: memref<256x192xf32, #tpu.memory_space<vmem>>, %arg3: memref<1x192xf32, #tpu.memory_space<vmem>>, %arg4: memref<256x192xf32, #tpu.memory_space<vmem>>, %arg5: memref<1x192xf32, #tpu.memory_space<vmem>>, %arg6: memref<256x192xf32, #tpu.memory_space<vmem>>, %arg7: memref<1x192xf32, #tpu.memory_space<vmem>>, %arg8: memref<192x256xf32, #tpu.memory_space<vmem>>, %arg9: memref<1x256xf32, #tpu.memory_space<vmem>>, %arg10: memref<1x256xf32, #tpu.memory_space<vmem>>, %arg11: memref<1x256xf32, #tpu.memory_space<vmem>>, %arg12: memref<16x256xf32, #tpu.memory_space<vmem>>) attributes {dimension_semantics = [#tpu.dimension_semantics<parallel>], iteration_bounds = array<i64: 1>, scalar_prefetch = 0 : i64, scratch_operands = 0 : i64, tpu.core_type = #tpu.core_type<tc>, window_params = [{transform_indices = @transform_0, window_bounds = array<i64: 16, 256>}, {pipeline_mode = #tpu.pipeline_mode<synchronous>, transform_indices = @transform_1, window_bounds = array<i64: 256, 192>}, {pipeline_mode = #tpu.pipeline_mode<synchronous>, transform_indices = @transform_2, window_bounds = array<i64: 1, 192>}, {pipeline_mode = #tpu.pipeline_mode<synchronous>, transform_indices = @transform_3, window_bounds = array<i64: 256, 192>}, {pipeline_mode = #tpu.pipeline_mode<synchronous>, transform_indices = @transform_4, window_bounds = array<i64: 1, 192>}, {pipeline_mode = #tpu.pipeline_mode<synchronous>, transform_indices = @transform_5, window_bounds = array<i64: 256, 192>}, {pipeline_mode = #tpu.pipeline_mode<synchronous>, transform_indices = @transform_6, window_bounds = array<i64: 1, 192>}, {pipeline_mode = #tpu.pipeline_mode<synchronous>, transform_indices = @transform_7, window_bounds = array<i64: 192, 256>}, {pipeline_mode = #tpu.pipeline_mode<synchronous>, transform_indices = @transform_8, window_bounds = array<i64: 1, 256>}, {pipeline_mode = #tpu.pipeline_mode<synchronous>, transform_indices = @transform_9, window_bounds = array<i64: 1, 256>}, {pipeline_mode = #tpu.pipeline_mode<synchronous>, transform_indices = @transform_10, window_bounds = array<i64: 1, 256>}, {transform_indices = @transform_11, window_bounds = array<i64: 16, 256>}]} {
    %c0 = arith.constant 0 : index
    %c0_0 = arith.constant 0 : index
    %0 = vector.load %arg1[%c0, %c0_0] : memref<16x256xf32, #tpu.memory_space<vmem>>, vector<16x256xf32>
    %c0_1 = arith.constant 0 : index
    %c0_2 = arith.constant 0 : index
    %1 = vector.load %arg2[%c0_1, %c0_2] : memref<256x192xf32, #tpu.memory_space<vmem>>, vector<256x192xf32>
    %cst = arith.constant dense<0.000000e+00> : vector<16x192xf32>
    %2 = tpu.matmul %0, %1, %cst {dimension_numbers = #tpu.dot_dimension_numbers<[1], [0], [0], [1], [0, 0, 1, 1], [], []>} : vector<16x256xf32>, vector<256x192xf32>, vector<16x192xf32> -> vector<16x192xf32>
    %c0_3 = arith.constant 0 : index
    %c0_4 = arith.constant 0 : index
    %3 = vector.load %arg3[%c0_3, %c0_4] : memref<1x192xf32, #tpu.memory_space<vmem>>, vector<1x192xf32>
    %4 = vector.broadcast %3 : vector<1x192xf32> to vector<16x192xf32>
    %5 = arith.addf %2, %4 : vector<16x192xf32>
    %c0_5 = arith.constant 0 : index
    %c0_6 = arith.constant 0 : index
    %6 = vector.load %arg4[%c0_5, %c0_6] : memref<256x192xf32, #tpu.memory_space<vmem>>, vector<256x192xf32>
    %cst_7 = arith.constant dense<0.000000e+00> : vector<16x192xf32>
    %7 = tpu.matmul %0, %6, %cst_7 {dimension_numbers = #tpu.dot_dimension_numbers<[1], [0], [0], [1], [0, 0, 1, 1], [], []>} : vector<16x256xf32>, vector<256x192xf32>, vector<16x192xf32> -> vector<16x192xf32>
    %c0_8 = arith.constant 0 : index
    %c0_9 = arith.constant 0 : index
    %8 = vector.load %arg5[%c0_8, %c0_9] : memref<1x192xf32, #tpu.memory_space<vmem>>, vector<1x192xf32>
    %9 = vector.broadcast %8 : vector<1x192xf32> to vector<16x192xf32>
    %10 = arith.addf %7, %9 : vector<16x192xf32>
    %c0_10 = arith.constant 0 : index
    %c0_11 = arith.constant 0 : index
    %11 = vector.load %arg6[%c0_10, %c0_11] : memref<256x192xf32, #tpu.memory_space<vmem>>, vector<256x192xf32>
    %cst_12 = arith.constant dense<0.000000e+00> : vector<16x192xf32>
    %12 = tpu.matmul %0, %11, %cst_12 {dimension_numbers = #tpu.dot_dimension_numbers<[1], [0], [0], [1], [0, 0, 1, 1], [], []>} : vector<16x256xf32>, vector<256x192xf32>, vector<16x192xf32> -> vector<16x192xf32>
    %c0_13 = arith.constant 0 : index
    %c0_14 = arith.constant 0 : index
    %13 = vector.load %arg7[%c0_13, %c0_14] : memref<1x192xf32, #tpu.memory_space<vmem>>, vector<1x192xf32>
    %14 = vector.broadcast %13 : vector<1x192xf32> to vector<16x192xf32>
    %15 = arith.addf %12, %14 : vector<16x192xf32>
    %16 = vector.shape_cast %5 : vector<16x192xf32> to vector<2x8x16x12xf32>
    %17 = tpu.transpose %16, [0, 2, 1, 3] : vector<2x8x16x12xf32> -> vector<2x16x8x12xf32>
    %18 = vector.shape_cast %17 : vector<2x16x8x12xf32> to vector<32x8x12xf32>
    %19 = vector.shape_cast %10 : vector<16x192xf32> to vector<2x8x16x12xf32>
    %20 = tpu.transpose %19, [0, 2, 1, 3] : vector<2x8x16x12xf32> -> vector<2x16x8x12xf32>
    %21 = vector.shape_cast %20 : vector<2x16x8x12xf32> to vector<32x8x12xf32>
    %22 = vector.shape_cast %15 : vector<16x192xf32> to vector<2x8x16x12xf32>
    %23 = tpu.transpose %22, [0, 2, 1, 3] : vector<2x8x16x12xf32> -> vector<2x16x8x12xf32>
    %24 = vector.shape_cast %23 : vector<2x16x8x12xf32> to vector<32x8x12xf32>
    "tpu.trace_start"() <{level = 10 : i32, message = "gqd,gkd->gqk"}> : () -> ()
    %cst_15 = arith.constant dense<0.000000e+00> : vector<32x8x8xf32>
    %25 = tpu.matmul %18, %21, %cst_15 {dimension_numbers = #tpu.dot_dimension_numbers<[2], [2], [1], [1], [0, 0, 0, 1, 1, 1], [0], [0]>} : vector<32x8x12xf32>, vector<32x8x12xf32>, vector<32x8x8xf32> -> vector<32x8x8xf32>
    "tpu.trace_stop"() : () -> ()
    %cst_16 = arith.constant dense<0xFF800000> : vector<32x8xf32>
    %26 = vector.multi_reduction <maximumf>, %25, %cst_16 [2] : vector<32x8x8xf32> to vector<32x8xf32>
    %27 = vector.shape_cast %26 : vector<32x8xf32> to vector<32x8x1xf32>
    %28 = vector.broadcast %27 : vector<32x8x1xf32> to vector<32x8x8xf32>
    %29 = arith.subf %25, %28 : vector<32x8x8xf32>
    %30 = math.exp %29 : vector<32x8x8xf32>
    %cst_17 = arith.constant dense<0.000000e+00> : vector<32x8xf32>
    %31 = vector.multi_reduction <add>, %30, %cst_17 [2] : vector<32x8x8xf32> to vector<32x8xf32>
    %32 = vector.shape_cast %31 : vector<32x8xf32> to vector<32x8x1xf32>
    %33 = vector.broadcast %32 : vector<32x8x1xf32> to vector<32x8x8xf32>
    %34 = arith.divf %30, %33 : vector<32x8x8xf32>
    "tpu.trace_start"() <{level = 10 : i32, message = "gqk,gkd->gqd"}> : () -> ()
    %cst_18 = arith.constant dense<0.000000e+00> : vector<32x8x12xf32>
    %35 = tpu.matmul %34, %24, %cst_18 {dimension_numbers = #tpu.dot_dimension_numbers<[2], [1], [1], [2], [0, 0, 0, 1, 1, 2], [0], [0]>} : vector<32x8x8xf32>, vector<32x8x12xf32>, vector<32x8x12xf32> -> vector<32x8x12xf32>
    "tpu.trace_stop"() : () -> ()
    %36 = vector.shape_cast %35 : vector<32x8x12xf32> to vector<2x16x8x12xf32>
    %37 = tpu.transpose %36, [0, 2, 1, 3] : vector<2x16x8x12xf32> -> vector<2x8x16x12xf32>
    %38 = vector.shape_cast %37 : vector<2x8x16x12xf32> to vector<16x192xf32>
    %c0_19 = arith.constant 0 : index
    %c0_20 = arith.constant 0 : index
    %39 = vector.load %arg8[%c0_19, %c0_20] : memref<192x256xf32, #tpu.memory_space<vmem>>, vector<192x256xf32>
    %cst_21 = arith.constant dense<0.000000e+00> : vector<16x256xf32>
    %40 = tpu.matmul %38, %39, %cst_21 {dimension_numbers = #tpu.dot_dimension_numbers<[1], [0], [0], [1], [0, 0, 1, 1], [], []>} : vector<16x192xf32>, vector<192x256xf32>, vector<16x256xf32> -> vector<16x256xf32>
    %c0_22 = arith.constant 0 : index
    %c0_23 = arith.constant 0 : index
    %41 = vector.load %arg9[%c0_22, %c0_23] : memref<1x256xf32, #tpu.memory_space<vmem>>, vector<1x256xf32>
    %42 = vector.broadcast %41 : vector<1x256xf32> to vector<16x256xf32>
    %43 = arith.addf %40, %42 : vector<16x256xf32>
    %44 = arith.addf %43, %0 : vector<16x256xf32>
    %cst_24 = arith.constant dense<0.000000e+00> : vector<16xf32>
    %45 = vector.multi_reduction <add>, %44, %cst_24 [1] : vector<16x256xf32> to vector<16xf32>
    %46 = vector.shape_cast %45 : vector<16xf32> to vector<16x1xf32>
    %cst_25 = arith.constant 0.00520833349 : f32
    %47 = vector.broadcast %cst_25 : f32 to vector<16x1xf32>
    %48 = arith.mulf %46, %47 : vector<16x1xf32>
    %49 = tpu.iota {dimensions = array<i32: 1>} : vector<16x256xi32>
    %c192_i32 = arith.constant 192 : i32
    %50 = vector.broadcast %c192_i32 : i32 to vector<16x256xi32>
    %51 = arith.cmpi slt, %49, %50 : vector<16x256xi32>
    %52 = vector.broadcast %48 : vector<16x1xf32> to vector<16x256xf32>
    %53 = arith.subf %44, %52 : vector<16x256xf32>
    %cst_26 = arith.constant 0.000000e+00 : f32
    %54 = vector.broadcast %cst_26 : f32 to vector<16x256xf32>
    %55 = arith.select %51, %53, %54 : vector<16x256xi1>, vector<16x256xf32>
    %56 = arith.mulf %55, %55 : vector<16x256xf32>
    %cst_27 = arith.constant dense<0.000000e+00> : vector<16xf32>
    %57 = vector.multi_reduction <add>, %56, %cst_27 [1] : vector<16x256xf32> to vector<16xf32>
    %58 = vector.shape_cast %57 : vector<16xf32> to vector<16x1xf32>
    %cst_28 = arith.constant 0.00520833349 : f32
    %59 = vector.broadcast %cst_28 : f32 to vector<16x1xf32>
    %60 = arith.mulf %58, %59 : vector<16x1xf32>
    %61 = vector.broadcast %48 : vector<16x1xf32> to vector<16x256xf32>
    %62 = arith.subf %44, %61 : vector<16x256xf32>
    %cst_29 = arith.constant 9.99999996E-13 : f32
    %63 = vector.broadcast %cst_29 : f32 to vector<16x1xf32>
    %64 = arith.addf %60, %63 : vector<16x1xf32>
    %65 = math.rsqrt %64 : vector<16x1xf32>
    %66 = vector.broadcast %65 : vector<16x1xf32> to vector<16x256xf32>
    %67 = arith.mulf %62, %66 : vector<16x256xf32>
    %c0_30 = arith.constant 0 : index
    %c0_31 = arith.constant 0 : index
    %68 = vector.load %arg10[%c0_30, %c0_31] : memref<1x256xf32, #tpu.memory_space<vmem>>, vector<1x256xf32>
    %69 = vector.broadcast %68 : vector<1x256xf32> to vector<16x256xf32>
    %70 = arith.mulf %67, %69 : vector<16x256xf32>
    %c0_32 = arith.constant 0 : index
    %c0_33 = arith.constant 0 : index
    %71 = vector.load %arg11[%c0_32, %c0_33] : memref<1x256xf32, #tpu.memory_space<vmem>>, vector<1x256xf32>
    %72 = vector.broadcast %71 : vector<1x256xf32> to vector<16x256xf32>
    %73 = arith.addf %70, %72 : vector<16x256xf32>
    %c0_34 = arith.constant 0 : index
    %c0_35 = arith.constant 0 : index
    %74 = vector.load %arg12[%c0_34, %c0_35] : memref<16x256xf32, #tpu.memory_space<vmem>>, vector<16x256xf32>
    tpu.vector_store %arg12[%c0_34, %c0_35], %73 {strides = array<i32>} : memref<16x256xf32, #tpu.memory_space<vmem>>, vector<16x256xf32>,
    return
  }
  func.func @transform_0(%arg0: i32) -> (i32, i32) {
    %c0_i32 = arith.constant 0 : i32
    %c0_i32_0 = arith.constant 0 : i32
    return %arg0, %c0_i32 : i32, i32
  }
  func.func @transform_1(%arg0: i32) -> (i32, i32) {
    %c0_i32 = arith.constant 0 : i32
    %c0_i32_0 = arith.constant 0 : i32
    %c0_i32_1 = arith.constant 0 : i32
    return %c0_i32, %c0_i32_0 : i32, i32
  }
  func.func @transform_2(%arg0: i32) -> (i32, i32) {
    %c0_i32 = arith.constant 0 : i32
    %c0_i32_0 = arith.constant 0 : i32
    %c0_i32_1 = arith.constant 0 : i32
    return %c0_i32, %c0_i32_0 : i32, i32
  }
  func.func @transform_3(%arg0: i32) -> (i32, i32) {
    %c0_i32 = arith.constant 0 : i32
    %c0_i32_0 = arith.constant 0 : i32
    %c0_i32_1 = arith.constant 0 : i32
    return %c0_i32, %c0_i32_0 : i32, i32
  }
  func.func @transform_4(%arg0: i32) -> (i32, i32) {
    %c0_i32 = arith.constant 0 : i32
    %c0_i32_0 = arith.constant 0 : i32
    %c0_i32_1 = arith.constant 0 : i32
    return %c0_i32, %c0_i32_0 : i32, i32
  }
  func.func @transform_5(%arg0: i32) -> (i32, i32) {
    %c0_i32 = arith.constant 0 : i32
    %c0_i32_0 = arith.constant 0 : i32
    %c0_i32_1 = arith.constant 0 : i32
    return %c0_i32, %c0_i32_0 : i32, i32
  }
  func.func @transform_6(%arg0: i32) -> (i32, i32) {
    %c0_i32 = arith.constant 0 : i32
    %c0_i32_0 = arith.constant 0 : i32
    %c0_i32_1 = arith.constant 0 : i32
    return %c0_i32, %c0_i32_0 : i32, i32
  }
  func.func @transform_7(%arg0: i32) -> (i32, i32) {
    %c0_i32 = arith.constant 0 : i32
    %c0_i32_0 = arith.constant 0 : i32
    %c0_i32_1 = arith.constant 0 : i32
    return %c0_i32, %c0_i32_0 : i32, i32
  }
  func.func @transform_8(%arg0: i32) -> (i32, i32) {
    %c0_i32 = arith.constant 0 : i32
    %c0_i32_0 = arith.constant 0 : i32
    %c0_i32_1 = arith.constant 0 : i32
    return %c0_i32, %c0_i32_0 : i32, i32
  }
  func.func @transform_9(%arg0: i32) -> (i32, i32) {
    %c0_i32 = arith.constant 0 : i32
    %c0_i32_0 = arith.constant 0 : i32
    %c0_i32_1 = arith.constant 0 : i32
    return %c0_i32, %c0_i32_0 : i32, i32
  }
  func.func @transform_10(%arg0: i32) -> (i32, i32) {
    %c0_i32 = arith.constant 0 : i32
    %c0_i32_0 = arith.constant 0 : i32
    %c0_i32_1 = arith.constant 0 : i32
    return %c0_i32, %c0_i32_0 : i32, i32
  }
  func.func @transform_11(%arg0: i32) -> (i32, i32) {
    %c0_i32 = arith.constant 0 : i32
    %c0_i32_0 = arith.constant 0 : i32
    return %arg0, %c0_i32 : i32, i32
  }
}

</mosaic_0001>

<bundles_post_ra>
// kernel: tpu_custom_call.1
= control target key start
LH: loop header
LB: loop body
LE: loop exit
PB: predicated region body
PF: predicated region fallthrough
CT: control target
= control target key end

     0   :  { %s14717_s0 = inlined_call_operand.vmem [shape: f32[16,256], index: 0, kind: input, shape index: {}]   ;;  %s14718_s1 = inlined_call_operand.vmem [shape: f32[256,192], index: 1, kind: input, shape index: {}]   ;;  %s14719_s2 = inlined_call_operand.vmem [shape: f32[1,192], index: 2, kind: input, shape index: {}]   ;;  %s14720_s3 = inlined_call_operand.vmem [shape: f32[256,192], index: 3, kind: input, shape index: {}]   ;;  %s14721_s4 = inlined_call_operand.vmem [shape: f32[1,192], index: 4, kind: input, shape index: {}]   ;;  %s14722_s5 = inlined_call_operand.vmem [shape: f32[256,192], index: 5, kind: input, shape index: {}]   ;;  %s14723_s6 = inlined_call_operand.vmem [shape: f32[1,192], index: 6, kind: input, shape index: {}]   ;;  %s14724_s7 = inlined_call_operand.vmem [shape: f32[192,256], index: 7, kind: input, shape index: {}]   ;;  %s14725_s8 = inlined_call_operand.vmem [shape: f32[1,256], index: 8, kind: input, shape index: {}]   ;;  %s14726_s9 = inlined_call_operand.vmem [shape: f32[1,256], index: 9, kind: input, shape index: {}]   ;;  %s14727_s10 = inlined_call_operand.vmem [shape: f32[1,256], index: 10, kind: input, shape index: {}]   ;;  %s14728_s11 = inlined_call_operand.hbm [shape: f32[16,256], index: 11, kind: output, shape index: {}]  }
   0x1   :  { %v227_v0 = vld [vmem:[%s14720_s3 + $0xf8] sm:$0xff]  ;;  %v226_v1 = vld [vmem:[%s14720_s3 + $0xf0] sm:$0xff]  ;;  %v225_v3 = vld [vmem:[%s14720_s3 + $0xe8] sm:$0xff] }
   0x2   :  { %v74_v2 = vld [vmem:[%s14718_s1 + $0xf8] sm:$0xff]  ;;  %272 = vmatprep.subr.mxu1 %v227_v0  ;;  %v73_v4 = vld [vmem:[%s14718_s1 + $0xf0] sm:$0xff]  ;;  %v224_v5 = vld [vmem:[%s14720_s3 + $0xe0] sm:$0xff] }
   0x3   :  { %119 = vmatprep.subr.mxu0 %v74_v2  ;;  %273 = vmatpush1.msra.mxu1 %v226_v1  ;;  %v72_v6 = vld [vmem:[%s14718_s1 + $0xe8] sm:$0xff]  ;;  %v223_v7 = vld [vmem:[%s14720_s3 + $0xd8] sm:$0xff]  ;;  %v71_v8 = vld [vmem:[%s14718_s1 + $0xe0] sm:$0xff] }
   0x4   :  { %120 = vmatpush1.msra.mxu0 %v73_v4  ;;  %274 = vmatprep.subr.mxu1 %v225_v3  ;;  %v222_v9 = vld [vmem:[%s14720_s3 + $0xd0] sm:$0xff]  ;;  %v70_v10 = vld [vmem:[%s14718_s1 + $0xd8] sm:$0xff]  ;;  %v221_v11 = vld [vmem:[%s14720_s3 + $0xc8] sm:$0xff] }
   0x5   :  { %121 = vmatprep.subr.mxu0 %v72_v6  ;;  %275 = vmatpush1.msra.mxu1 %v224_v5  ;;  %v69_v12 = vld [vmem:[%s14718_s1 + $0xd0] sm:$0xff]  ;;  %v68_v13 = vld [vmem:[%s14718_s1 + $0xc8] sm:$0xff]  ;;  %v220_v14 = vld [vmem:[%s14720_s3 + $0xc0] sm:$0xff] }
   0x6   :  { %122 = vmatpush1.msra.mxu0 %v71_v8  ;;  %276 = vmatprep.subr.mxu1 %v223_v7  ;;  %v67_v15 = vld [vmem:[%s14718_s1 + $0xc0] sm:$0xff]  ;;  %v219_v16 = vld [vmem:[%s14720_s3 + $0xb8] sm:$0xff]  ;;  %v218_v18 = vld [vmem:[%s14720_s3 + $0xb0] sm:$0xff] }
   0x7   :  { %123 = vmatprep.subr.mxu0 %v70_v10  ;;  %277 = vmatpush1.msra.mxu1 %v222_v9  ;;  %v66_v17 = vld [vmem:[%s14718_s1 + $0xb8] sm:$0xff]  ;;  %v65_v19 = vld [vmem:[%s14718_s1 + $0xb0] sm:$0xff]  ;;  %v217_v20 = vld [vmem:[%s14720_s3 + $0xa8] sm:$0xff] }
   0x8   :  { %124 = vmatpush1.msra.mxu0 %v69_v12  ;;  %278 = vmatprep.subr.mxu1 %v221_v11  ;;  %v64_v21 = vld [vmem:[%s14718_s1 + $0xa8] sm:$0xff]  ;;  %v216_v22 = vld [vmem:[%s14720_s3 + $0xa0] sm:$0xff]  ;;  %v215_v24 = vld [vmem:[%s14720_s3 + $0x98] sm:$0xff] }
   0x9   :  { %125 = vmatprep.subr.mxu0 %v68_v13  ;;  %279 = vmatpush1.msra.mxu1 %v220_v14  ;;  %v63_v23 = vld [vmem:[%s14718_s1 + $0xa0] sm:$0xff]  ;;  %v62_v25 = vld [vmem:[%s14718_s1 + $0x98] sm:$0xff]  ;;  %v214_v26 = vld [vmem:[%s14720_s3 + $0x90] sm:$0xff] }
   0xa   :  { %126 = vmatpush1.msra.mxu0 %v67_v15  ;;  %280 = vmatprep.subr.mxu1 %v219_v16  ;;  %v61_v27 = vld [vmem:[%s14718_s1 + $0x90] sm:$0xff]  ;;  %v213_v28 = vld [vmem:[%s14720_s3 + $0x88] sm:$0xff]  ;;  %v212_v30 = vld [vmem:[%s14720_s3 + $0x80] sm:$0xff] }
   0xb   :  { %127 = vmatprep.subr.mxu0 %v66_v17  ;;  %281 = vmatpush1.msra.mxu1 %v218_v18  ;;  %v60_v29 = vld [vmem:[%s14718_s1 + $0x88] sm:$0xff]  ;;  %v59_v31 = vld [vmem:[%s14718_s1 + $0x80] sm:$0xff]  ;;  %v211_v32 = vld [vmem:[%s14720_s3 + $0x78] sm:$0xff] }
   0xc   :  { %128 = vmatpush1.msra.mxu0 %v65_v19  ;;  %282 = vmatprep.subr.mxu1 %v217_v20  ;;  %v58_v33 = vld [vmem:[%s14718_s1 + $0x78] sm:$0xff]  ;;  %v210_v34 = vld [vmem:[%s14720_s3 + $0x70] sm:$0xff]  ;;  %v209_v36 = vld [vmem:[%s14720_s3 + $0x68] sm:$0xff] }
   0xd   :  { %129 = vmatprep.subr.mxu0 %v64_v21  ;;  %283 = vmatpush1.msra.mxu1 %v216_v22  ;;  %v57_v35 = vld [vmem:[%s14718_s1 + $0x70] sm:$0xff]  ;;  %v56_v37 = vld [vmem:[%s14718_s1 + $0x68] sm:$0xff]  ;;  %v208_v38 = vld [vmem:[%s14720_s3 + $0x60] sm:$0xff] }
   0xe   :  { %130 = vmatpush1.msra.mxu0 %v63_v23  ;;  %284 = vmatprep.subr.mxu1 %v215_v24  ;;  %v55_v39 = vld [vmem:[%s14718_s1 + $0x60] sm:$0xff]  ;;  %v207_v40 = vld [vmem:[%s14720_s3 + $0x58] sm:$0xff]  ;;  %v206_v42 = vld [vmem:[%s14720_s3 + $0x50] sm:$0xff] }
   0xf   :  { %131 = vmatprep.subr.mxu0 %v62_v25  ;;  %285 = vmatpush1.msra.mxu1 %v214_v26  ;;  %v54_v41 = vld [vmem:[%s14718_s1 + $0x58] sm:$0xff]  ;;  %v53_v43 = vld [vmem:[%s14718_s1 + $0x50] sm:$0xff]  ;;  %v205_v44 = vld [vmem:[%s14720_s3 + $0x48] sm:$0xff] }
  0x10   :  { %132 = vmatpush1.msra.mxu0 %v61_v27  ;;  %286 = vmatprep.subr.mxu1 %v213_v28  ;;  %v52_v45 = vld [vmem:[%s14718_s1 + $0x48] sm:$0xff]  ;;  %v204_v46 = vld [vmem:[%s14720_s3 + $0x40] sm:$0xff]  ;;  %v203_v48 = vld [vmem:[%s14720_s3 + $0x38] sm:$0xff] }
  0x11   :  { %133 = vmatprep.subr.mxu0 %v60_v29  ;;  %287 = vmatpush1.msra.mxu1 %v212_v30  ;;  %v51_v47 = vld [vmem:[%s14718_s1 + $0x40] sm:$0xff]  ;;  %v50_v49 = vld [vmem:[%s14718_s1 + $0x38] sm:$0xff]  ;;  %v202_v50 = vld [vmem:[%s14720_s3 + $0x30] sm:$0xff] }
  0x12   :  { %134 = vmatpush1.msra.mxu0 %v59_v31  ;;  %288 = vmatprep.subr.mxu1 %v211_v32  ;;  %v49_v51 = vld [vmem:[%s14718_s1 + $0x30] sm:$0xff]  ;;  %v201_v52 = vld [vmem:[%s14720_s3 + $0x28] sm:$0xff]  ;;  %v200_v54 = vld [vmem:[%s14720_s3 + $0x20] sm:$0xff] }
  0x13   :  { %135 = vmatprep.subr.mxu0 %v58_v33  ;;  %289 = vmatpush1.msra.mxu1 %v210_v34  ;;  %v48_v53 = vld [vmem:[%s14718_s1 + $0x28] sm:$0xff]  ;;  %v47_v55 = vld [vmem:[%s14718_s1 + $0x20] sm:$0xff]  ;;  %v199_v56 = vld [vmem:[%s14720_s3 + $0x18] sm:$0xff] }
  0x14   :  { %136 = vmatpush1.msra.mxu0 %v57_v35  ;;  %290 = vmatprep.subr.mxu1 %v209_v36  ;;  %v46_v57 = vld [vmem:[%s14718_s1 + $0x18] sm:$0xff]  ;;  %v198_v58 = vld [vmem:[%s14720_s3 + $0x10] sm:$0xff]  ;;  %v197_v60 = vld [vmem:[%s14720_s3 + $0x8] sm:$0xff] }
  0x15   :  { %137 = vmatprep.subr.mxu0 %v56_v37  ;;  %291 = vmatpush1.msra.mxu1 %v208_v38  ;;  %v45_v59 = vld [vmem:[%s14718_s1 + $0x10] sm:$0xff]  ;;  %v44_v61 = vld [vmem:[%s14718_s1 + $0x8] sm:$0xff]  ;;  %v196_v62 = vld [vmem:[%s14720_s3] sm:$0xff] }
  0x16   :  { %138 = vmatpush1.msra.mxu0 %v55_v39  ;;  %292 = vmatprep.subr.mxu1 %v207_v40  ;;  %v43_v63 = vld [vmem:[%s14718_s1] sm:$0xff]  ;;  %v259_v0 = vld [vmem:[%s14720_s3 + $0x1f8] sm:$0xff]  ;;  %v258_v2 = vld [vmem:[%s14720_s3 + $0x1f0] sm:$0xff] }
  0x17   :  { %139 = vmatprep.subr.mxu0 %v54_v41  ;;  %293 = vmatpush1.msra.mxu1 %v206_v42  ;;  %v106_v1 = vld [vmem:[%s14718_s1 + $0x1f8] sm:$0xff]  ;;  %v105_v3 = vld [vmem:[%s14718_s1 + $0x1f0] sm:$0xff]  ;;  %v257_v4 = vld [vmem:[%s14720_s3 + $0x1e8] sm:$0xff] }
  0x18   :  { %140 = vmatpush1.msra.mxu0 %v53_v43  ;;  %294 = vmatprep.subr.mxu1 %v205_v44  ;;  %v104_v5 = vld [vmem:[%s14718_s1 + $0x1e8] sm:$0xff]  ;;  %v256_v6 = vld [vmem:[%s14720_s3 + $0x1e0] sm:$0xff]  ;;  %v255_v8 = vld [vmem:[%s14720_s3 + $0x1d8] sm:$0xff] }
  0x19   :  { %141 = vmatprep.subr.mxu0 %v52_v45  ;;  %295 = vmatpush1.msra.mxu1 %v204_v46  ;;  %v103_v7 = vld [vmem:[%s14718_s1 + $0x1e0] sm:$0xff]  ;;  %v102_v9 = vld [vmem:[%s14718_s1 + $0x1d8] sm:$0xff]  ;;  %v254_v10 = vld [vmem:[%s14720_s3 + $0x1d0] sm:$0xff] }
  0x1a   :  { %142 = vmatpush1.msra.mxu0 %v51_v47  ;;  %296 = vmatprep.subr.mxu1 %v203_v48  ;;  %v101_v11 = vld [vmem:[%s14718_s1 + $0x1d0] sm:$0xff]  ;;  %v253_v12 = vld [vmem:[%s14720_s3 + $0x1c8] sm:$0xff]  ;;  %v252_v14 = vld [vmem:[%s14720_s3 + $0x1c0] sm:$0xff] }
  0x1b   :  { %143 = vmatprep.subr.mxu0 %v50_v49  ;;  %297 = vmatpush1.msra.mxu1 %v202_v50  ;;  %v100_v13 = vld [vmem:[%s14718_s1 + $0x1c8] sm:$0xff]  ;;  %v99_v15 = vld [vmem:[%s14718_s1 + $0x1c0] sm:$0xff]  ;;  %v251_v16 = vld [vmem:[%s14720_s3 + $0x1b8] sm:$0xff] }
  0x1c   :  { %144 = vmatpush1.msra.mxu0 %v49_v51  ;;  %298 = vmatprep.subr.mxu1 %v201_v52  ;;  %v98_v17 = vld [vmem:[%s14718_s1 + $0x1b8] sm:$0xff]  ;;  %v250_v18 = vld [vmem:[%s14720_s3 + $0x1b0] sm:$0xff]  ;;  %v249_v20 = vld [vmem:[%s14720_s3 + $0x1a8] sm:$0xff] }
  0x1d   :  { %145 = vmatprep.subr.mxu0 %v48_v53  ;;  %299 = vmatpush1.msra.mxu1 %v200_v54  ;;  %v97_v19 = vld [vmem:[%s14718_s1 + $0x1b0] sm:$0xff]  ;;  %v96_v21 = vld [vmem:[%s14718_s1 + $0x1a8] sm:$0xff]  ;;  %v248_v22 = vld [vmem:[%s14720_s3 + $0x1a0] sm:$0xff] }
  0x1e   :  { %146 = vmatpush1.msra.mxu0 %v47_v55  ;;  %300 = vmatprep.subr.mxu1 %v199_v56  ;;  %v95_v23 = vld [vmem:[%s14718_s1 + $0x1a0] sm:$0xff]  ;;  %v247_v24 = vld [vmem:[%s14720_s3 + $0x198] sm:$0xff]  ;;  %v246_v26 = vld [vmem:[%s14720_s3 + $0x190] sm:$0xff] }
  0x1f   :  { %147 = vmatprep.subr.mxu0 %v46_v57  ;;  %301 = vmatpush1.msra.mxu1 %v198_v58  ;;  %v94_v25 = vld [vmem:[%s14718_s1 + $0x198] sm:$0xff]  ;;  %v93_v27 = vld [vmem:[%s14718_s1 + $0x190] sm:$0xff]  ;;  %v245_v28 = vld [vmem:[%s14720_s3 + $0x188] sm:$0xff] }
  0x20   :  { %148 = vmatpush1.msra.mxu0 %v45_v59  ;;  %302 = vmatprep.subr.mxu1 %v197_v60  ;;  %v92_v29 = vld [vmem:[%s14718_s1 + $0x188] sm:$0xff]  ;;  %v244_v30 = vld [vmem:[%s14720_s3 + $0x180] sm:$0xff]  ;;  %v243_v32 = vld [vmem:[%s14720_s3 + $0x178] sm:$0xff] }
  0x21   :  { %149 = vmatprep.subr.mxu0 %v44_v61  ;;  %303 = vmatpush1.msra.mxu1 %v196_v62  ;;  %v91_v31 = vld [vmem:[%s14718_s1 + $0x180] sm:$0xff]  ;;  %v90_v33 = vld [vmem:[%s14718_s1 + $0x178] sm:$0xff]  ;;  %v242_v34 = vld [vmem:[%s14720_s3 + $0x170] sm:$0xff] }
  0x22   :  { %150 = vmatpush1.msra.mxu0 %v43_v63  ;;  %304 = vmatprep.subr.mxu1 %v259_v0  ;;  %v89_v35 = vld [vmem:[%s14718_s1 + $0x170] sm:$0xff]  ;;  %v241_v36 = vld [vmem:[%s14720_s3 + $0x168] sm:$0xff]  ;;  %v240_v38 = vld [vmem:[%s14720_s3 + $0x160] sm:$0xff] }
  0x23   :  { %151 = vmatprep.subr.mxu0 %v106_v1  ;;  %305 = vmatpush2.msra.mxu1 %v258_v2  ;;  %v88_v37 = vld [vmem:[%s14718_s1 + $0x168] sm:$0xff]  ;;  %v87_v39 = vld [vmem:[%s14718_s1 + $0x160] sm:$0xff]  ;;  %v239_v40 = vld [vmem:[%s14720_s3 + $0x158] sm:$0xff] }
  0x24   :  { %152 = vmatpush2.msra.mxu0 %v105_v3  ;;  %306 = vmatprep.subr.mxu1 %v257_v4  ;;  %v86_v41 = vld [vmem:[%s14718_s1 + $0x158] sm:$0xff]  ;;  %v238_v42 = vld [vmem:[%s14720_s3 + $0x150] sm:$0xff]  ;;  %v237_v44 = vld [vmem:[%s14720_s3 + $0x148] sm:$0xff] }
  0x25   :  { %153 = vmatprep.subr.mxu0 %v104_v5  ;;  %307 = vmatpush2.msra.mxu1 %v256_v6  ;;  %v85_v43 = vld [vmem:[%s14718_s1 + $0x150] sm:$0xff]  ;;  %v84_v45 = vld [vmem:[%s14718_s1 + $0x148] sm:$0xff]  ;;  %v236_v46 = vld [vmem:[%s14720_s3 + $0x140] sm:$0xff] }
  0x26   :  { %154 = vmatpush2.msra.mxu0 %v103_v7  ;;  %308 = vmatprep.subr.mxu1 %v255_v8  ;;  %v83_v47 = vld [vmem:[%s14718_s1 + $0x140] sm:$0xff] }
  0x27   :  { %155 = vmatprep.subr.mxu0 %v102_v9  ;;  %309 = vmatpush2.msra.mxu1 %v254_v10 }
  0x28   :  { %156 = vmatpush2.msra.mxu0 %v101_v11  ;;  %310 = vmatprep.subr.mxu1 %v253_v12 }
  0x29   :  { %157 = vmatprep.subr.mxu0 %v100_v13  ;;  %311 = vmatpush2.msra.mxu1 %v252_v14 }
  0x2a   :  { %158 = vmatpush2.msra.mxu0 %v99_v15  ;;  %312 = vmatprep.subr.mxu1 %v251_v16 }
  0x2b   :  { %159 = vmatprep.subr.mxu0 %v98_v17  ;;  %313 = vmatpush2.msra.mxu1 %v250_v18 }
  0x2c   :  { %160 = vmatpush2.msra.mxu0 %v97_v19  ;;  %314 = vmatprep.subr.mxu1 %v249_v20 }
  0x2d   :  { %161 = vmatprep.subr.mxu0 %v96_v21  ;;  %315 = vmatpush2.msra.mxu1 %v248_v22 }
  0x2e   :  { %162 = vmatpush2.msra.mxu0 %v95_v23  ;;  %316 = vmatprep.subr.mxu1 %v247_v24 }
  0x2f   :  { %163 = vmatprep.subr.mxu0 %v94_v25  ;;  %317 = vmatpush2.msra.mxu1 %v246_v26 }
  0x30   :  { %164 = vmatpush2.msra.mxu0 %v93_v27  ;;  %318 = vmatprep.subr.mxu1 %v245_v28 }
  0x31   :  { %165 = vmatprep.subr.mxu0 %v92_v29  ;;  %319 = vmatpush2.msra.mxu1 %v244_v30 }
  0x32   :  { %166 = vmatpush2.msra.mxu0 %v91_v31  ;;  %320 = vmatprep.subr.mxu1 %v243_v32 }
  0x33   :  { %167 = vmatprep.subr.mxu0 %v90_v33  ;;  %321 = vmatpush2.msra.mxu1 %v242_v34 }
  0x34   :  { %168 = vmatpush2.msra.mxu0 %v89_v35  ;;  %322 = vmatprep.subr.mxu1 %v241_v36 }
  0x35   :  { %169 = vmatprep.subr.mxu0 %v88_v37  ;;  %323 = vmatpush2.msra.mxu1 %v240_v38 }
  0x36   :  { %170 = vmatpush2.msra.mxu0 %v87_v39  ;;  %324 = vmatprep.subr.mxu1 %v239_v40 }
  0x37   :  { %171 = vmatprep.subr.mxu0 %v86_v41 }
  0x38   :  { %16 = vsyncpa [#allocation3], 0  ;;  %325 = vmatpush2.msra.mxu1 %v238_v42  ;;  %172 = vmatpush2.msra.mxu0 %v85_v43  ;;  %v235_v48 = vld [vmem:[%s14720_s3 + $0x138] sm:$0xff]  ;;  %v234_v50 = vld [vmem:[%s14720_s3 + $0x130] sm:$0xff]  ;;  %s11590_s18 = smov 92   ;;  %s11594_s19 = smov 80  }
  0x39   :  { %v82_v49 = vld [vmem:[%s14718_s1 + $0x138] sm:$0xff]  ;;  %326 = vmatprep.subr.mxu1 %v237_v44  ;;  %173 = vmatprep.subr.mxu0 %v84_v45  ;;  %v81_v51 = vld [vmem:[%s14718_s1 + $0x130] sm:$0xff]  ;;  %v233_v52 = vld [vmem:[%s14720_s3 + $0x128] sm:$0xff]  ;;  %s11595_s20 = smov 68   ;;  %s11596_s21 = smov 56   ;;  %vm11598_vm0 = vmmov 0  }
  0x3a   :  { %327 = vmatpush2.msra.mxu1 %v236_v46  ;;  %174 = vmatpush2.msra.mxu0 %v83_v47  ;;  %v80_v53 = vld [vmem:[%s14718_s1 + $0x128] sm:$0xff]  ;;  %v232_v54 = vld [vmem:[%s14720_s3 + $0x120] sm:$0xff]  ;;  %v231_v56 = vld [vmem:[%s14720_s3 + $0x118] sm:$0xff]  ;;  %s11597_s22 = smov 44   ;;  %s11599_s23 = smov 8   ;;  %vm4067_vm1 = vcmask 97280  }
  0x3b   :  { %328 = vmatprep.subr.mxu1 %v235_v48  ;;  %175 = vmatprep.subr.mxu0 %v82_v49  ;;  %v79_v55 = vld [vmem:[%s14718_s1 + $0x120] sm:$0xff]  ;;  %v78_v57 = vld [vmem:[%s14718_s1 + $0x118] sm:$0xff]  ;;  %v230_v58 = vld [vmem:[%s14720_s3 + $0x110] sm:$0xff]  ;;  %s11600_s24 = smov 20   ;;  %s11601_s25 = smov 32   ;;  %vm568_vm2 = vcmask 64512  }
  0x3c   :  { %329 = vmatpush2.msra.mxu1 %v234_v50  ;;  %176 = vmatpush2.msra.mxu0 %v81_v51  ;;  %v77_v59 = vld [vmem:[%s14718_s1 + $0x110] sm:$0xff]  ;;  %v229_v60 = vld [vmem:[%s14720_s3 + $0x108] sm:$0xff]  ;;  %v228_v62 = vld [vmem:[%s14720_s3 + $0x100] sm:$0xff]  ;;  %s11602_s26 = smov 124   ;;  %s11603_s27 = smov 112   ;;  %vm10425_vm3 = vcmask 31744  }
  0x3d   :  { %330 = vmatprep.subr.mxu1 %v233_v52  ;;  %177 = vmatprep.subr.mxu0 %v80_v53  ;;  %v40_v61 = vld [vmem:[%s14717_s0 + $0x8] sm:$0xff]  ;;  %v12073_v0 = vld [vmem:[%s14717_s0] sm:$0xff]  ;;  %v12081_v2 = vld [vmem:[%s14717_s0 + $0x18] sm:$0xff]  ;;  %s11604_s28 = smov 100   ;;  %s11605_s29 = smov 88   ;;  %vm10428_vm4 = vcmask 130048  }
  0x3e   :  { %331 = vmatpush2.msra.mxu1 %v232_v54  ;;  %178 = vmatpush2.msra.mxu0 %v79_v55  ;;  %v76_v63 = vld [vmem:[%s14718_s1 + $0x108] sm:$0xff]  ;;  %v75_v1 = vld [vmem:[%s14718_s1 + $0x100] sm:$0xff]  ;;  %v380_v3 = vld [vmem:[%s14722_s5 + $0xf8] sm:$0xff]  ;;  %s11606_s30 = smov 76   ;;  %s11611_s15 = smov 108   ;;  %vm10431_vm5 = vcmask 228352  }
  0x3f   :  { %332 = vmatprep.subr.mxu1 %v231_v56  ;;  %179 = vmatprep.subr.mxu0 %v78_v57  ;;  %v379_v4 = vld [vmem:[%s14722_s5 + $0xf0] sm:$0xff]  ;;  %v378_v6 = vld [vmem:[%s14722_s5 + $0xe8] sm:$0xff]  ;;  %v377_v7 = vld [vmem:[%s14722_s5 + $0xe0] sm:$0xff]  ;;  %s11613_s12 = smov 28   ;;  %s11616_s3 = smov 24   ;;  %vm10434_vm6 = vcmask 326656  }
  0x40   :  { %333 = vmatpush2.msra.mxu1 %v230_v58  ;;  %180 = vmatpush2.msra.mxu0 %v77_v59  ;;  %v12094_v5 = vld [vmem:[%s14717_s0 + $0x10] sm:$0xff]  ;;  %v376_v8 = vld [vmem:[%s14722_s5 + $0xd8] sm:$0xff]  ;;  %v374_v10 = vld [vmem:[%s14722_s5 + $0xc8] sm:$0xff]  ;;  %s11617_s16 = smov 12   ;;  %s11620_s1 = smov 48   ;;  %vm10437_vm7 = vcmask 424960  }
  0x41   :  { %334 = vmatprep.subr.mxu1 %v229_v60  ;;  %336 = vmatprep.mubr.f32.mxu1 %v40_v61  ;;  %v375_v9 = vld [vmem:[%s14722_s5 + $0xd0] sm:$0xff]  ;;  %v373_v11 = vld [vmem:[%s14722_s5 + $0xc0] sm:$0xff]  ;;  %v372_v12 = vld [vmem:[%s14722_s5 + $0xb8] sm:$0xff]  ;;  %vm10500_vm8 = vcmask 523264   ;;  %vm10398_vm9 = vcmask 195584   ;;  %vm10401_vm10 = vcmask 293888  }
  0x42   :  { %335 = vmatpush2.msra.mxu1 %v228_v62  ;;  %181 = vmatprep.subr.mxu0 %v76_v63  ;;  %v371_v13 = vld [vmem:[%s14722_s5 + $0xb0] sm:$0xff]  ;;  %v370_v14 = vld [vmem:[%s14722_s5 + $0xa8] sm:$0xff]  ;;  %v369_v15 = vld [vmem:[%s14722_s5 + $0xa0] sm:$0xff]  ;;  %vm10404_vm11 = vcmask 392192   ;;  %vm10407_vm12 = vcmask 490496   ;;  %vm10410_vm13 = vcmask 588800  }
  0x43   :  { %337 = vmatmul.mubr.f32.vlgmr.msra.gmra.mxu1 %v12073_v0  ;;  %182 = vmatpush2.msra.mxu0 %v75_v1  ;;  %v368_v16 = vld [vmem:[%s14722_s5 + $0x98] sm:$0xff]  ;;  %v367_v17 = vld [vmem:[%s14722_s5 + $0x90] sm:$0xff]  ;;  %v366_v18 = vld [vmem:[%s14722_s5 + $0x88] sm:$0xff]  ;;  %vm10413_vm14 = vcmask 687104   ;;  %vm10416_vm15 = vcmask 785408  }
  0x44   :  { %183 = vmatprep.mubr.f32.mxu0 %v40_v61  ;;  %342 = vmatprep.mubr.f32.mxu1 %v12081_v2  ;;  %v365_v19 = vld [vmem:[%s14722_s5 + $0x80] sm:$0xff]  ;;  %v364_v20 = vld [vmem:[%s14722_s5 + $0x78] sm:$0xff]  ;;  %v363_v21 = vld [vmem:[%s14722_s5 + $0x70] sm:$0xff] }
  0x45   :  { %184 = vmatmul.mubr.f32.vlgmr.msra.gmra.mxu0 %v12073_v0  ;;  %425 = vmatprep.subr.mxu0 %v380_v3  ;;  %v362_v22 = vld [vmem:[%s14722_s5 + $0x68] sm:$0xff]  ;;  %v361_v23 = vld [vmem:[%s14722_s5 + $0x60] sm:$0xff]  ;;  %v360_v24 = vld [vmem:[%s14722_s5 + $0x58] sm:$0xff] }
  0x46   :  { %189 = vmatprep.mubr.f32.mxu0 %v12081_v2  ;;  %426 = vmatpush1.msra.mxu0 %v379_v4  ;;  %v359_v25 = vld [vmem:[%s14722_s5 + $0x50] sm:$0xff]  ;;  %v358_v26 = vld [vmem:[%s14722_s5 + $0x48] sm:$0xff]  ;;  %v357_v27 = vld [vmem:[%s14722_s5 + $0x40] sm:$0xff] }
  0x47   :  { %343 = vmatmul.mubr.f32.gmra.mxu1 %v12094_v5  ;;  %427 = vmatprep.subr.mxu0 %v378_v6  ;;  %v356_v28 = vld [vmem:[%s14722_s5 + $0x38] sm:$0xff]  ;;  %v355_v29 = vld [vmem:[%s14722_s5 + $0x30] sm:$0xff]  ;;  %v354_v30 = vld [vmem:[%s14722_s5 + $0x28] sm:$0xff] }
  0x48   :  { %428 = vmatpush1.msra.mxu0 %v377_v7  ;;  %v353_v31 = vld [vmem:[%s14722_s5 + $0x20] sm:$0xff]  ;;  %v352_v32 = vld [vmem:[%s14722_s5 + $0x18] sm:$0xff]  ;;  %v351_v33 = vld [vmem:[%s14722_s5 + $0x10] sm:$0xff]  ;;  %v14729_v7 = vlaneseq }
  0x49   :  { %190 = vmatmul.mubr.f32.gmra.mxu0 %v12094_v5  ;;  %429 = vmatprep.subr.mxu0 %v376_v8  ;;  %v350_v34 = vld [vmem:[%s14722_s5 + $0x8] sm:$0xff]  ;;  %v349_v35 = vld [vmem:[%s14722_s5] sm:$0xff]  ;;  %v412_v36 = vld [vmem:[%s14722_s5 + $0x1f8] sm:$0xff] }
  0x4a   :  { %430 = vmatpush1.msra.mxu0 %v375_v9  ;;  %489 = vmatprep.mubr.f32.mxu0 %v40_v61  ;;  %v411_v37 = vld [vmem:[%s14722_s5 + $0x1f0] sm:$0xff]  ;;  %v410_v38 = vld [vmem:[%s14722_s5 + $0x1e8] sm:$0xff]  ;;  %v409_v39 = vld [vmem:[%s14722_s5 + $0x1e0] sm:$0xff]  ;;  %v12290_v8 = vshrl.u32 %v14729_v7, 7 }
  0x4b   :  { %431 = vmatprep.subr.mxu0 %v374_v10  ;;  %v408_v40 = vld [vmem:[%s14722_s5 + $0x1d8] sm:$0xff]  ;;  %v407_v41 = vld [vmem:[%s14722_s5 + $0x1d0] sm:$0xff]  ;;  %v406_v42 = vld [vmem:[%s14722_s5 + $0x1c8] sm:$0xff] }
  0x4c   :  { %432 = vmatpush1.msra.mxu0 %v373_v11  ;;  %v405_v43 = vld [vmem:[%s14722_s5 + $0x1c0] sm:$0xff]  ;;  %v404_v44 = vld [vmem:[%s14722_s5 + $0x1b8] sm:$0xff]  ;;  %v403_v45 = vld [vmem:[%s14722_s5 + $0x1b0] sm:$0xff]  ;;  %v12293_v9 = vsub.s32 0, %v12290_v8 }
  0x4d   :  { %433 = vmatprep.subr.mxu0 %v372_v12  ;;  %v402_v46 = vld [vmem:[%s14722_s5 + $0x1a8] sm:$0xff]  ;;  %v401_v47 = vld [vmem:[%s14722_s5 + $0x1a0] sm:$0xff]  ;;  %v400_v48 = vld [vmem:[%s14722_s5 + $0x198] sm:$0xff] }
  0x4e   :  { %434 = vmatpush1.msra.mxu0 %v371_v13  ;;  %v399_v49 = vld [vmem:[%s14722_s5 + $0x190] sm:$0xff]  ;;  %v398_v50 = vld [vmem:[%s14722_s5 + $0x188] sm:$0xff]  ;;  %v397_v51 = vld [vmem:[%s14722_s5 + $0x180] sm:$0xff]  ;;  %14768 = vst [vmem:[#allocation5_spill] sm:$0xff] %v12293_v9 }
  0x4f   :  { %435 = vmatprep.subr.mxu0 %v370_v14  ;;  %v396_v52 = vld [vmem:[%s14722_s5 + $0x178] sm:$0xff]  ;;  %v395_v53 = vld [vmem:[%s14722_s5 + $0x170] sm:$0xff]  ;;  %v394_v54 = vld [vmem:[%s14722_s5 + $0x168] sm:$0xff] }
  0x50   :  { %436 = vmatpush1.msra.mxu0 %v369_v15  ;;  %v393_v55 = vld [vmem:[%s14722_s5 + $0x160] sm:$0xff]  ;;  %v392_v56 = vld [vmem:[%s14722_s5 + $0x158] sm:$0xff]  ;;  %v391_v57 = vld [vmem:[%s14722_s5 + $0x150] sm:$0xff]  ;;  %v14730_v15 = vmov 0.0  }
  0x51   :  { %437 = vmatprep.subr.mxu0 %v368_v16  ;;  %v390_v58 = vld [vmem:[%s14722_s5 + $0x148] sm:$0xff]  ;;  %v389_v59 = vld [vmem:[%s14722_s5 + $0x140] sm:$0xff]  ;;  %v388_v60 = vld [vmem:[%s14722_s5 + $0x138] sm:$0xff]  ;;  %11035 = vmatprep.subr.mxu1 %v14730_v15  ;;  %v12348_v16 = vsub.s32 1, %v12290_v8 }
  0x52   :  { %438 = vmatpush1.msra.mxu0 %v367_v17  ;;  %v387_v61 = vld [vmem:[%s14722_s5 + $0x130] sm:$0xff]  ;;  %v386_v62 = vld [vmem:[%s14722_s5 + $0x128] sm:$0xff]  ;;  %v385_v63 = vld [vmem:[%s14722_s5 + $0x120] sm:$0xff]  ;;  %11037 = vmatprep.mubr.msk.f32.mxu1 %vm11598_vm0, %v14730_v15 }
  0x53   :  { %439 = vmatprep.subr.mxu0 %v366_v18  ;;  %v384_v1 = vld [vmem:[%s14722_s5 + $0x118] sm:$0xff]  ;;  %v383_v3 = vld [vmem:[%s14722_s5 + $0x110] sm:$0xff]  ;;  %v382_v4 = vld [vmem:[%s14722_s5 + $0x108] sm:$0xff]  ;;  %14769 = vst [vmem:[#allocation6_spill] sm:$0xff] %v12348_v16 }
  0x54   :  { %440 = vmatpush1.msra.mxu0 %v365_v19  ;;  %v381_v6 = vld [vmem:[%s14722_s5 + $0x100] sm:$0xff] }
  0x55   :  { %441 = vmatprep.subr.mxu0 %v364_v20  ;;  %v260_v10 = vld [vmem:[%s14721_s4] sm:$0x3]  ;;  %s11591_s4 = smov 116  }
  0x56   :  { %442 = vmatpush1.msra.mxu0 %v363_v21  ;;  %v107_v11 = vld [vmem:[%s14719_s2] sm:$0x3]  ;;  %s11592_s2 = smov 104   ;;  %v269_v17 = vrot.slane %v260_v10, %v12348_v16 }
  0x57   :  { %443 = vmatprep.subr.mxu0 %v362_v22  ;;  %v116_v20 = vrot.slane %v107_v11, %v12348_v16 }
  0x58   :  { %444 = vmatpush1.msra.mxu0 %v361_v23 }
  0x59   :  { %445 = vmatprep.subr.mxu0 %v360_v24 }
  0x5a   :  { %446 = vmatpush1.msra.mxu0 %v359_v25 }
  0x5b   :  { %447 = vmatprep.subr.mxu0 %v358_v26 }
  0x5c   :  { %448 = vmatpush1.msra.mxu0 %v357_v27 }
  0x5d   :  { %449 = vmatprep.subr.mxu0 %v356_v28 }
  0x5e   :  { %450 = vmatpush1.msra.mxu0 %v355_v29 }
  0x5f   :  { %451 = vmatprep.subr.mxu0 %v354_v30 }
  0x60   :  { %452 = vmatpush1.msra.mxu0 %v353_v31  ;;  %v11607_v31 = vmov 1983009808  }
  0x61   :  { %453 = vmatprep.subr.mxu0 %v352_v32  ;;  %v606_v32 = vunpack.c.l.s4 %v11607_v31 }
  0x62   :  { %454 = vmatpush1.msra.mxu0 %v351_v33  ;;  %v11608_v33 = vmov 1934713408  }
  0x63   :  { %455 = vmatprep.subr.mxu0 %v350_v34  ;;  %v670_v34 = vunpack.c.l.s4 %v11608_v33 }
  0x64   :  { %456 = vmatpush1.msra.mxu0 %v349_v35  ;;  %v607_v35 = vunpack.c.0.s8 %v606_v32 }
  0x65   :  { %457 = vmatprep.subr.mxu0 %v412_v36 }
  0x66   :  { %458 = vmatpush2.msra.mxu0 %v411_v37 }
  0x67   :  { %459 = vmatprep.subr.mxu0 %v410_v38  ;;  %v671_v38 = vunpack.c.0.s8 %v670_v34 }
  0x68   :  { %460 = vmatpush2.msra.mxu0 %v409_v39  ;;  %v12431_v39 = vsub.s32 %v607_v35, %v12290_v8 }
  0x69   :  { %461 = vmatprep.subr.mxu0 %v408_v40 }
  0x6a   :  { %462 = vmatpush2.msra.mxu0 %v407_v41 }
  0x6b   :  { %463 = vmatprep.subr.mxu0 %v406_v42  ;;  %v413_v42 = vld [vmem:[%s14723_s6] sm:$0x3] }
  0x6c   :  { %464 = vmatpush2.msra.mxu0 %v405_v43 }
  0x6d   :  { %465 = vmatprep.subr.mxu0 %v404_v44 }
  0x6e   :  { %466 = vmatpush2.msra.mxu0 %v403_v45  ;;  %v12437_v45 = vrot.slane %v413_v42, %v12293_v9 }
  0x6f   :  { %467 = vmatprep.subr.mxu0 %v402_v46 }
  0x70   :  { %468 = vmatpush2.msra.mxu0 %v401_v47 }
  0x71   :  { %469 = vmatprep.subr.mxu0 %v400_v48 }
  0x72   :  { %470 = vmatpush2.msra.mxu0 %v399_v49  ;;  %v12442_v49 = vsub.s32 %v671_v38, %v12290_v8 }
  0x73   :  { %471 = vmatprep.subr.mxu0 %v398_v50 }
  0x74   :  { %472 = vmatpush2.msra.mxu0 %v397_v51  ;;  %14770 = vst [vmem:[#allocation7_spill] sm:$0xff] %v12442_v49 }
  0x75   :  { %473 = vmatprep.subr.mxu0 %v396_v52 }
  0x76   :  { %474 = vmatpush2.msra.mxu0 %v395_v53 }
  0x77   :  { %475 = vmatprep.subr.mxu0 %v394_v54 }
  0x78   :  { %476 = vmatpush2.msra.mxu0 %v393_v55 }
  0x79   :  { %477 = vmatprep.subr.mxu0 %v392_v56 }
  0x7a   :  { %478 = vmatpush2.msra.mxu0 %v391_v57 }
  0x7b   :  { %479 = vmatprep.subr.mxu0 %v390_v58 }
  0x7c   :  { %480 = vmatpush2.msra.mxu0 %v389_v59 }
  0x7d   :  { %481 = vmatprep.subr.mxu0 %v388_v60 }
  0x7e   :  { %482 = vmatpush2.msra.mxu0 %v387_v61 }
  0x7f   :  { %483 = vmatprep.subr.mxu0 %v386_v62 }
  0x80   :  { %484 = vmatpush2.msra.mxu0 %v385_v63 }
  0x81   :  { %485 = vmatprep.subr.mxu0 %v384_v1 }
  0x82   :  { %486 = vmatpush2.msra.mxu0 %v383_v3 }
  0x83   :  { %487 = vmatprep.subr.mxu0 %v382_v4 }
  0x84   :  { %488 = vmatpush2.msra.mxu0 %v381_v6 }
  0x85   :  { %490 = vmatmul.mubr.f32.vlgmr.msra.gmra.mxu0 %v12073_v0  ;;  %v12302_v0 = vrot.slane %v260_v10, %v12293_v9  ;;  %11175 = vmatprep.subr.mxu0 %v14730_v15 }
  0x86   :  { %495 = vmatprep.mubr.f32.mxu0 %v12081_v2  ;;  %v12305_v2 = vrot.slane %v107_v11, %v12293_v9 }
  0x89   :  { %496 = vmatmul.mubr.f32.gmra.mxu0 %v12094_v5 }
  0x8a   :  { %11177 = vmatprep.mubr.msk.f32.mxu0 %vm11598_vm0, %v14730_v15 }
 0x103   :  { %v338_v5 = vpop.f32.mrf.mxu1 }
 0x104   :  { %v12308_v12 = vadd.f32 %v338_v5, %v12302_v0 }
 0x105   :  { %v185_v13 = vpop.f32.mrf.mxu0  ;;  %v340_v18 = vpop.f32.mrf.mxu1 }
 0x106   :  { %v12311_v14 = vadd.f32 %v185_v13, %v12305_v2  ;;  %1705 = vrot.lane.b32.xlu1 %v12308_v12, %s11590_s18  ;;  %1693 = vrot.lane.b32.xlu0 %v12308_v12, %s11591_s4  ;;  %v341_v19 = vadd.f32 %v340_v18, %v269_v17 }
 0x107   :  { %v187_v21 = vpop.f32.mrf.mxu0  ;;  %v344_v23 = vpop.f32.mrf.mxu1 }
 0x108   :  { %v188_v22 = vadd.f32 %v187_v21, %v116_v20  ;;  %v12375_v24 = vadd.f32 %v344_v23, %v12302_v0 }
 0x109   :  { %v191_v25 = vpop.f32.mrf.mxu0  ;;  %v346_v27 = vpop.f32.mrf.mxu1 }
 0x10a   :  { %1699 = vrot.lane.b32.xlu0 %v12308_v12, %s11592_s2  ;;  %504 = vrot.lane.b32.xlu1 %v12311_v14, %s11591_s4  ;;  %v12380_v26 = vadd.f32 %v191_v25, %v12305_v2  ;;  %v347_v28 = vadd.f32 %v346_v27, %v269_v17 }
 0x10b   :  { %v193_v29 = vpop.f32.mrf.mxu0 }
 0x10c   :  { %v194_v30 = vadd.f32 %v193_v29, %v116_v20 }
 0x10e   :  { %510 = vrot.lane.b32.xlu0 %v12311_v14, %s11592_s2  ;;  %516 = vrot.lane.b32.xlu1 %v12311_v14, %s11590_s18 }
 0x112   :  { %1711 = vrot.lane.b32.xlu0 %v12308_v12, %s11594_s19  ;;  %1717 = vrot.lane.b32.xlu1 %v12308_v12, %s11595_s20 }
 0x116   :  { %1723 = vrot.lane.b32.xlu0 %v12308_v12, %s11596_s21  ;;  %1729 = vrot.lane.b32.xlu1 %v12308_v12, %s11597_s22 }
 0x11a   :  { %522 = vrot.lane.b32.xlu0 %v12311_v14, %s11594_s19  ;;  %528 = vrot.lane.b32.xlu1 %v12311_v14, %s11595_s20 }
 0x11e   :  { %534 = vrot.lane.b32.xlu0 %v12311_v14, %s11596_s21  ;;  %540 = vrot.lane.b32.xlu1 %v12311_v14, %s11597_s22 }
 0x122   :  { %1749 = vrot.lane.b32.xlu0 %v12308_v12, %s11599_s23  ;;  %1741 = vrot.lane.b32.xlu1 %v12308_v12, %s11600_s24 }
 0x126   :  { %1735 = vrot.lane.b32.xlu0 %v12308_v12, %s11601_s25  ;;  %560 = vrot.lane.b32.xlu1 %v12311_v14, %s11599_s23 }
 0x12a   :  { %1761 = vrot.lane.b32.xlu0 %v341_v19, %s11602_s26  ;;  %546 = vrot.lane.b32.xlu1 %v12311_v14, %s11601_s25 }
 0x12e   :  { %562 = vrot.lane.b32.xlu0 %v188_v22, %s11599_s23  ;;  %1751 = vrot.lane.b32.xlu1 %v341_v19, %s11599_s23 }
 0x132   :  { %552 = vrot.lane.b32.xlu0 %v12311_v14, %s11600_s24  ;;  %573 = vrot.lane.b32.xlu1 %v188_v22, %s11602_s26 }
 0x136   :  { %1767 = vrot.lane.b32.xlu0 %v341_v19, %s11603_s27  ;;  %1773 = vrot.lane.b32.xlu1 %v341_v19, %s11604_s28 }
 0x13a   :  { %1779 = vrot.lane.b32.xlu0 %v341_v19, %s11605_s29  ;;  %1785 = vrot.lane.b32.xlu1 %v341_v19, %s11606_s30 }
 0x13e   :  { %579 = vrot.lane.b32.xlu0 %v188_v22, %s11603_s27  ;;  %585 = vrot.lane.b32.xlu1 %v188_v22, %s11604_s28 }
 0x142   :  { %591 = vrot.lane.b32.xlu0 %v188_v22, %s11605_s29  ;;  %597 = vrot.lane.b32.xlu1 %v188_v22, %s11606_s30 }
 0x145   :  { %v491_v48 = vpop.f32.mrf.mxu0 }
 0x146   :  { %1695 = vrot.lane.b32.xlu0 %v12375_v24, %s11591_s4  ;;  %1701 = vrot.lane.b32.xlu1 %v12375_v24, %s11592_s2  ;;  %v12451_v56 = vadd.f32 %v491_v48, %v12437_v45 }
 0x14a   :  { %1707 = vrot.lane.b32.xlu0 %v12375_v24, %s11590_s18  ;;  %506 = vrot.lane.b32.xlu1 %v12380_v26, %s11591_s4 }
 0x14e   :  { %512 = vrot.lane.b32.xlu0 %v12380_v26, %s11592_s2  ;;  %518 = vrot.lane.b32.xlu1 %v12380_v26, %s11590_s18 }
 0x152   :  { %1713 = vrot.lane.b32.xlu0 %v12375_v24, %s11594_s19  ;;  %1719 = vrot.lane.b32.xlu1 %v12375_v24, %s11595_s20 }
 0x156   :  { %1725 = vrot.lane.b32.xlu0 %v12375_v24, %s11596_s21  ;;  %1731 = vrot.lane.b32.xlu1 %v12375_v24, %s11597_s22 }
 0x15a   :  { %524 = vrot.lane.b32.xlu0 %v12380_v26, %s11594_s19  ;;  %530 = vrot.lane.b32.xlu1 %v12380_v26, %s11595_s20 }
 0x15e   :  { %536 = vrot.lane.b32.xlu0 %v12380_v26, %s11596_s21  ;;  %542 = vrot.lane.b32.xlu1 %v12380_v26, %s11597_s22 }
 0x162   :  { %1753 = vrot.lane.b32.xlu0 %v12375_v24, %s11599_s23  ;;  %1743 = vrot.lane.b32.xlu1 %v12375_v24, %s11600_s24 }
 0x166   :  { %1737 = vrot.lane.b32.xlu0 %v12375_v24, %s11601_s25  ;;  %564 = vrot.lane.b32.xlu1 %v12380_v26, %s11599_s23 }
 0x16a   :  { %1763 = vrot.lane.b32.xlu0 %v347_v28, %s11602_s26  ;;  %548 = vrot.lane.b32.xlu1 %v12380_v26, %s11601_s25 }
 0x16e   :  { %566 = vrot.lane.b32.xlu0 %v194_v30, %s11599_s23  ;;  %1755 = vrot.lane.b32.xlu1 %v347_v28, %s11599_s23 }
 0x172   :  { %554 = vrot.lane.b32.xlu0 %v12380_v26, %s11600_s24  ;;  %575 = vrot.lane.b32.xlu1 %v194_v30, %s11602_s26 }
 0x176   :  { %1769 = vrot.lane.b32.xlu0 %v347_v28, %s11603_s27  ;;  %1775 = vrot.lane.b32.xlu1 %v347_v28, %s11604_s28 }
 0x178   :  { %v1706_v36 = vpop.permute.xlu1 %1705  ;;  %v1694_v37 = vpop.permute.xlu0 %1693 }
 0x179   :  { %v1807_v40 = vcombine.low %v1694_v37, %v1706_v36  ;;  %v1808_v41 = vcombine.high %v1694_v37, %v1706_v36 }
 0x17a   :  { %1781 = vrot.lane.b32.xlu0 %v347_v28, %s11605_s29  ;;  %1787 = vrot.lane.b32.xlu1 %v347_v28, %s11606_s30 }
 0x17b   :  { %v1815_v50 = vrot.slane %v1807_v40, %v12431_v39  ;;  %v1822_v51 = vrot.slane %v1808_v41, %v12431_v39 }
 0x17c   :  { %v1700_v43 = vpop.permute.xlu0 %1699  ;;  %v505_v44 = vpop.permute.xlu1 %504 }
 0x17d   :  { %v1791_v46 = vcombine.low %v12308_v12, %v1700_v43  ;;  %v1792_v47 = vcombine.high %v12308_v12, %v1700_v43 }
 0x17e   :  { %581 = vrot.lane.b32.xlu0 %v194_v30, %s11603_s27  ;;  %587 = vrot.lane.b32.xlu1 %v194_v30, %s11604_s28 }
 0x17f   :  { %v1799_v52 = vrot.slane %v1791_v46, %v12431_v39  ;;  %v1806_v53 = vrot.slane %v1792_v47, %v12431_v39 }
 0x180   :  { %v511_v54 = vpop.permute.xlu0 %510  ;;  %v517_v55 = vpop.permute.xlu1 %516 }
 0x181   :  { %v1855_v57 = vcombine.low %v1799_v52, %v1815_v50  ;;  %v1856_v58 = vcombine.high %v1799_v52, %v1815_v50  ;;  %v1871_v59 = vcombine.low %v1806_v53, %v1822_v51  ;;  %v1872_v60 = vcombine.high %v1806_v53, %v1822_v51 }
 0x182   :  { %v603_v61 = vcombine.low %v12311_v14, %v511_v54  ;;  %v604_v62 = vcombine.high %v12311_v14, %v511_v54  ;;  %v619_v63 = vcombine.low %v505_v44, %v517_v55  ;;  %v620_v1 = vcombine.high %v505_v44, %v517_v55  ;;  %593 = vrot.lane.b32.xlu0 %v194_v30, %s11605_s29 }
 0x183   :  { %v1863_v3 = vrot.slane %v1855_v57, %v12442_v49  ;;  %v1870_v4 = vrot.slane %v1856_v58, %v12442_v49  ;;  %v1879_v6 = vrot.slane %v1871_v59, %v12442_v49  ;;  %v1886_v8 = vrot.slane %v1872_v60, %v12442_v49  ;;  %599 = vrot.lane.b32.xlu1 %v194_v30, %s11606_s30 }
 0x184   :  { %v611_v10 = vrot.slane %v603_v61, %v12431_v39  ;;  %v618_v11 = vrot.slane %v604_v62, %v12431_v39  ;;  %v627_v0 = vrot.slane %v619_v63, %v12431_v39  ;;  %v634_v2 = vrot.slane %v620_v1, %v12431_v39  ;;  %v1712_v5 = vpop.permute.xlu0 %1711  ;;  %v1718_v12 = vpop.permute.xlu1 %1717 }
 0x185   :  { %v10713_v13 = vcombine.low %v1863_v3, %v1870_v4  ;;  %v10715_v14 = vcombine.high %v1863_v3, %v1870_v4  ;;  %v10717_v17 = vcombine.low %v1879_v6, %v1886_v8  ;;  %v10719_v18 = vcombine.high %v1879_v6, %v1886_v8 }
 0x186   :  { %v667_v19 = vcombine.low %v611_v10, %v627_v0  ;;  %v668_v20 = vcombine.high %v611_v10, %v627_v0  ;;  %v683_v21 = vcombine.low %v618_v11, %v634_v2  ;;  %v684_v22 = vcombine.high %v618_v11, %v634_v2  ;;  %2887 = vrot.lane.b32.xlu0 %v12451_v56, %s11592_s2 }
 0x187   :  { %v12468_v23 = vrot.slane %v10713_v13, %v12431_v39  ;;  %v12471_v25 = vrot.slane %v10715_v14, %v12431_v39  ;;  %v12474_v27 = vrot.slane %v10717_v17, %v12431_v39  ;;  %v12477_v28 = vrot.slane %v10719_v18, %v12431_v39  ;;  %2881 = vrot.lane.b32.xlu1 %v12451_v56, %s11591_s4 }
 0x188   :  { %v675_v29 = vrot.slane %v667_v19, %v12442_v49  ;;  %v682_v30 = vrot.slane %v668_v20, %v12442_v49  ;;  %v691_v31 = vrot.slane %v683_v21, %v12442_v49  ;;  %v698_v32 = vrot.slane %v684_v22, %v12442_v49  ;;  %v1724_v33 = vpop.permute.xlu0 %1723  ;;  %v1730_v34 = vpop.permute.xlu1 %1729 }
 0x189   :  { %v2399_v35 = vcombine.low %v12468_v23, %v12471_v25  ;;  %v2400_v36 = vcombine.high %v12468_v23, %v12471_v25  ;;  %v2431_v37 = vcombine.low %v12474_v27, %v12477_v28  ;;  %v2432_v38 = vcombine.high %v12474_v27, %v12477_v28 }
 0x18a   :  { %v10681_v40 = vcombine.low %v675_v29, %v682_v30  ;;  %v10683_v41 = vcombine.high %v675_v29, %v682_v30  ;;  %v10685_v42 = vcombine.low %v691_v31, %v698_v32  ;;  %v10687_v43 = vcombine.high %v691_v31, %v698_v32  ;;  %2899 = vrot.lane.b32.xlu0 %v12451_v56, %s11594_s19 }
 0x18b   :  { %v1823_v44 = vcombine.low %v1712_v5, %v1724_v33  ;;  %v1824_v46 = vcombine.high %v1712_v5, %v1724_v33  ;;  %v1839_v47 = vcombine.low %v1718_v12, %v1730_v34  ;;  %v1840_v48 = vcombine.high %v1718_v12, %v1730_v34  ;;  %2893 = vrot.lane.b32.xlu1 %v12451_v56, %s11590_s18 }
 0x18c   :  { %v12498_v50 = vrot.slane %v10681_v40, %v12431_v39  ;;  %v12501_v51 = vrot.slane %v10683_v41, %v12431_v39  ;;  %v12504_v52 = vrot.slane %v10685_v42, %v12431_v39  ;;  %v12507_v53 = vrot.slane %v10687_v43, %v12431_v39  ;;  %v523_v54 = vpop.permute.xlu0 %522  ;;  %v529_v55 = vpop.permute.xlu1 %528 }
 0x18d   :  { %v1831_v57 = vrot.slane %v1823_v44, %v12431_v39  ;;  %v1838_v58 = vrot.slane %v1824_v46, %v12431_v39  ;;  %v1847_v59 = vrot.slane %v1839_v47, %v12431_v39  ;;  %v1854_v60 = vrot.slane %v1840_v48, %v12431_v39 }
 0x18e   :  { %v1211_v61 = vcombine.low %v12498_v50, %v12501_v51  ;;  %v1212_v62 = vcombine.high %v12498_v50, %v12501_v51  ;;  %v1243_v63 = vcombine.low %v12504_v52, %v12507_v53  ;;  %v1244_v1 = vcombine.high %v12504_v52, %v12507_v53  ;;  %2917 = vrot.lane.b32.xlu0 %v12451_v56, %s11597_s22 }
 0x18f   :  { %v1887_v3 = vcombine.low %v1831_v57, %v1847_v59  ;;  %v1888_v4 = vcombine.high %v1831_v57, %v1847_v59  ;;  %v1903_v6 = vcombine.low %v1838_v58, %v1854_v60  ;;  %v1904_v8 = vcombine.high %v1838_v58, %v1854_v60  ;;  %2905 = vrot.lane.b32.xlu1 %v12451_v56, %s11595_s20 }
 0x190   :  { %v12526_v10 = vrot.slane %v1211_v61, %v12442_v49  ;;  %v12529_v11 = vrot.slane %v1243_v63, %v12442_v49  ;;  %v2407_v0 = vrot.slane %v2399_v35, %v12442_v49  ;;  %v2439_v2 = vrot.slane %v2431_v37, %v12442_v49  ;;  %v535_v5 = vpop.permute.xlu0 %534  ;;  %v541_v12 = vpop.permute.xlu1 %540 }
 0x191   :  { %v1895_v13 = vrot.slane %v1887_v3, %v12442_v49  ;;  %v1902_v14 = vrot.slane %v1888_v4, %v12442_v49  ;;  %v1911_v17 = vrot.slane %v1903_v6, %v12442_v49  ;;  %v1918_v18 = vrot.slane %v1904_v8, %v12442_v49 }
 0x192   :  { %v2463_v19 = vcombine.low %v2407_v0, %v2439_v2  ;;  %v635_v20 = vcombine.low %v523_v54, %v535_v5  ;;  %v636_v21 = vcombine.high %v523_v54, %v535_v5  ;;  %v651_v22 = vcombine.low %v529_v55, %v541_v12  ;;  %2937 = vrot.lane.b32.xlu0 %v12451_v56, %s11599_s23 }
 0x193   :  { %v10714_v29 = vcombine.low %v1895_v13, %v1902_v14  ;;  %v10716_v30 = vcombine.high %v1895_v13, %v1902_v14  ;;  %v10718_v31 = vcombine.low %v1911_v17, %v1918_v18  ;;  %v10720_v32 = vcombine.high %v1911_v17, %v1918_v18  ;;  %2911 = vrot.lane.b32.xlu1 %v12451_v56, %s11596_s21 }
 0x194   :  { %11036 = vmatpush3.xpose.msk.msra.mxu1 %vm4067_vm1, %v2463_v19  ;;  %v643_v33 = vrot.slane %v635_v20, %v12431_v39  ;;  %v650_v34 = vrot.slane %v636_v21, %v12431_v39  ;;  %v652_v35 = vcombine.high %v529_v55, %v541_v12  ;;  %v659_v37 = vrot.slane %v651_v22, %v12431_v39  ;;  %v12545_v40 = vpop.permute.xlu0 %1749  ;;  %v1742_v41 = vpop.permute.xlu1 %1741 }
 0x195   :  { %v12548_v42 = vrot.slane %v10714_v29, %v12431_v39  ;;  %v12551_v43 = vrot.slane %v10716_v30, %v12431_v39  ;;  %v12554_v44 = vrot.slane %v10718_v31, %v12431_v39  ;;  %v12557_v46 = vrot.slane %v10720_v32, %v12431_v39  ;;  %11040 = vmatprep.subr.mxu1 %v14730_v15 }
 0x196   :  { %v666_v47 = vrot.slane %v652_v35, %v12431_v39  ;;  %v699_v48 = vcombine.low %v643_v33, %v659_v37  ;;  %v700_v54 = vcombine.high %v643_v33, %v659_v37  ;;  %v1275_v55 = vcombine.low %v12526_v10, %v12529_v11  ;;  %2923 = vrot.lane.b32.xlu0 %v12451_v56, %s11601_s25 }
 0x197   :  { %v2415_v57 = vcombine.low %v12548_v42, %v12551_v43  ;;  %v2416_v58 = vcombine.high %v12548_v42, %v12551_v43  ;;  %v2447_v59 = vcombine.low %v12554_v44, %v12557_v46  ;;  %v2448_v60 = vcombine.high %v12554_v44, %v12557_v46  ;;  %2929 = vrot.lane.b32.xlu1 %v12451_v56, %s11600_s24 }
 0x198   :  { %v707_v61 = vrot.slane %v699_v48, %v12442_v49  ;;  %v714_v63 = vrot.slane %v700_v54, %v12442_v49  ;;  %v715_v3 = vcombine.low %v650_v34, %v666_v47  ;;  %v716_v4 = vcombine.high %v650_v34, %v666_v47  ;;  %11038 = vmatmul.mubr.msk.f32.vlgmr.msra.gmra.mxu1 %vm4067_vm1, %v1275_v55  ;;  %v12578_v6 = vpop.permute.xlu0 %1735  ;;  %v561_v8 = vpop.permute.xlu1 %560 }
 0x199   :  { %v2464_v5 = vcombine.high %v2407_v0, %v2439_v2  ;;  %11042 = vmatprep.mubr.msk.f32.mxu1 %vm11598_vm0, %v14730_v15  ;;  %v1276_v12 = vcombine.high %v12526_v10, %v12529_v11  ;;  %v2414_v13 = vrot.slane %v2400_v36, %v12442_v49  ;;  %v2446_v14 = vrot.slane %v2432_v38, %v12442_v49 }
 0x19a   :  { %v723_v17 = vrot.slane %v715_v3, %v12442_v49  ;;  %v730_v0 = vrot.slane %v716_v4, %v12442_v49  ;;  %v10682_v2 = vcombine.low %v707_v61, %v714_v63  ;;  %v10684_v18 = vcombine.high %v707_v61, %v714_v63 }
 0x19b   :  { %11041 = vmatpush3.xpose.msk.msra.mxu1 %vm4067_vm1, %v2464_v5  ;;  %v2465_v19 = vcombine.low %v2414_v13, %v2446_v14  ;;  %v1226_v23 = vrot.slane %v1212_v62, %v12442_v49  ;;  %v1258_v25 = vrot.slane %v1244_v1, %v12442_v49  ;;  %v2466_v27 = vcombine.high %v2414_v13, %v2446_v14 }
 0x19c   :  { %v1162_v28 = vrot.slane %v10682_v2, %v12431_v39  ;;  %v1178_v36 = vrot.slane %v10684_v18, %v12431_v39  ;;  %v10686_v38 = vcombine.low %v723_v17, %v730_v0  ;;  %v10688_v10 = vcombine.high %v723_v17, %v730_v0  ;;  %11045 = vmatprep.subr.mxu1 %v14730_v15  ;;  %v1762_v11 = vpop.permute.xlu0 %1761  ;;  %v547_v20 = vpop.permute.xlu1 %546 }
 0x19d   :  { %v1277_v21 = vcombine.low %v1226_v23, %v1258_v25  ;;  %v1943_v22 = vcombine.low %v1742_v41, %v1762_v11  ;;  %v1944_v50 = vcombine.high %v1742_v41, %v1762_v11  ;;  %v1278_v51 = vcombine.high %v1226_v23, %v1258_v25 }
 0x19e   :  { %v1194_v62 = vrot.slane %v10686_v38, %v12431_v39  ;;  %v1210_v52 = vrot.slane %v10688_v10, %v12431_v39  ;;  %v1227_v53 = vcombine.low %v1162_v28, %v1178_v36  ;;  %v1228_v1 = vcombine.high %v1162_v28, %v1178_v36  ;;  %11043 = vmatmul.mubr.msk.f32.vlgmr.msra.gmra.mxu1 %vm4067_vm1, %v1276_v12 }
 0x19f   :  { %11046 = vmatpush3.xpose.msk.msra.mxu1 %vm4067_vm1, %v2465_v19  ;;  %11047 = vmatprep.mubr.msk.f32.mxu1 %vm11598_vm0, %v14730_v15  ;;  %v1951_v29 = vrot.slane %v1943_v22, %v12431_v39  ;;  %v1958_v30 = vrot.slane %v1944_v50, %v12431_v39  ;;  %v2423_v31 = vrot.slane %v2415_v57, %v12442_v49 }
 0x1a0   :  { %v1259_v32 = vcombine.low %v1194_v62, %v1210_v52  ;;  %v1260_v33 = vcombine.high %v1194_v62, %v1210_v52  ;;  %11050 = vmatprep.subr.mxu1 %v14730_v15  ;;  %v2455_v34 = vrot.slane %v2447_v59, %v12442_v49  ;;  %v563_v35 = vpop.permute.xlu0 %562  ;;  %v1752_v37 = vpop.permute.xlu1 %1751  ;;  %v12618_v41 = vrot.slane %v1227_v53, %v12442_v49 }
 0x1a1   :  { %v569_v42 = vsel %vm568_vm2, %v561_v8, %v563_v35  ;;  %v1757_v43 = vsel %vm568_vm2, %v12545_v40, %v1752_v37  ;;  %v12624_v44 = vrot.slane %v2416_v58, %v12442_v49  ;;  %v12627_v46 = vrot.slane %v2448_v60, %v12442_v49 }
 0x1a2   :  { %11048 = vmatmul.mubr.msk.f32.vlgmr.msra.gmra.mxu1 %vm4067_vm1, %v1277_v21  ;;  %v2467_v47 = vcombine.low %v2423_v31, %v2455_v34  ;;  %v739_v48 = vcombine.low %v547_v20, %v569_v42  ;;  %v740_v54 = vcombine.high %v547_v20, %v569_v42  ;;  %v1927_v55 = vcombine.low %v12578_v6, %v1757_v43 }
 0x1a3   :  { %11051 = vmatpush3.xpose.msk.msra.mxu1 %vm4067_vm1, %v2466_v27  ;;  %11052 = vmatprep.mubr.msk.f32.mxu1 %vm11598_vm0, %v14730_v15  ;;  %v1928_v40 = vcombine.high %v12578_v6, %v1757_v43  ;;  %v1267_v57 = vrot.slane %v1259_v32, %v12442_v49  ;;  %v2468_v58 = vcombine.high %v2423_v31, %v2455_v34 }
 0x1a4   :  { %11055 = vmatprep.subr.mxu1 %v14730_v15  ;;  %v747_v59 = vrot.slane %v739_v48, %v12431_v39  ;;  %v754_v60 = vrot.slane %v740_v54, %v12431_v39  ;;  %v1935_v61 = vrot.slane %v1927_v55, %v12431_v39  ;;  %v553_v63 = vpop.permute.xlu0 %552  ;;  %v574_v3 = vpop.permute.xlu1 %573  ;;  %v2469_v4 = vcombine.low %v12624_v44, %v12627_v46 }
 0x1a5   :  { %v1942_v8 = vrot.slane %v1928_v40, %v12431_v39  ;;  %v1279_v6 = vcombine.low %v12618_v41, %v1267_v57  ;;  %v755_v5 = vcombine.low %v553_v63, %v574_v3  ;;  %v756_v12 = vcombine.high %v553_v63, %v574_v3 }
 0x1a6   :  { %11053 = vmatmul.mubr.msk.f32.vlgmr.msra.gmra.mxu1 %vm4067_vm1, %v1278_v51  ;;  %v1991_v13 = vcombine.low %v1935_v61, %v1951_v29  ;;  %v1992_v14 = vcombine.high %v1935_v61, %v1951_v29  ;;  %v1280_v17 = vcombine.high %v12618_v41, %v1267_v57  ;;  %v12647_v0 = vrot.slane %v1228_v1, %v12442_v49 }
 0x1a7   :  { %11056 = vmatpush3.xpose.msk.msra.mxu1 %vm4067_vm1, %v2467_v47  ;;  %v2007_v2 = vcombine.low %v1942_v8, %v1958_v30  ;;  %v2008_v18 = vcombine.high %v1942_v8, %v1958_v30  ;;  %11057 = vmatprep.mubr.msk.f32.mxu1 %vm11598_vm0, %v14730_v15  ;;  %v763_v19 = vrot.slane %v755_v5, %v12431_v39 }
 0x1a8   :  { %v1999_v23 = vrot.slane %v1991_v13, %v12442_v49  ;;  %v2006_v25 = vrot.slane %v1992_v14, %v12442_v49  ;;  %11060 = vmatprep.subr.mxu1 %v14730_v15  ;;  %v770_v27 = vrot.slane %v756_v12, %v12431_v39  ;;  %v1768_v28 = vpop.permute.xlu0 %1767  ;;  %v12657_v36 = vpop.permute.xlu1 %1773  ;;  %v12660_v38 = vrot.slane %v1260_v33, %v12442_v49 }
 0x1a9   :  { %v2015_v10 = vrot.slane %v2007_v2, %v12442_v49  ;;  %v2022_v11 = vrot.slane %v2008_v18, %v12442_v49  ;;  %v803_v20 = vcombine.low %v747_v59, %v763_v19  ;;  %v804_v21 = vcombine.high %v747_v59, %v763_v19 }
 0x1aa   :  { %v10721_v22 = vcombine.low %v1999_v23, %v2006_v25  ;;  %v10723_v50 = vcombine.high %v1999_v23, %v2006_v25  ;;  %11058 = vmatmul.mubr.msk.f32.vlgmr.msra.gmra.mxu1 %vm4067_vm1, %v1279_v6  ;;  %v819_v51 = vcombine.low %v754_v60, %v770_v27  ;;  %v820_v62 = vcombine.high %v754_v60, %v770_v27 }
 0x1ab   :  { %v10725_v52 = vcombine.low %v2015_v10, %v2022_v11  ;;  %v10727_v53 = vcombine.high %v2015_v10, %v2022_v11  ;;  %11061 = vmatpush3.xpose.msk.msra.mxu1 %vm4067_vm1, %v2468_v58  ;;  %v811_v1 = vrot.slane %v803_v20, %v12442_v49  ;;  %v818_v29 = vrot.slane %v804_v21, %v12442_v49 }
 0x1ac   :  { %v12669_v30 = vrot.slane %v10721_v22, %v12431_v39  ;;  %v12672_v31 = vrot.slane %v10723_v50, %v12431_v39  ;;  %v827_v32 = vrot.slane %v819_v51, %v12442_v49  ;;  %v834_v33 = vrot.slane %v820_v62, %v12442_v49  ;;  %11062 = vmatprep.mubr.msk.f32.mxu1 %vm11598_vm0, %v14730_v15  ;;  %v1780_v34 = vpop.permute.xlu0 %1779  ;;  %v1786_v35 = vpop.permute.xlu1 %1785 }
 0x1ad   :  { %v12679_v37 = vrot.slane %v10725_v52, %v12431_v39  ;;  %v12682_v41 = vrot.slane %v10727_v53, %v12431_v39  ;;  %v10689_v42 = vcombine.low %v811_v1, %v818_v29  ;;  %v10691_v43 = vcombine.high %v811_v1, %v818_v29  ;;  %11065 = vmatprep.subr.mxu1 %v14730_v15 }
 0x1ae   :  { %v2535_v47 = vcombine.low %v12669_v30, %v12672_v31  ;;  %v2536_v48 = vcombine.high %v12669_v30, %v12672_v31  ;;  %v10693_v54 = vcombine.low %v827_v32, %v834_v33  ;;  %v10695_v55 = vcombine.high %v827_v32, %v834_v33  ;;  %11063 = vmatmul.mubr.msk.f32.vlgmr.msra.gmra.mxu1 %vm4067_vm1, %v1280_v17 }
 0x1af   :  { %v2567_v40 = vcombine.low %v12679_v37, %v12682_v41  ;;  %v2568_v57 = vcombine.high %v12679_v37, %v12682_v41  ;;  %v12695_v58 = vrot.slane %v10689_v42, %v12431_v39  ;;  %v12698_v59 = vrot.slane %v10691_v43, %v12431_v39  ;;  %11066 = vmatpush3.xpose.msk.msra.mxu1 %vm4067_vm1, %v2469_v4 }
 0x1b0   :  { %v12702_v60 = vrot.slane %v10693_v54, %v12431_v39  ;;  %v12705_v61 = vrot.slane %v10695_v55, %v12431_v39  ;;  %11067 = vmatprep.mubr.msk.f32.mxu1 %vm11598_vm0, %v14730_v15  ;;  %11070 = vmatprep.subr.mxu1 %v14730_v15  ;;  %v1281_v63 = vcombine.low %v12647_v0, %v12660_v38  ;;  %v580_v3 = vpop.permute.xlu0 %579  ;;  %v586_v8 = vpop.permute.xlu1 %585 }
 0x1b1   :  { %v1347_v6 = vcombine.low %v12695_v58, %v12698_v59  ;;  %v1348_v4 = vcombine.high %v12695_v58, %v12698_v59  ;;  %v2470_v5 = vcombine.high %v12624_v44, %v12627_v46  ;;  %v1959_v12 = vcombine.low %v1768_v28, %v1780_v34 }
 0x1b2   :  { %v1379_v13 = vcombine.low %v12702_v60, %v12705_v61  ;;  %v1380_v14 = vcombine.high %v12702_v60, %v12705_v61  ;;  %11068 = vmatmul.mubr.msk.f32.vlgmr.msra.gmra.mxu1 %vm4067_vm1, %v1281_v63  ;;  %v1960_v17 = vcombine.high %v1768_v28, %v1780_v34  ;;  %v1975_v2 = vcombine.low %v12657_v36, %v1786_v35 }
 0x1b3   :  { %11071 = vmatpush3.xpose.msk.msra.mxu1 %vm4067_vm1, %v2470_v5  ;;  %v1967_v18 = vrot.slane %v1959_v12, %v12431_v39  ;;  %v1976_v19 = vcombine.high %v12657_v36, %v1786_v35  ;;  %11072 = vmatprep.mubr.msk.f32.mxu1 %vm11598_vm0, %v14730_v15  ;;  %v1282_v44 = vcombine.high %v12647_v0, %v12660_v38 }
 0x1b4   :  { %v1974_v46 = vrot.slane %v1960_v17, %v12431_v39  ;;  %v1983_v23 = vrot.slane %v1975_v2, %v12431_v39  ;;  %11075 = vmatprep.subr.mxu1 %v14730_v15  ;;  %v592_v25 = vpop.permute.xlu0 %591  ;;  %v12735_v27 = vrot.slane %v2535_v47, %v12442_v49  ;;  %v12738_v28 = vrot.slane %v2567_v40, %v12442_v49  ;;  %v598_v36 = vpop.permute.xlu1 %597 }
 0x1b5   :  { %v1990_v10 = vrot.slane %v1976_v19, %v12431_v39  ;;  %v771_v11 = vcombine.low %v580_v3, %v592_v25  ;;  %v772_v20 = vcombine.high %v580_v3, %v592_v25  ;;  %v787_v21 = vcombine.low %v586_v8, %v598_v36 }
 0x1b6   :  { %v2023_v0 = vcombine.low %v1967_v18, %v1983_v23  ;;  %v2024_v38 = vcombine.high %v1967_v18, %v1983_v23  ;;  %11073 = vmatmul.mubr.msk.f32.vlgmr.msra.gmra.mxu1 %vm4067_vm1, %v1282_v44  ;;  %v2599_v22 = vcombine.low %v12735_v27, %v12738_v28  ;;  %v788_v50 = vcombine.high %v586_v8, %v598_v36 }
 0x1b7   :  { %v2039_v51 = vcombine.low %v1974_v46, %v1990_v10  ;;  %v2040_v62 = vcombine.high %v1974_v46, %v1990_v10  ;;  %v779_v52 = vrot.slane %v771_v11, %v12431_v39  ;;  %v786_v53 = vrot.slane %v772_v20, %v12431_v39  ;;  %11077 = vmatprep.mubr.msk.f32.mxu1 %vm11598_vm0, %v14730_v15 }
 0x1b8   :  { %v2031_v1 = vrot.slane %v2023_v0, %v12442_v49  ;;  %v2038_v29 = vrot.slane %v2024_v38, %v12442_v49  ;;  %11076 = vmatpush3.xpose.msk.msra.mxu1 %vm4067_vm1, %v2599_v22  ;;  %v795_v32 = vrot.slane %v787_v21, %v12431_v39  ;;  %v802_v33 = vrot.slane %v788_v50, %v12431_v39  ;;  %v12753_v34 = vpop.permute.xlu0 %1695  ;;  %v1702_v35 = vpop.permute.xlu1 %1701 }
 0x1b9   :  { %v2047_v42 = vrot.slane %v2039_v51, %v12442_v49  ;;  %v2054_v43 = vrot.slane %v2040_v62, %v12442_v49  ;;  %v1355_v47 = vrot.slane %v1347_v6, %v12442_v49  ;;  %v1387_v54 = vrot.slane %v1379_v13, %v12442_v49  ;;  %11080 = vmatprep.subr.mxu1 %v14730_v15 }
 0x1ba   :  { %v10722_v55 = vcombine.low %v2031_v1, %v2038_v29  ;;  %v10724_v40 = vcombine.high %v2031_v1, %v2038_v29  ;;  %v835_v63 = vcombine.low %v779_v52, %v795_v32  ;;  %v836_v3 = vcombine.high %v779_v52, %v795_v32 }
 0x1bb   :  { %v10726_v8 = vcombine.low %v2047_v42, %v2054_v43  ;;  %v10728_v5 = vcombine.high %v2047_v42, %v2054_v43  ;;  %v851_v12 = vcombine.low %v786_v53, %v802_v33  ;;  %v852_v17 = vcombine.high %v786_v53, %v802_v33 }
 0x1bc   :  { %v12761_v2 = vrot.slane %v10722_v55, %v12431_v39  ;;  %v12764_v18 = vrot.slane %v10724_v40, %v12431_v39  ;;  %v843_v6 = vrot.slane %v835_v63, %v12442_v49  ;;  %v850_v13 = vrot.slane %v836_v3, %v12442_v49  ;;  %v1708_v19 = vpop.permute.xlu0 %1707  ;;  %v12768_v44 = vpop.permute.xlu1 %506 }
 0x1bd   :  { %v12771_v46 = vrot.slane %v10726_v8, %v12431_v39  ;;  %v12774_v23 = vrot.slane %v10728_v5, %v12431_v39  ;;  %v859_v25 = vrot.slane %v851_v12, %v12442_v49  ;;  %v866_v36 = vrot.slane %v852_v17, %v12442_v49 }
 0x1be   :  { %v2551_v10 = vcombine.low %v12761_v2, %v12764_v18  ;;  %v2552_v11 = vcombine.high %v12761_v2, %v12764_v18  ;;  %v10690_v20 = vcombine.low %v843_v6, %v850_v13  ;;  %v10692_v21 = vcombine.high %v843_v6, %v850_v13 }
 0x1bf   :  { %v2583_v0 = vcombine.low %v12771_v46, %v12774_v23  ;;  %v2584_v38 = vcombine.high %v12771_v46, %v12774_v23  ;;  %v10694_v22 = vcombine.low %v859_v25, %v866_v36  ;;  %v10696_v50 = vcombine.high %v859_v25, %v866_v36 }
 0x1c0   :  { %v12787_v51 = vrot.slane %v10690_v20, %v12431_v39  ;;  %v12790_v62 = vrot.slane %v10692_v21, %v12431_v39  ;;  %v1411_v52 = vcombine.low %v1355_v47, %v1387_v54  ;;  %v2600_v53 = vcombine.high %v12735_v27, %v12738_v28  ;;  %v513_v1 = vpop.permute.xlu0 %512  ;;  %v519_v29 = vpop.permute.xlu1 %518 }
 0x1c1   :  { %v12795_v32 = vrot.slane %v10694_v22, %v12431_v39  ;;  %v12798_v33 = vrot.slane %v10696_v50, %v12431_v39  ;;  %v2063_v42 = vcombine.low %v12375_v24, %v1702_v35  ;;  %v2064_v43 = vcombine.high %v12375_v24, %v1702_v35 }
 0x1c2   :  { %v1363_v55 = vcombine.low %v12787_v51, %v12790_v62  ;;  %v1364_v40 = vcombine.high %v12787_v51, %v12790_v62  ;;  %11078 = vmatmul.mubr.msk.f32.vlgmr.msra.gmra.mxu1 %vm4067_vm1, %v1411_v52  ;;  %v1412_v27 = vcombine.high %v1355_v47, %v1387_v54  ;;  %v2079_v28 = vcombine.low %v12753_v34, %v1708_v19 }
 0x1c3   :  { %v1395_v63 = vcombine.low %v12795_v32, %v12798_v33  ;;  %v1396_v3 = vcombine.high %v12795_v32, %v12798_v33  ;;  %11081 = vmatpush3.xpose.msk.msra.mxu1 %vm4067_vm1, %v2600_v53  ;;  %v2071_v24 = vrot.slane %v2063_v42, %v12431_v39  ;;  %v2078_v35 = vrot.slane %v2064_v43, %v12431_v39 }
 0x1c4   :  { %11082 = vmatprep.mubr.msk.f32.mxu1 %vm11598_vm0, %v14730_v15  ;;  %11085 = vmatprep.subr.mxu1 %v14730_v15  ;;  %v2080_v47 = vcombine.high %v12753_v34, %v1708_v19  ;;  %v2087_v54 = vrot.slane %v2079_v28, %v12431_v39  ;;  %v2550_v8 = vrot.slane %v2536_v48, %v12442_v49  ;;  %v12824_v5 = vpop.permute.xlu0 %1713  ;;  %v12826_v12 = vpop.permute.xlu1 %1719 }
 0x1c5   :  { %v2582_v17 = vrot.slane %v2568_v57, %v12442_v49  ;;  %v1362_v34 = vrot.slane %v1348_v4, %v12442_v49  ;;  %v1394_v30 = vrot.slane %v1380_v14, %v12442_v49  ;;  %v875_v31 = vcombine.low %v12380_v26, %v513_v1 }
 0x1c6   :  { %11083 = vmatmul.mubr.msk.f32.vlgmr.msra.gmra.mxu1 %vm4067_vm1, %v1412_v27  ;;  %v2094_v48 = vrot.slane %v2080_v47, %v12431_v39  ;;  %v2127_v6 = vcombine.low %v2071_v24, %v2087_v54  ;;  %v2128_v13 = vcombine.high %v2071_v24, %v2087_v54  ;;  %v876_v37 = vcombine.high %v12380_v26, %v513_v1 }
 0x1c7   :  { %v2601_v41 = vcombine.low %v2550_v8, %v2582_v17  ;;  %11087 = vmatprep.mubr.msk.f32.mxu1 %vm11598_vm0, %v14730_v15  ;;  %v1413_v57 = vcombine.low %v1362_v34, %v1394_v30  ;;  %v883_v58 = vrot.slane %v875_v31, %v12431_v39  ;;  %v2602_v59 = vcombine.high %v2550_v8, %v2582_v17 }
 0x1c8   :  { %v2135_v60 = vrot.slane %v2127_v6, %v12442_v49  ;;  %v2142_v61 = vrot.slane %v2128_v13, %v12442_v49  ;;  %v2143_v4 = vcombine.low %v2078_v35, %v2094_v48  ;;  %v2144_v14 = vcombine.high %v2078_v35, %v2094_v48  ;;  %v12849_v19 = vpop.permute.xlu0 %1725  ;;  %v12851_v25 = vpop.permute.xlu1 %1731 }
 0x1c9   :  { %11086 = vmatpush3.xpose.msk.msra.mxu1 %vm4067_vm1, %v2601_v41  ;;  %v890_v26 = vrot.slane %v876_v37, %v12431_v39  ;;  %v891_v36 = vcombine.low %v12768_v44, %v519_v29  ;;  %v892_v20 = vcombine.high %v12768_v44, %v519_v29  ;;  %v1414_v21 = vcombine.high %v1362_v34, %v1394_v30 }
 0x1ca   :  { %v2151_v22 = vrot.slane %v2143_v4, %v12442_v49  ;;  %v2158_v50 = vrot.slane %v2144_v14, %v12442_v49  ;;  %v10729_v52 = vcombine.low %v2135_v60, %v2142_v61  ;;  %v10731_v53 = vcombine.high %v2135_v60, %v2142_v61  ;;  %11090 = vmatprep.subr.mxu1 %v14730_v15 }
 0x1cb   :  { %v899_v1 = vrot.slane %v891_v36, %v12431_v39  ;;  %v906_v42 = vrot.slane %v892_v20, %v12431_v39  ;;  %v2559_v43 = vrot.slane %v2551_v10, %v12442_v49  ;;  %v2591_v44 = vrot.slane %v2583_v0, %v12442_v49 }
 0x1cc   :  { %v12871_v29 = vrot.slane %v10729_v52, %v12431_v39  ;;  %v12874_v27 = vrot.slane %v10731_v53, %v12431_v39  ;;  %v10733_v28 = vcombine.low %v2151_v22, %v2158_v50  ;;  %v10735_v24 = vcombine.high %v2151_v22, %v2158_v50  ;;  %11088 = vmatmul.mubr.msk.f32.vlgmr.msra.gmra.mxu1 %vm4067_vm1, %v1413_v57  ;;  %v12877_v35 = vpop.permute.xlu0 %524  ;;  %v12879_v47 = vpop.permute.xlu1 %530 }
 0x1cd   :  { %11091 = vmatpush3.xpose.msk.msra.mxu1 %vm4067_vm1, %v2602_v59  ;;  %v939_v10 = vcombine.low %v883_v58, %v899_v1  ;;  %v940_v54 = vcombine.high %v883_v58, %v899_v1  ;;  %v955_v8 = vcombine.low %v890_v26, %v906_v42  ;;  %v956_v0 = vcombine.high %v890_v26, %v906_v42 }
 0x1ce   :  { %v12883_v17 = vrot.slane %v10733_v28, %v12431_v39  ;;  %v12886_v34 = vrot.slane %v10735_v24, %v12431_v39  ;;  %v2671_v30 = vcombine.low %v12871_v29, %v12874_v27  ;;  %v2672_v31 = vcombine.high %v12871_v29, %v12874_v27  ;;  %11092 = vmatprep.mubr.msk.f32.mxu1 %vm11598_vm0, %v14730_v15 }
 0x1cf   :  { %v947_v48 = vrot.slane %v939_v10, %v12442_v49  ;;  %v954_v6 = vrot.slane %v940_v54, %v12442_v49  ;;  %v963_v13 = vrot.slane %v955_v8, %v12442_v49  ;;  %v970_v37 = vrot.slane %v956_v0, %v12442_v49  ;;  %11095 = vmatprep.subr.mxu1 %v14730_v15 }
 0x1d0   :  { %v2703_v41 = vcombine.low %v12883_v17, %v12886_v34  ;;  %v2704_v57 = vcombine.high %v12883_v17, %v12886_v34  ;;  %11093 = vmatmul.mubr.msk.f32.vlgmr.msra.gmra.mxu1 %vm4067_vm1, %v1414_v21  ;;  %v2603_v58 = vcombine.low %v2559_v43, %v2591_v44  ;;  %v1371_v59 = vrot.slane %v1363_v55, %v12442_v49  ;;  %v537_v60 = vpop.permute.xlu0 %536  ;;  %v12908_v61 = vpop.permute.xlu1 %542 }
 0x1d1   :  { %v10697_v4 = vcombine.low %v947_v48, %v954_v6  ;;  %v10699_v14 = vcombine.high %v947_v48, %v954_v6  ;;  %v10701_v26 = vcombine.low %v963_v13, %v970_v37  ;;  %v10703_v36 = vcombine.high %v963_v13, %v970_v37  ;;  %11097 = vmatprep.mubr.msk.f32.mxu1 %vm11598_vm0, %v14730_v15 }
 0x1d2   :  { %11096 = vmatpush3.xpose.msk.msra.mxu1 %vm4067_vm1, %v2603_v58  ;;  %v1403_v20 = vrot.slane %v1395_v63, %v12442_v49  ;;  %v2095_v55 = vcombine.low %v12824_v5, %v12849_v19  ;;  %v2096_v21 = vcombine.high %v12824_v5, %v12849_v19  ;;  %v2604_v22 = vcombine.high %v2559_v43, %v2591_v44 }
 0x1d3   :  { %v12922_v50 = vrot.slane %v10697_v4, %v12431_v39  ;;  %v12925_v52 = vrot.slane %v10699_v14, %v12431_v39  ;;  %v12928_v53 = vrot.slane %v10701_v26, %v12431_v39  ;;  %v12931_v1 = vrot.slane %v10703_v36, %v12431_v39  ;;  %11100 = vmatprep.subr.mxu1 %v14730_v15 }
 0x1d4   :  { %v1415_v63 = vcombine.low %v1371_v59, %v1403_v20  ;;  %v2103_v42 = vrot.slane %v2095_v55, %v12431_v39  ;;  %v2110_v5 = vrot.slane %v2096_v21, %v12431_v39  ;;  %v2111_v19 = vcombine.low %v12826_v12, %v12851_v25  ;;  %v12938_v43 = vpop.permute.xlu0 %1753  ;;  %v12940_v44 = vpop.permute.xlu1 %1743 }
 0x1d5   :  { %v1483_v28 = vcombine.low %v12922_v50, %v12925_v52  ;;  %v1484_v24 = vcombine.high %v12922_v50, %v12925_v52  ;;  %v1515_v10 = vcombine.low %v12928_v53, %v12931_v1  ;;  %v1516_v54 = vcombine.high %v12928_v53, %v12931_v1 }
 0x1d6   :  { %11098 = vmatmul.mubr.msk.f32.vlgmr.msra.gmra.mxu1 %vm4067_vm1, %v1415_v63  ;;  %v2112_v8 = vcombine.high %v12826_v12, %v12851_v25  ;;  %v2119_v0 = vrot.slane %v2111_v19, %v12431_v39  ;;  %v1416_v48 = vcombine.high %v1371_v59, %v1403_v20  ;;  %v2566_v6 = vrot.slane %v2552_v11, %v12442_v49 }
 0x1d7   :  { %11101 = vmatpush3.xpose.msk.msra.mxu1 %vm4067_vm1, %v2604_v22  ;;  %11102 = vmatprep.mubr.msk.f32.mxu1 %vm11598_vm0, %v14730_v15  ;;  %v2598_v13 = vrot.slane %v2584_v38, %v12442_v49  ;;  %v1378_v12 = vrot.slane %v1364_v40, %v12442_v49  ;;  %v1410_v2 = vrot.slane %v1396_v3, %v12442_v49 }
 0x1d8   :  { %v2126_v18 = vrot.slane %v2112_v8, %v12431_v39  ;;  %v2159_v11 = vcombine.low %v2103_v42, %v2119_v0  ;;  %v2160_v25 = vcombine.high %v2103_v42, %v2119_v0  ;;  %11105 = vmatprep.subr.mxu1 %v14730_v15  ;;  %v907_v37 = vcombine.low %v12877_v35, %v537_v60  ;;  %v12976_v46 = vpop.permute.xlu0 %1737  ;;  %v12978_v23 = vpop.permute.xlu1 %564 }
 0x1d9   :  { %v2605_v38 = vcombine.low %v2566_v6, %v2598_v13  ;;  %v1417_v51 = vcombine.low %v1378_v12, %v1410_v2  ;;  %v908_v62 = vcombine.high %v12877_v35, %v537_v60  ;;  %v2606_v40 = vcombine.high %v2566_v6, %v2598_v13 }
 0x1da   :  { %v2167_v32 = vrot.slane %v2159_v11, %v12442_v49  ;;  %v2174_v33 = vrot.slane %v2160_v25, %v12442_v49  ;;  %v2175_v3 = vcombine.low %v2110_v5, %v2126_v18  ;;  %v2176_v58 = vcombine.high %v2110_v5, %v2126_v18  ;;  %11103 = vmatmul.mubr.msk.f32.vlgmr.msra.gmra.mxu1 %vm4067_vm1, %v1416_v48 }
 0x1db   :  { %11106 = vmatpush3.xpose.msk.msra.mxu1 %vm4067_vm1, %v2605_v38  ;;  %11107 = vmatprep.mubr.msk.f32.mxu1 %vm11598_vm0, %v14730_v15  ;;  %v915_v59 = vrot.slane %v907_v37, %v12431_v39  ;;  %v922_v4 = vrot.slane %v908_v62, %v12431_v39  ;;  %v923_v35 = vcombine.low %v12879_v47, %v12908_v61 }
 0x1dc   :  { %v2183_v60 = vrot.slane %v2175_v3, %v12442_v49  ;;  %v2190_v14 = vrot.slane %v2176_v58, %v12442_v49  ;;  %v10730_v26 = vcombine.low %v2167_v32, %v2174_v33  ;;  %v10732_v36 = vcombine.high %v2167_v32, %v2174_v33  ;;  %11110 = vmatprep.subr.mxu1 %v14730_v15  ;;  %v1764_v20 = vpop.permute.xlu0 %1763  ;;  %v12994_v55 = vpop.permute.xlu1 %548 }
 0x1dd   :  { %v924_v21 = vcombine.high %v12879_v47, %v12908_v61  ;;  %v931_v22 = vrot.slane %v923_v35, %v12431_v39  ;;  %v1418_v63 = vcombine.high %v1378_v12, %v1410_v2  ;;  %v13003_v42 = vrot.slane %v2671_v30, %v12442_v49 }
 0x1de   :  { %v13006_v5 = vrot.slane %v10730_v26, %v12431_v39  ;;  %v13009_v19 = vrot.slane %v10732_v36, %v12431_v39  ;;  %v10734_v8 = vcombine.low %v2183_v60, %v2190_v14  ;;  %v10736_v0 = vcombine.high %v2183_v60, %v2190_v14  ;;  %11108 = vmatmul.mubr.msk.f32.vlgmr.msra.gmra.mxu1 %vm4067_vm1, %v1417_v51 }
 0x1df   :  { %11111 = vmatpush3.xpose.msk.msra.mxu1 %vm4067_vm1, %v2606_v40  ;;  %v938_v47 = vrot.slane %v924_v21, %v12431_v39  ;;  %v971_v61 = vcombine.low %v915_v59, %v931_v22  ;;  %v972_v48 = vcombine.high %v915_v59, %v931_v22  ;;  %11112 = vmatprep.mubr.msk.f32.mxu1 %vm11598_vm0, %v14730_v15 }
 0x1e0   :  { %v13017_v30 = vrot.slane %v10734_v8, %v12431_v39  ;;  %v13020_v6 = vrot.slane %v10736_v0, %v12431_v39  ;;  %v2687_v13 = vcombine.low %v13006_v5, %v13009_v19  ;;  %v2688_v12 = vcombine.high %v13006_v5, %v13009_v19  ;;  %11115 = vmatprep.subr.mxu1 %v14730_v15  ;;  %v567_v2 = vpop.permute.xlu0 %566  ;;  %v1756_v32 = vpop.permute.xlu1 %1755 }
 0x1e1   :  { %v979_v18 = vrot.slane %v971_v61, %v12442_v49  ;;  %v986_v11 = vrot.slane %v972_v48, %v12442_v49  ;;  %v987_v25 = vcombine.low %v922_v4, %v938_v47  ;;  %v988_v37 = vcombine.high %v922_v4, %v938_v47 }
 0x1e2   :  { %v2719_v38 = vcombine.low %v13017_v30, %v13020_v6  ;;  %v2720_v51 = vcombine.high %v13017_v30, %v13020_v6  ;;  %11113 = vmatmul.mubr.msk.f32.vlgmr.msra.gmra.mxu1 %vm4067_vm1, %v1418_v63  ;;  %v2711_v62 = vrot.slane %v2703_v41, %v12442_v49  ;;  %v1491_v40 = vrot.slane %v1483_v28, %v12442_v49 }
 0x1e3   :  { %v995_v33 = vrot.slane %v987_v25, %v12442_v49  ;;  %v1002_v3 = vrot.slane %v988_v37, %v12442_v49  ;;  %v10698_v58 = vcombine.low %v979_v18, %v986_v11  ;;  %v10700_v59 = vcombine.high %v979_v18, %v986_v11  ;;  %11117 = vmatprep.mubr.msk.f32.mxu1 %vm11598_vm0, %v14730_v15 }
 0x1e4   :  { %v2735_v4 = vcombine.low %v13003_v42, %v2711_v62  ;;  %v1523_v41 = vrot.slane %v1515_v10, %v12442_v49  ;;  %v2736_v35 = vcombine.high %v13003_v42, %v2711_v62  ;;  %v2215_v28 = vcombine.low %v12940_v44, %v1764_v20  ;;  %v555_v60 = vpop.permute.xlu0 %554  ;;  %v576_v11 = vpop.permute.xlu1 %575 }
 0x1e5   :  { %v13054_v14 = vrot.slane %v10698_v58, %v12431_v39  ;;  %v13057_v26 = vrot.slane %v10700_v59, %v12431_v39  ;;  %v10702_v36 = vcombine.low %v995_v33, %v1002_v3  ;;  %v10704_v21 = vcombine.high %v995_v33, %v1002_v3 }
 0x1e6   :  { %11116 = vmatpush3.xpose.msk.msra.mxu1 %vm4067_vm1, %v2735_v4  ;;  %v1547_v22 = vcombine.low %v1491_v40, %v1523_v41  ;;  %v1548_v63 = vcombine.high %v1491_v40, %v1523_v41  ;;  %v2216_v8 = vcombine.high %v12940_v44, %v1764_v20  ;;  %v2223_v10 = vrot.slane %v2215_v28, %v12431_v39 }
 0x1e7   :  { %v13063_v42 = vrot.slane %v10702_v36, %v12431_v39  ;;  %v13066_v0 = vrot.slane %v10704_v21, %v12431_v39  ;;  %v1499_v47 = vcombine.low %v13054_v14, %v13057_v26  ;;  %v1500_v61 = vcombine.high %v13054_v14, %v13057_v26  ;;  %11120 = vmatprep.subr.mxu1 %v14730_v15 }
 0x1e8   :  { %v2230_v48 = vrot.slane %v2216_v8, %v12431_v39  ;;  %v2686_v44 = vrot.slane %v2672_v31, %v12442_v49  ;;  %v2718_v20 = vrot.slane %v2704_v57, %v12442_v49  ;;  %v13086_v18 = vrot.slane %v1484_v24, %v12442_v49  ;;  %v13099_v17 = vpop.permute.xlu0 %1769  ;;  %v13133_v3 = vpop.permute.xlu1 %1775 }
 0x1e9   :  { %v1531_v25 = vcombine.low %v13063_v42, %v13066_v0  ;;  %v1532_v37 = vcombine.high %v13063_v42, %v13066_v0  ;;  %11118 = vmatmul.mubr.msk.f32.vlgmr.msra.gmra.mxu1 %vm4067_vm1, %v1547_v22  ;;  %v1530_v29 = vrot.slane %v1516_v54, %v12442_v49  ;;  %v570_v27 = vsel %vm568_vm2, %v12978_v23, %v567_v2 }
 0x1ea   :  { %11121 = vmatpush3.xpose.msk.msra.mxu1 %vm4067_vm1, %v2736_v35  ;;  %11122 = vmatprep.mubr.msk.f32.mxu1 %vm11598_vm0, %v14730_v15  ;;  %v2737_v34 = vcombine.low %v2686_v44, %v2718_v20  ;;  %v1011_v31 = vcombine.low %v12994_v55, %v570_v27  ;;  %v1012_v57 = vcombine.high %v12994_v55, %v570_v27 }
 0x1eb   :  { %11125 = vmatprep.subr.mxu1 %v14730_v15  ;;  %v1549_v50 = vcombine.low %v13086_v18, %v1530_v29  ;;  %v2738_v52 = vcombine.high %v2686_v44, %v2718_v20  ;;  %v1758_v53 = vsel %vm568_vm2, %v12938_v43, %v1756_v32  ;;  %v1550_v1 = vcombine.high %v13086_v18, %v1530_v29 }
 0x1ec   :  { %v1019_v24 = vrot.slane %v1011_v31, %v12431_v39  ;;  %v1026_v54 = vrot.slane %v1012_v57, %v12431_v39  ;;  %v2199_v23 = vcombine.low %v12976_v46, %v1758_v53  ;;  %v2200_v2 = vcombine.high %v12976_v46, %v1758_v53  ;;  %v13143_v4 = vpop.permute.xlu0 %1781 }
 0x1ed   :  { %11123 = vmatmul.mubr.msk.f32.vlgmr.msra.gmra.mxu1 %vm4067_vm1, %v1548_v63  ;;  %v13120_v55 = vrot.slane %v2687_v13, %v12442_v49  ;;  %v13123_v43 = vrot.slane %v2719_v38, %v12442_v49  ;;  %v1027_v62 = vcombine.low %v555_v60, %v576_v11  ;;  %v1028_v40 = vcombine.high %v555_v60, %v576_v11 }
 0x1ee   :  { %11126 = vmatpush3.xpose.msk.msra.mxu1 %vm4067_vm1, %v2737_v34  ;;  %11127 = vmatprep.mubr.msk.f32.mxu1 %vm11598_vm0, %v14730_v15  ;;  %v2207_v46 = vrot.slane %v2199_v23, %v12431_v39  ;;  %v2214_v32 = vrot.slane %v2200_v2, %v12431_v39  ;;  %v13131_v33 = vrot.slane %v1499_v47, %v12442_v49  ;;  %v1788_v34 = vpop.permute.xlu1 %1787 }
 0x1ef   :  { %11130 = vmatprep.subr.mxu1 %v14730_v15  ;;  %v2739_v13 = vcombine.low %v13120_v55, %v13123_v43  ;;  %v1035_v38 = vrot.slane %v1027_v62, %v12431_v39  ;;  %v1042_v58 = vrot.slane %v1028_v40, %v12431_v39  ;;  %v13141_v59 = vrot.slane %v1531_v25, %v12442_v49 }
 0x1f0   :  { %v2263_v41 = vcombine.low %v2207_v46, %v2223_v10  ;;  %v2264_v35 = vcombine.high %v2207_v46, %v2223_v10  ;;  %v2279_v28 = vcombine.low %v2214_v32, %v2230_v48  ;;  %v2280_v60 = vcombine.high %v2214_v32, %v2230_v48  ;;  %v582_v53 = vpop.permute.xlu0 %581 }
 0x1f1   :  { %11128 = vmatmul.mubr.msk.f32.vlgmr.msra.gmra.mxu1 %vm4067_vm1, %v1549_v50  ;;  %v1075_v36 = vcombine.low %v1019_v24, %v1035_v38  ;;  %v1076_v21 = vcombine.high %v1019_v24, %v1035_v38  ;;  %v1091_v22 = vcombine.low %v1026_v54, %v1042_v58  ;;  %v1092_v63 = vcombine.high %v1026_v54, %v1042_v58 }
 0x1f2   :  { %11131 = vmatpush3.xpose.msk.msra.mxu1 %vm4067_vm1, %v2738_v52  ;;  %v2271_v8 = vrot.slane %v2263_v41, %v12442_v49  ;;  %v2278_v47 = vrot.slane %v2264_v35, %v12442_v49  ;;  %v2287_v44 = vrot.slane %v2279_v28, %v12442_v49  ;;  %v2294_v20 = vrot.slane %v2280_v60, %v12442_v49 }
 0x1f3   :  { %11132 = vmatprep.mubr.msk.f32.mxu1 %vm11598_vm0, %v14730_v15  ;;  %11135 = vmatprep.subr.mxu1 %v14730_v15  ;;  %v1083_v10 = vrot.slane %v1075_v36, %v12442_v49  ;;  %v1090_v48 = vrot.slane %v1076_v21, %v12442_v49  ;;  %v1099_v18 = vrot.slane %v1091_v22, %v12442_v49 }
 0x1f4   :  { %v10737_v11 = vcombine.low %v2271_v8, %v2278_v47  ;;  %v10739_v25 = vcombine.high %v2271_v8, %v2278_v47  ;;  %v10741_v29 = vcombine.low %v2287_v44, %v2294_v20  ;;  %v10743_v27 = vcombine.high %v2287_v44, %v2294_v20  ;;  %v588_v8 = vpop.permute.xlu1 %587 }
 0x1f5   :  { %11133 = vmatmul.mubr.msk.f32.vlgmr.msra.gmra.mxu1 %vm4067_vm1, %v1550_v1  ;;  %v1106_v31 = vrot.slane %v1092_v63, %v12442_v49  ;;  %v10705_v57 = vcombine.low %v1083_v10, %v1090_v48  ;;  %v10707_v50 = vcombine.high %v1083_v10, %v1090_v48  ;;  %v1551_v52 = vcombine.low %v13131_v33, %v13141_v59 }
 0x1f6   :  { %v13162_v24 = vrot.slane %v10737_v11, %v12431_v39  ;;  %v13165_v54 = vrot.slane %v10739_v25, %v12431_v39  ;;  %v13168_v23 = vrot.slane %v10741_v29, %v12431_v39  ;;  %v13171_v2 = vrot.slane %v10743_v27, %v12431_v39  ;;  %11136 = vmatpush3.xpose.msk.msra.mxu1 %vm4067_vm1, %v2739_v13 }
 0x1f7   :  { %v13175_v1 = vrot.slane %v10705_v57, %v12431_v39  ;;  %v13178_v62 = vrot.slane %v10707_v50, %v12431_v39  ;;  %v10709_v40 = vcombine.low %v1099_v18, %v1106_v31  ;;  %v10711_v46 = vcombine.high %v1099_v18, %v1106_v31  ;;  %11137 = vmatprep.mubr.msk.f32.mxu1 %vm11598_vm0, %v14730_v15 }
 0x1f8   :  { %v2807_v32 = vcombine.low %v13162_v24, %v13165_v54  ;;  %v2808_v38 = vcombine.high %v13162_v24, %v13165_v54  ;;  %v2839_v13 = vcombine.low %v13168_v23, %v13171_v2  ;;  %v2840_v58 = vcombine.high %v13168_v23, %v13171_v2  ;;  %11140 = vmatprep.subr.mxu1 %v14730_v15 }
 0x1f9   :  { %v13192_v41 = vrot.slane %v10709_v40, %v12431_v39  ;;  %v13195_v35 = vrot.slane %v10711_v46, %v12431_v39  ;;  %v1619_v28 = vcombine.low %v13175_v1, %v13178_v62  ;;  %v1620_v60 = vcombine.high %v13175_v1, %v13178_v62  ;;  %11138 = vmatmul.mubr.msk.f32.vlgmr.msra.gmra.mxu1 %vm4067_vm1, %v1551_v52 }
 0x1fa   :  { %v2740_v36 = vcombine.high %v13120_v55, %v13123_v43  ;;  %11142 = vmatprep.mubr.msk.f32.mxu1 %vm11598_vm0, %v14730_v15  ;;  %v1552_v21 = vcombine.high %v13131_v33, %v13141_v59  ;;  %v2231_v22 = vcombine.low %v13099_v17, %v13143_v4  ;;  %v2232_v63 = vcombine.high %v13099_v17, %v13143_v4  ;;  %v594_v33 = vpop.permute.xlu0 %593 }
 0x1fb   :  { %v1651_v47 = vcombine.low %v13192_v41, %v13195_v35  ;;  %v1652_v44 = vcombine.high %v13192_v41, %v13195_v35  ;;  %v2702_v55 = vrot.slane %v2688_v12, %v12442_v49  ;;  %v2734_v43 = vrot.slane %v2720_v51, %v12442_v49 }
 0x1fc   :  { %11141 = vmatpush3.xpose.msk.msra.mxu1 %vm4067_vm1, %v2740_v36  ;;  %v2239_v17 = vrot.slane %v2231_v22, %v12431_v39  ;;  %v2246_v59 = vrot.slane %v2232_v63, %v12431_v39  ;;  %v2247_v4 = vcombine.low %v13133_v3, %v1788_v34  ;;  %v2248_v20 = vcombine.high %v13133_v3, %v1788_v34 }
 0x1fd   :  { %11145 = vmatprep.subr.mxu1 %v14730_v15  ;;  %v2741_v5 = vcombine.low %v2702_v55, %v2734_v43  ;;  %v1514_v19 = vrot.slane %v1500_v61, %v12442_v49  ;;  %v1546_v30 = vrot.slane %v1532_v37, %v12442_v49  ;;  %v2742_v6 = vcombine.high %v2702_v55, %v2734_v43  ;;  %v600_v37 = vpop.permute.xlu1 %599 }
 0x1fe   :  { %v2255_v12 = vrot.slane %v2247_v4, %v12431_v39  ;;  %v2262_v51 = vrot.slane %v2248_v20, %v12431_v39  ;;  %v1043_v10 = vcombine.low %v582_v53, %v594_v33  ;;  %v1044_v3 = vcombine.high %v582_v53, %v594_v33 }
 0x1ff   :  { %11143 = vmatmul.mubr.msk.f32.vlgmr.msra.gmra.mxu1 %vm4067_vm1, %v1552_v21  ;;  %v1553_v48 = vcombine.low %v1514_v19, %v1546_v30  ;;  %v1554_v18 = vcombine.high %v1514_v19, %v1546_v30  ;;  %v13242_v11 = vrot.slane %v2807_v32, %v12442_v49  ;;  %v13245_v14 = vrot.slane %v2839_v13, %v12442_v49 }
 0x200   :  { %11146 = vmatpush3.xpose.msk.msra.mxu1 %vm4067_vm1, %v2741_v5  ;;  %v2295_v26 = vcombine.low %v2239_v17, %v2255_v12  ;;  %v2296_v42 = vcombine.high %v2239_v17, %v2255_v12  ;;  %v2311_v0 = vcombine.low %v2246_v59, %v2262_v51  ;;  %v2312_v61 = vcombine.high %v2246_v59, %v2262_v51 }
 0x201   :  { %11147 = vmatprep.mubr.msk.f32.mxu1 %vm11598_vm0, %v14730_v15  ;;  %11150 = vmatprep.subr.mxu1 %v14730_v15  ;;  %v1051_v25 = vrot.slane %v1043_v10, %v12431_v39  ;;  %v1058_v29 = vrot.slane %v1044_v3, %v12431_v39  ;;  %v2871_v27 = vcombine.low %v13242_v11, %v13245_v14  ;;  %v493_v3 = vpop.f32.mrf.mxu0 }
 0x202   :  { %v2303_v34 = vrot.slane %v2295_v26, %v12442_v49  ;;  %v2310_v31 = vrot.slane %v2296_v42, %v12442_v49  ;;  %v2319_v57 = vrot.slane %v2311_v0, %v12442_v49  ;;  %v2326_v50 = vrot.slane %v2312_v61, %v12442_v49 }
 0x203   :  { %11148 = vmatmul.mubr.msk.f32.vlgmr.msra.gmra.mxu1 %vm4067_vm1, %v1553_v48  ;;  %v1059_v52 = vcombine.low %v588_v8, %v600_v37  ;;  %v1060_v53 = vcombine.high %v588_v8, %v600_v37  ;;  %v13261_v40 = vrot.slane %v1619_v28, %v12442_v49  ;;  %v13264_v46 = vrot.slane %v1651_v47, %v12442_v49 }
 0x204   :  { %v10738_v32 = vcombine.low %v2303_v34, %v2310_v31  ;;  %v10740_v13 = vcombine.high %v2303_v34, %v2310_v31  ;;  %v10742_v36 = vcombine.low %v2319_v57, %v2326_v50  ;;  %v10744_v21 = vcombine.high %v2319_v57, %v2326_v50  ;;  %11151 = vmatpush3.xpose.msk.msra.mxu1 %vm4067_vm1, %v2742_v6  ;;  %v2882_v31 = vpop.permute.xlu1 %2881 }
 0x205   :  { %11152 = vmatprep.mubr.msk.f32.mxu1 %vm11598_vm0, %v14730_v15  ;;  %11155 = vmatprep.subr.mxu1 %v14730_v15  ;;  %v1067_v22 = vrot.slane %v1059_v52, %v12431_v39  ;;  %v1074_v63 = vrot.slane %v1060_v53, %v12431_v39  ;;  %v1683_v28 = vcombine.low %v13261_v40, %v13264_v46 }
 0x206   :  { %v13275_v8 = vrot.slane %v10738_v32, %v12431_v39  ;;  %v2774_v47 = vrot.slane %v10740_v13, %v12431_v39  ;;  %v2790_v55 = vrot.slane %v10742_v36, %v12431_v39  ;;  %v2806_v43 = vrot.slane %v10744_v21, %v12431_v39  ;;  %v2888_v21 = vpop.permute.xlu0 %2887 }
 0x207   :  { %11153 = vmatmul.mubr.msk.f32.vlgmr.msra.gmra.mxu1 %vm4067_vm1, %v1554_v18  ;;  %v1107_v33 = vcombine.low %v1051_v25, %v1067_v22  ;;  %v1108_v17 = vcombine.high %v1051_v25, %v1067_v22  ;;  %v1123_v59 = vcombine.low %v1058_v29, %v1074_v63  ;;  %v1124_v4 = vcombine.high %v1058_v29, %v1074_v63  ;;  %v11563_v18 = vld [vmem:[%s14723_s6] sm:$0x3]  ;;  %s11619_s6 = smov 60  }
 0x208   :  { %v2823_v20 = vcombine.low %v13275_v8, %v2774_v47  ;;  %v2824_v5 = vcombine.high %v13275_v8, %v2774_v47  ;;  %v2855_v19 = vcombine.low %v2790_v55, %v2806_v43  ;;  %v2856_v30 = vcombine.high %v2790_v55, %v2806_v43  ;;  %11156 = vmatpush3.xpose.msk.msra.mxu1 %vm4067_vm1, %v2871_v27  ;;  %v2894_v22 = vpop.permute.xlu1 %2893 }
 0x209   :  { %v1115_v6 = vrot.slane %v1107_v33, %v12442_v49  ;;  %v1122_v12 = vrot.slane %v1108_v17, %v12442_v49  ;;  %v1131_v51 = vrot.slane %v1123_v59, %v12442_v49  ;;  %v1138_v10 = vrot.slane %v1124_v4, %v12442_v49  ;;  %11157 = vmatprep.mubr.msk.f32.mxu1 %vm11598_vm0, %v14730_v15 }
 0x20a   :  { %11160 = vmatprep.subr.mxu1 %v14730_v15  ;;  %v2872_v48 = vcombine.high %v13242_v11, %v13245_v14  ;;  %v13297_v26 = vrot.slane %v11563_v18, %v12348_v16  ;;  %v1684_v42 = vcombine.high %v13261_v40, %v13264_v46  ;;  %v2822_v0 = vrot.slane %v2808_v38, %v12442_v49 }
 0x20b   :  { %v10706_v61 = vcombine.low %v1115_v6, %v1122_v12  ;;  %v10708_v37 = vcombine.high %v1115_v6, %v1122_v12  ;;  %v10710_v25 = vcombine.low %v1131_v51, %v1138_v10  ;;  %v10712_v29 = vcombine.high %v1131_v51, %v1138_v10  ;;  %11158 = vmatmul.mubr.msk.f32.vlgmr.msra.gmra.mxu1 %vm4067_vm1, %v1683_v28 }
 0x20c   :  { %11161 = vmatpush3.xpose.msk.msra.mxu1 %vm4067_vm1, %v2872_v48  ;;  %11162 = vmatprep.mubr.msk.f32.mxu1 %vm11598_vm0, %v14730_v15  ;;  %v13310_v11 = vadd.f32 %v493_v3, %v13297_v26  ;;  %v2854_v24 = vrot.slane %v2840_v58, %v12442_v49  ;;  %v1634_v54 = vrot.slane %v1620_v60, %v12442_v49 }
 0x20d   :  { %v1570_v38 = vrot.slane %v10706_v61, %v12431_v39  ;;  %v1586_v14 = vrot.slane %v10708_v37, %v12431_v39  ;;  %v1602_v27 = vrot.slane %v10710_v25, %v12431_v39  ;;  %v1618_v34 = vrot.slane %v10712_v29, %v12431_v39  ;;  %11165 = vmatprep.subr.mxu1 %v14730_v15 }
 0x20e   :  { %v2873_v57 = vcombine.low %v2822_v0, %v2854_v24  ;;  %2939 = vrot.lane.b32.xlu1 %v13310_v11, %s11599_s23  ;;  %v1666_v23 = vrot.slane %v1652_v44, %v12442_v49  ;;  %v2831_v2 = vrot.slane %v2823_v20, %v12442_v49  ;;  %v2863_v1 = vrot.slane %v2855_v19, %v12442_v49 }
 0x20f   :  { %v1635_v62 = vcombine.low %v1570_v38, %v1586_v14  ;;  %v1636_v58 = vcombine.high %v1570_v38, %v1586_v14  ;;  %v1667_v60 = vcombine.low %v1602_v27, %v1618_v34  ;;  %v1668_v50 = vcombine.high %v1602_v27, %v1618_v34  ;;  %11163 = vmatmul.mubr.msk.f32.vlgmr.msra.gmra.mxu1 %vm4067_vm1, %v1684_v42 }
 0x210   :  { %11166 = vmatpush3.xpose.msk.msra.mxu1 %vm4067_vm1, %v2873_v57  ;;  %11167 = vmatprep.mubr.msk.f32.mxu1 %vm11598_vm0, %v14730_v15  ;;  %v2875_v52 = vcombine.low %v2831_v2, %v2863_v1  ;;  %v1685_v35 = vcombine.low %v1634_v54, %v1666_v23  ;;  %v2874_v44 = vcombine.high %v2822_v0, %v2854_v24 }
 0x211   :  { %v1643_v53 = vrot.slane %v1635_v62, %v12442_v49  ;;  %v1675_v41 = vrot.slane %v1667_v60, %v12442_v49  ;;  %11170 = vmatprep.subr.mxu1 %v14730_v15  ;;  %v2838_v40 = vrot.slane %v2824_v5, %v12442_v49  ;;  %v2870_v46 = vrot.slane %v2856_v30, %v12442_v49  ;;  %v497_v5 = vpop.f32.mrf.mxu0 }
 0x212   :  { %11176 = vmatpush3.xpose.msk.msra.mxu0 %vm4067_vm1, %v2875_v52  ;;  %2949 = vrot.lane.b32.xlu1 %v13310_v11, %s11602_s26  ;;  %v1650_v13 = vrot.slane %v1636_v58, %v12442_v49  ;;  %v1682_v36 = vrot.slane %v1668_v50, %v12442_v49  ;;  %v1686_v28 = vcombine.high %v1634_v54, %v1666_v23 }
 0x213   :  { %11168 = vmatmul.mubr.msk.f32.vlgmr.msra.gmra.mxu1 %vm4067_vm1, %v1685_v35  ;;  %11185 = vmatprep.subr.mxu0 %v14730_v15  ;;  %v1687_v32 = vcombine.low %v1643_v53, %v1675_v41  ;;  %v2877_v63 = vcombine.low %v2838_v40, %v2870_v46  ;;  %v2876_v8 = vcombine.high %v2831_v2, %v2863_v1  ;;  %v499_v52 = vpop.f32.mrf.mxu0 }
 0x214   :  { %11171 = vmatpush3.xpose.msk.msra.mxu1 %vm4067_vm1, %v2874_v44  ;;  %11172 = vmatprep.mubr.msk.f32.mxu1 %vm11598_vm0, %v14730_v15  ;;  %v2979_v47 = vcombine.low %v12451_v56, %v2888_v21  ;;  %v2980_v55 = vcombine.high %v12451_v56, %v2888_v21  ;;  %v2995_v43 = vcombine.low %v2882_v31, %v2894_v22 }
 0x215   :  { %11180 = vmatprep.subr.mxu1 %v14730_v15  ;;  %11178 = vmatmul.mubr.msk.f32.vlgmr.msra.gmra.mxu0 %vm4067_vm1, %v1687_v32  ;;  %v1688_v33 = vcombine.high %v1643_v53, %v1675_v41  ;;  %v1689_v17 = vcombine.low %v1650_v13, %v1682_v36  ;;  %v2996_v59 = vcombine.high %v2882_v31, %v2894_v22 }
 0x216   :  { %2955 = vrot.lane.b32.xlu1 %v13310_v11, %s11603_s27  ;;  %11186 = vmatpush3.xpose.msk.msra.mxu0 %vm4067_vm1, %v2877_v63  ;;  %v2987_v4 = vrot.slane %v2979_v47, %v12431_v39  ;;  %v2994_v20 = vrot.slane %v2980_v55, %v12431_v39  ;;  %v3003_v56 = vrot.slane %v2995_v43, %v12431_v39  ;;  %v13460_v47 = vpop.permute.xlu1 %2905 }
 0x217   :  { %11173 = vmatmul.mubr.msk.f32.vlgmr.msra.gmra.mxu1 %vm4067_vm1, %v1686_v28  ;;  %11187 = vmatprep.mubr.msk.f32.mxu0 %vm11598_vm0, %v14730_v15  ;;  %v3010_v19 = vrot.slane %v2996_v59, %v12431_v39  ;;  %v2878_v30 = vcombine.high %v2838_v40, %v2870_v46  ;;  %v13381_v3 = vadd.f32 %v497_v5, %v12437_v45 }
 0x218   :  { %11181 = vmatpush3.xpose.msk.msra.mxu1 %vm4067_vm1, %v2876_v8  ;;  %11182 = vmatprep.mubr.msk.f32.mxu1 %vm11598_vm0, %v14730_v15  ;;  %v3043_v6 = vcombine.low %v2987_v4, %v3003_v56  ;;  %v3044_v12 = vcombine.high %v2987_v4, %v3003_v56  ;;  %v1690_v42 = vcombine.high %v1650_v13, %v1682_v36 }
 0x219   :  { %11190 = vmatprep.subr.mxu1 %v14730_v15  ;;  %11188 = vmatmul.mubr.msk.f32.vlgmr.msra.gmra.mxu0 %vm4067_vm1, %v1689_v17  ;;  %v3059_v51 = vcombine.low %v2994_v20, %v3010_v19  ;;  %v3060_v10 = vcombine.high %v2994_v20, %v3010_v19  ;;  %14771 = vst [vmem:[#allocation8_spill] sm:$0xff] %v13381_v3  ;;  %v13470_v20 = vpop.permute.xlu0 %2899 }
 0x21a   :  { %2967 = vrot.lane.b32.xlu1 %v13310_v11, %s11605_s29  ;;  %2961 = vrot.lane.b32.xlu0 %v13310_v11, %s11604_s28  ;;  %v3051_v48 = vrot.slane %v3043_v6, %v12442_v49  ;;  %v3058_v18 = vrot.slane %v3044_v12, %v12442_v49  ;;  %v13432_v53 = vadd.f32 %v499_v52, %v13297_v26  ;;  %v13468_v59 = vpop.permute.xlu1 %2911 }
 0x21b   :  { %11183 = vmatmul.mubr.msk.f32.vlgmr.msra.gmra.mxu1 %vm4067_vm1, %v1688_v33  ;;  %11195 = vmatprep.subr.mxu0 %v14730_v15  ;;  %v3067_v0 = vrot.slane %v3059_v51, %v12442_v49  ;;  %v3074_v61 = vrot.slane %v3060_v10, %v12442_v49 }
 0x21c   :  { %11191 = vmatpush3.xpose.msk.msra.mxu1 %vm4067_vm1, %v2878_v30  ;;  %11192 = vmatprep.mubr.msk.f32.mxu1 %vm11598_vm0, %v14730_v15  ;;  %v10745_v45 = vcombine.low %v3051_v48, %v3058_v18  ;;  %v10747_v37 = vcombine.high %v3051_v48, %v3058_v18 }
 0x21d   :  { %11200 = vmatprep.subr.mxu1 %v14730_v15  ;;  %11197 = vmatprep.mubr.msk.f32.mxu0 %vm11598_vm0, %v14730_v15  ;;  %v10749_v25 = vcombine.low %v3067_v0, %v3074_v61  ;;  %v10751_v29 = vcombine.high %v3067_v0, %v3074_v61  ;;  %v13478_v6 = vpop.permute.xlu0 %2917 }
 0x21e   :  { %2973 = vrot.lane.b32.xlu1 %v13310_v11, %s11606_s30  ;;  %2889 = vrot.lane.b32.xlu0 %v13381_v3, %s11592_s2  ;;  %v3531_v24 = vrot.slane %v10745_v45, %v12431_v39  ;;  %v3547_v54 = vrot.slane %v10747_v37, %v12431_v39  ;;  %v13476_v30 = vpop.permute.xlu1 %2929 }
 0x21f   :  { %11193 = vmatmul.mubr.msk.f32.vlgmr.msra.gmra.mxu1 %vm4067_vm1, %v1690_v42  ;;  %v3563_v38 = vrot.slane %v10749_v25, %v12431_v39  ;;  %v3579_v11 = vrot.slane %v10751_v29, %v12431_v39 }
 0x220   :  { %11202 = vmatprep.mubr.msk.f32.mxu1 %vm11598_vm0, %v14730_v15  ;;  %v3587_v14 = vcombine.low %v3531_v24, %v3547_v54  ;;  %v3588_v27 = vcombine.high %v3531_v24, %v3547_v54 }
 0x221   :  { %v3619_v34 = vcombine.low %v3563_v38, %v3579_v11  ;;  %v3620_v31 = vcombine.high %v3563_v38, %v3579_v11  ;;  %v13482_v51 = vpop.permute.xlu0 %2937 }
 0x222   :  { %2883 = vrot.lane.b32.xlu1 %v13381_v3, %s11591_s4  ;;  %2901 = vrot.lane.b32.xlu0 %v13381_v3, %s11594_s19  ;;  %v3595_v57 = vrot.slane %v3587_v14, %v12442_v49  ;;  %v13407_v23 = vrot.slane %v3588_v27, %v12442_v49  ;;  %s11623_s4 = smov 96  }
 0x223   :  { %v3627_v2 = vrot.slane %v3619_v34, %v12442_v49  ;;  %v13411_v1 = vrot.slane %v3620_v31, %v12442_v49 }
 0x225   :  { %v3651_v62 = vcombine.low %v3595_v57, %v3627_v2  ;;  %v3652_v58 = vcombine.high %v3595_v57, %v3627_v2  ;;  %v13492_v61 = vpop.permute.xlu0 %2923 }
 0x226   :  { %2895 = vrot.lane.b32.xlu1 %v13381_v3, %s11590_s18  ;;  %2919 = vrot.lane.b32.xlu0 %v13381_v3, %s11597_s22  ;;  %14772 = vst [vmem:[#allocation9_spill] sm:$0xff] %v13492_v61  ;;  %s11612_s22 = smov 16   ;;  %s11614_s18 = smov 40  }
 0x227   :  { %11196 = vmatpush3.msra.mxu0 %v3651_v62  ;;  %11201 = vmatpush3.msra.mxu1 %v3652_v58 }
 0x228   :  { %11210 = vmatprep.subr.mxu1 %v14730_v15  ;;  %11205 = vmatprep.subr.mxu0 %v14730_v15 }
 0x22a   :  { %2907 = vrot.lane.b32.xlu1 %v13381_v3, %s11595_s20  ;;  %2941 = vrot.lane.b32.xlu0 %v13381_v3, %s11599_s23  ;;  %s11621_s20 = smov 72  }
 0x22e   :  { %2913 = vrot.lane.b32.xlu1 %v13381_v3, %s11596_s21  ;;  %2925 = vrot.lane.b32.xlu0 %v13381_v3, %s11601_s25  ;;  %s11618_s21 = smov 36  }
 0x232   :  { %2931 = vrot.lane.b32.xlu1 %v13381_v3, %s11600_s24  ;;  %2957 = vrot.lane.b32.xlu0 %v13432_v53, %s11603_s27  ;;  %s11610_s27 = smov 120  }
 0x236   :  { %2943 = vrot.lane.b32.xlu1 %v13432_v53, %s11599_s23 }
 0x23a   :  { %2951 = vrot.lane.b32.xlu1 %v13432_v53, %s11602_s26  ;;  %s11609_s26 = smov 4  }
 0x258   :  { %v13442_v41 = vpop.f32.mrf.mxu1 }
 0x259   :  { %v6500_v35 = vsel %vm568_vm2, %v13442_v41, -inf }
 0x25a   :  { %6501 = vmax.xlane.f32.xlu0 %v6500_v35  ;;  %v11039_v26 = vpop.f32.mrf.mxu1 }
 0x25e   :  { %v13446_v44 = vpop.f32.mrf.mxu1 }
 0x25f   :  { %v6503_v40 = vsel %vm568_vm2, %v13446_v44, -inf }
 0x260   :  { %6504 = vmax.xlane.f32.xlu1 %v6503_v40  ;;  %v11044_v46 = vpop.f32.mrf.mxu1 }
 0x262   :  { %v13450_v32 = vpop.f32.mrf.mxu1 }
 0x263   :  { %v6506_v13 = vsel %vm568_vm2, %v13450_v32, -inf }
 0x264   :  { %6507 = vmax.xlane.f32.xlu0 %v6506_v13  ;;  %v11049_v36 = vpop.f32.mrf.mxu1 }
 0x266   :  { %v13454_v21 = vpop.f32.mrf.mxu1 }
 0x267   :  { %v6509_v22 = vsel %vm568_vm2, %v13454_v21, -inf }
 0x268   :  { %6510 = vmax.xlane.f32.xlu0 %v6509_v22  ;;  %v11054_v63 = vpop.f32.mrf.mxu1 }
 0x26a   :  { %v13458_v28 = vpop.f32.mrf.mxu1 }
 0x26c   :  { %v11059_v8 = vpop.f32.mrf.mxu1 }
 0x26e   :  { %v13462_v55 = vpop.f32.mrf.mxu1 }
 0x26f   :  { %v6515_v43 = vsel %vm568_vm2, %v13462_v55, -inf }
 0x270   :  { %6516 = vmax.xlane.f32.xlu0 %v6515_v43  ;;  %v11064_v33 = vpop.f32.mrf.mxu1 }
 0x272   :  { %v13466_v17 = vpop.f32.mrf.mxu1 }
 0x274   :  { %v11069_v4 = vpop.f32.mrf.mxu1 }
 0x276   :  { %v13472_v56 = vpop.f32.mrf.mxu1 }
 0x277   :  { %v6521_v5 = vsel %vm568_vm2, %v13472_v56, -inf }
 0x278   :  { %6522 = vmax.xlane.f32.xlu0 %v6521_v5  ;;  %v11074_v19 = vpop.f32.mrf.mxu1 }
 0x280   :  { %v13480_v12 = vpop.permute.xlu1 %2939 }
 0x282   :  { %v13484_v10 = vpop.f32.mrf.mxu1 }
 0x284   :  { %v13486_v48 = vpop.permute.xlu1 %2949  ;;  %v11079_v18 = vpop.f32.mrf.mxu1 }
 0x286   :  { %v13488_v42 = vpop.f32.mrf.mxu1 }
 0x287   :  { %v6527_v0 = vsel %vm568_vm2, %v13488_v42, -inf }
 0x288   :  { %v13494_v45 = vpop.permute.xlu1 %2955  ;;  %6528 = vmax.xlane.f32.xlu0 %v6527_v0  ;;  %v11084_v37 = vpop.f32.mrf.mxu1 }
 0x289   :  { %14773 = vst [vmem:[#allocation10_spill] sm:$0xff] %v13494_v45 }
 0x28c   :  { %v13496_v25 = vpop.permute.xlu1 %2967  ;;  %v13498_v29 = vpop.f32.mrf.mxu1 }
 0x28d   :  { %14774 = vst [vmem:[#allocation11_spill] sm:$0xff] %v13496_v25  ;;  %v13500_v24 = vpop.permute.xlu0 %2961 }
 0x28e   :  { %14775 = vst [vmem:[#allocation12_spill] sm:$0xff] %v13500_v24  ;;  %v11089_v54 = vpop.f32.mrf.mxu1 }
 0x290   :  { %v13502_v38 = vpop.permute.xlu1 %2973  ;;  %v13504_v11 = vpop.f32.mrf.mxu1 }
 0x291   :  { %14776 = vst [vmem:[#allocation13_spill] sm:$0xff] %v13502_v38  ;;  %v6533_v14 = vsel %vm568_vm2, %v13504_v11, -inf  ;;  %v13508_v27 = vpop.permute.xlu0 %2889 }
 0x292   :  { %14777 = vst [vmem:[#allocation14_spill] sm:$0xff] %v13508_v27  ;;  %6534 = vmax.xlane.f32.xlu0 %v6533_v14  ;;  %v11094_v34 = vpop.f32.mrf.mxu1 }
 0x294   :  { %v13510_v31 = vpop.permute.xlu1 %2883 }
 0x295   :  { %14778 = vst [vmem:[#allocation15_spill] sm:$0xff] %v13510_v31  ;;  %v2902_v57 = vpop.permute.xlu0 %2901 }
 0x296   :  { %v13512_v2 = vpop.f32.mrf.mxu1 }
 0x298   :  { %v13514_v62 = vpop.permute.xlu1 %2895  ;;  %v11099_v58 = vpop.f32.mrf.mxu1 }
 0x299   :  { %14779 = vst [vmem:[#allocation16_spill] sm:$0xff] %v13514_v62  ;;  %v2920_v26 = vpop.permute.xlu0 %2919 }
 0x29a   :  { %v13516_v52 = vpop.f32.mrf.mxu1 }
 0x29b   :  { %v6539_v35 = vsel %vm568_vm2, %v13516_v52, -inf }
 0x29c   :  { %6540 = vmax.xlane.f32.xlu0 %v6539_v35  ;;  %v11104_v40 = vpop.f32.mrf.mxu1  ;;  %v2908_v46 = vpop.permute.xlu1 %2907 }
 0x29d   :  { %v3299_v13 = vcombine.low %v2908_v46, %v2920_v26  ;;  %v3300_v36 = vcombine.high %v2908_v46, %v2920_v26  ;;  %v2942_v34 = vpop.permute.xlu0 %2941 }
 0x29e   :  { %v13520_v22 = vpop.f32.mrf.mxu1 }
 0x29f   :  { %v3307_v43 = vrot.slane %v3299_v13, %v12431_v39  ;;  %v3314_v33 = vrot.slane %v3300_v36, %v12431_v39 }
 0x2a0   :  { %v11109_v63 = vpop.f32.mrf.mxu1  ;;  %v2914_v8 = vpop.permute.xlu1 %2913 }
 0x2a1   :  { %v3283_v4 = vcombine.low %v2902_v57, %v2914_v8  ;;  %v3284_v5 = vcombine.high %v2902_v57, %v2914_v8 }
 0x2a2   :  { %v13524_v19 = vpop.f32.mrf.mxu1 }
 0x2a3   :  { %v6545_v18 = vsel %vm568_vm2, %v13524_v19, -inf  ;;  %v3291_v0 = vrot.slane %v3283_v4, %v12431_v39  ;;  %v3298_v37 = vrot.slane %v3284_v5, %v12431_v39 }
 0x2a4   :  { %6546 = vmax.xlane.f32.xlu0 %v6545_v18  ;;  %v11114_v54 = vpop.f32.mrf.mxu1  ;;  %v2932_v14 = vpop.permute.xlu1 %2931 }
 0x2a5   :  { %v3347_v58 = vcombine.low %v3291_v0, %v3307_v43  ;;  %v3348_v35 = vcombine.high %v3291_v0, %v3307_v43  ;;  %v3363_v26 = vcombine.low %v3298_v37, %v3314_v33  ;;  %v3364_v40 = vcombine.high %v3298_v37, %v3314_v33  ;;  %v2926_v37 = vpop.permute.xlu0 %2925 }
 0x2a7   :  { %v3355_v46 = vrot.slane %v3347_v58, %v12442_v49  ;;  %v3362_v57 = vrot.slane %v3348_v35, %v12442_v49  ;;  %v3371_v13 = vrot.slane %v3363_v26, %v12442_v49  ;;  %v3378_v36 = vrot.slane %v3364_v40, %v12442_v49 }
 0x2a8   :  { %v2944_v63 = vpop.permute.xlu1 %2943 }
 0x2a9   :  { %v13534_v8 = vpop.f32.mrf.mxu1  ;;  %v10762_v4 = vcombine.low %v3355_v46, %v3362_v57  ;;  %v10764_v5 = vcombine.high %v3355_v46, %v3362_v57  ;;  %v10766_v18 = vcombine.low %v3371_v13, %v3378_v36  ;;  %v10768_v54 = vcombine.high %v3371_v13, %v3378_v36 }
 0x2aa   :  { %v2946_v7 = vsel %vm568_vm2, %v2942_v34, %v2944_v63 }
 0x2ab   :  { %v11119_v43 = vpop.f32.mrf.mxu1  ;;  %v3810_v33 = vrot.slane %v10762_v4, %v12431_v39  ;;  %v3826_v0 = vrot.slane %v10764_v5, %v12431_v39  ;;  %v3842_v58 = vrot.slane %v10766_v18, %v12431_v39  ;;  %v3858_v35 = vrot.slane %v10768_v54, %v12431_v39 }
 0x2ac   :  { %v3387_v26 = vcombine.low %v2926_v37, %v2946_v7  ;;  %v3388_v40 = vcombine.high %v2926_v37, %v2946_v7  ;;  %v2952_v50 = vpop.permute.xlu1 %2951 }
 0x2ad   :  { %v13541_v15 = vpop.f32.mrf.mxu1  ;;  %v3403_v46 = vcombine.low %v2932_v14, %v2952_v50  ;;  %v3404_v57 = vcombine.high %v2932_v14, %v2952_v50  ;;  %v3875_v13 = vcombine.low %v3810_v33, %v3826_v0  ;;  %v3907_v54 = vcombine.low %v3842_v58, %v3858_v35 }
 0x2ae   :  { %v6551_v34 = vsel %vm568_vm2, %v13541_v15, -inf  ;;  %v3395_v36 = vrot.slane %v3387_v26, %v12431_v39  ;;  %v3402_v63 = vrot.slane %v3388_v40, %v12431_v39  ;;  %v3876_v43 = vcombine.high %v3810_v33, %v3826_v0 }
 0x2af   :  { %6552 = vmax.xlane.f32.xlu0 %v6551_v34  ;;  %v11124_v4 = vpop.f32.mrf.mxu1  ;;  %v3411_v5 = vrot.slane %v3403_v46, %v12431_v39  ;;  %v3418_v18 = vrot.slane %v3404_v57, %v12431_v39  ;;  %v13550_v7 = vrot.slane %v3875_v13, %v12442_v49  ;;  %v3908_v50 = vcombine.high %v3842_v58, %v3858_v35 }
 0x2b0   :  { %v13555_v40 = vrot.slane %v3907_v54, %v12442_v49  ;;  %v13566_v58 = vrot.slane %v3876_v43, %v12442_v49 }
 0x2b1   :  { %14780 = vst [vmem:[#allocation17_spill] sm:$0xff] %v13550_v7  ;;  %v13552_v14 = vpop.f32.mrf.mxu1  ;;  %v3451_v37 = vcombine.low %v3395_v36, %v3411_v5  ;;  %v3452_v60 = vcombine.high %v3395_v36, %v3411_v5  ;;  %v3467_v16 = vcombine.low %v3402_v63, %v3418_v18  ;;  %v3468_v26 = vcombine.high %v3402_v63, %v3418_v18 }
 0x2b2   :  { %14781 = vst [vmem:[#allocation18_spill] sm:$0xff] %v13555_v40  ;;  %14782 = vst [vmem:[#allocation19_spill] sm:$0xff] %v13566_v58  ;;  %v13569_v35 = vrot.slane %v3908_v50, %v12442_v49 }
 0x2b3   :  { %v11129_v34 = vpop.f32.mrf.mxu1  ;;  %v3459_v46 = vrot.slane %v3451_v37, %v12442_v49  ;;  %v3466_v57 = vrot.slane %v3452_v60, %v12442_v49  ;;  %v3475_v13 = vrot.slane %v3467_v16, %v12442_v49  ;;  %v3482_v4 = vrot.slane %v3468_v26, %v12442_v49 }
 0x2b4   :  { %14783 = vst [vmem:[#allocation20_spill] sm:$0xff] %v13569_v35 }
 0x2b5   :  { %v13571_v36 = vpop.f32.mrf.mxu1  ;;  %v10769_v63 = vcombine.low %v3459_v46, %v3466_v57  ;;  %v10771_v60 = vcombine.high %v3459_v46, %v3466_v57  ;;  %v10773_v5 = vcombine.low %v3475_v13, %v3482_v4  ;;  %v10775_v16 = vcombine.high %v3475_v13, %v3482_v4 }
 0x2b6   :  { %v6557_v18 = vsel %vm568_vm2, %v13571_v36, -inf }
 0x2b7   :  { %6558 = vmax.xlane.f32.xlu0 %v6557_v18  ;;  %v11134_v43 = vpop.f32.mrf.mxu1  ;;  %v3939_v50 = vrot.slane %v10769_v63, %v12431_v39  ;;  %v3955_v26 = vrot.slane %v10771_v60, %v12431_v39  ;;  %v3971_v34 = vrot.slane %v10773_v5, %v12431_v39  ;;  %v3987_v46 = vrot.slane %v10775_v16, %v12431_v39 }
 0x2b9   :  { %v13583_v57 = vpop.f32.mrf.mxu1  ;;  %v3995_v13 = vcombine.low %v3939_v50, %v3955_v26  ;;  %v4027_v4 = vcombine.low %v3971_v34, %v3987_v46  ;;  %v3996_v0 = vcombine.high %v3939_v50, %v3955_v26  ;;  %v4028_v33 = vcombine.high %v3971_v34, %v3987_v46 }
 0x2bb   :  { %v11139_v54 = vpop.f32.mrf.mxu1  ;;  %v13586_v9 = vrot.slane %v3995_v13, %v12442_v49  ;;  %v13589_v18 = vrot.slane %v4027_v4, %v12442_v49  ;;  %v13592_v63 = vrot.slane %v3996_v0, %v12442_v49  ;;  %v13595_v60 = vrot.slane %v4028_v33, %v12442_v49 }
 0x2bd   :  { %14784 = vst [vmem:[#allocation21_spill] sm:$0xff] %v13586_v9  ;;  %14785 = vst [vmem:[#allocation22_spill] sm:$0xff] %v13589_v18 }
 0x2be   :  { %14786 = vst [vmem:[#allocation23_spill] sm:$0xff] %v13592_v63  ;;  %14787 = vst [vmem:[#allocation24_spill] sm:$0xff] %v13595_v60 }
 0x2bf   :  { %v13605_v50 = vpop.f32.mrf.mxu1 }
 0x2c0   :  { %v6563_v0 = vsel %vm568_vm2, %v13605_v50, -inf }
 0x2c1   :  { %6564 = vmax.xlane.f32.xlu0 %v6563_v0  ;;  %v11144_v33 = vpop.f32.mrf.mxu1 }
 0x2c3   :  { %v13609_v26 = vpop.f32.mrf.mxu1 }
 0x2c5   :  { %v11149_v34 = vpop.f32.mrf.mxu1 }
 0x2c7   :  { %v13611_v46 = vpop.f32.mrf.mxu1 }
 0x2c8   :  { %v6569_v13 = vsel %vm568_vm2, %v13611_v46, -inf }
 0x2c9   :  { %6570 = vmax.xlane.f32.xlu0 %v6569_v13  ;;  %v11154_v4 = vpop.f32.mrf.mxu1 }
 0x2cb   :  { %v13615_v54 = vpop.f32.mrf.mxu1 }
 0x2cd   :  { %v11159_v43 = vpop.f32.mrf.mxu1 }
 0x2cf   :  { %v13617_v16 = vpop.f32.mrf.mxu1 }
 0x2d0   :  { %v6575_v5 = vsel %vm568_vm2, %v13617_v16, -inf }
 0x2d1   :  { %6576 = vmax.xlane.f32.xlu0 %v6575_v5  ;;  %v11164_v0 = vpop.f32.mrf.mxu1 }
 0x2d3   :  { %v13621_v33 = vpop.f32.mrf.mxu1 }
 0x2d5   :  { %v11169_v34 = vpop.f32.mrf.mxu1  ;;  %v13623_v37 = vpop.f32.mrf.mxu0 }
 0x2d6   :  { %v6584_v60 = vsel %vm568_vm2, %v13623_v37, -inf }
 0x2d7   :  { %v13627_v13 = vpop.f32.mrf.mxu1  ;;  %6585 = vmax.xlane.f32.xlu1 %v6584_v60  ;;  %v11179_v4 = vpop.f32.mrf.mxu0 }
 0x2d8   :  { %v6581_v43 = vsel %vm568_vm2, %v13627_v13, -inf  ;;  %v6512_v4 = vsel %vm568_vm2, %v13458_v28, -inf }
 0x2d9   :  { %6582 = vmax.xlane.f32.xlu0 %v6581_v43  ;;  %v11174_v63 = vpop.f32.mrf.mxu1  ;;  %v13631_v18 = vpop.f32.mrf.mxu0 }
 0x2da   :  { %v6590_v5 = vsel %vm568_vm2, %v13631_v18, -inf }
 0x2db   :  { %v13635_v0 = vpop.f32.mrf.mxu1  ;;  %6591 = vmax.xlane.f32.xlu1 %v6590_v5  ;;  %v11189_v34 = vpop.f32.mrf.mxu0  ;;  %v6518_v5 = vsel %vm568_vm2, %v13466_v17, -inf }
 0x2dc   :  { %v6587_v9 = vsel %vm568_vm2, %v13635_v0, -inf  ;;  %v6524_v34 = vsel %vm568_vm2, %v13484_v10, -inf }
 0x2dd   :  { %6588 = vmax.xlane.f32.xlu0 %v6587_v9  ;;  %v11184_v60 = vpop.f32.mrf.mxu1 }
 0x2de   :  { %v6530_v60 = vsel %vm568_vm2, %v13498_v29, -inf }
 0x2df   :  { %v13641_v35 = vpop.f32.mrf.mxu1  ;;  %6513 = vmax.xlane.f32.xlu1 %v6512_v4 }
 0x2e0   :  { %v6593_v63 = vsel %vm568_vm2, %v13641_v35, -inf }
 0x2e1   :  { %6594 = vmax.xlane.f32.xlu0 %v6593_v63  ;;  %v11194_v43 = vpop.f32.mrf.mxu1  ;;  %v6536_v63 = vsel %vm568_vm2, %v13512_v2, -inf }
 0x2e2   :  { %v6542_v43 = vsel %vm568_vm2, %v13520_v22, -inf }
 0x2e3   :  { %6519 = vmax.xlane.f32.xlu1 %v6518_v5  ;;  %v6548_v5 = vsel %vm568_vm2, %v13534_v8, -inf }
 0x2e7   :  { %6525 = vmax.xlane.f32.xlu1 %v6524_v34  ;;  %v6554_v34 = vsel %vm568_vm2, %v13552_v14, -inf }
 0x2e9   :  { %v6505_v9 = vpop.xlane.xlu1 %6504 }
 0x2ea   :  { %v6597_v58 = vsub.f32 %v13446_v44, %v6505_v9  ;;  %v6566_v9 = vsel %vm568_vm2, %v13609_v26, -inf }
 0x2eb   :  { %6531 = vmax.xlane.f32.xlu1 %v6530_v60  ;;  %v6572_v60 = vsel %vm568_vm2, %v13615_v54, -inf }
 0x2ec   :  { %v6630_v4 = vmul.f32 1.442695, %v6597_v58  ;;  %v6560_v58 = vsel %vm568_vm2, %v13583_v57, -inf }
 0x2ee   :  { %11431 = vpow2.f32 %v6630_v4  ;;  %v6578_v4 = vsel %vm568_vm2, %v13621_v33, -inf }
 0x2ef   :  { %6537 = vmax.xlane.f32.xlu1 %v6536_v63  ;;  %v13674_v63 = vpop.permute.xlu0 %2957 }
 0x2f0   :  { %14788 = vst [vmem:[#allocation25_spill] sm:$0xff] %v13674_v63 }
 0x2f3   :  { %6543 = vmax.xlane.f32.xlu1 %v6542_v43  ;;  %v6502_v43 = vpop.xlane.xlu0 %6501 }
 0x2f7   :  { %6549 = vmax.xlane.f32.xlu1 %v6548_v5  ;;  %v6596_v5 = vsub.f32 %v13442_v41, %v6502_v43 }
 0x2fb   :  { %v13660_v40 = vpop.eup %11431  ;;  %6555 = vmax.xlane.f32.xlu1 %v6554_v34  ;;  %v6628_v34 = vmul.f32 1.442695, %v6596_v5 }
 0x2fc   :  { %v6695_v44 = vsel %vm568_vm2, %v13660_v40, 0.0 }
 0x2fd   :  { %6696 = vadd.xlane.f32.xlu0 %v6695_v44  ;;  %11433 = vpow2.f32 %v6628_v34 }
 0x2ff   :  { %6561 = vmax.xlane.f32.xlu1 %v6560_v58 }
 0x303   :  { %6567 = vmax.xlane.f32.xlu1 %v6566_v9  ;;  %v6508_v9 = vpop.xlane.xlu0 %6507 }
 0x304   :  { %v6598_v63 = vsub.f32 %v13450_v32, %v6508_v9 }
 0x306   :  { %v6632_v5 = vmul.f32 1.442695, %v6598_v63 }
 0x307   :  { %6573 = vmax.xlane.f32.xlu1 %v6572_v60  ;;  %v6511_v60 = vpop.xlane.xlu0 %6510 }
 0x308   :  { %v6599_v24 = vsub.f32 %v13454_v21, %v6511_v60 }
 0x30a   :  { %v13677_v44 = vpop.eup %11433  ;;  %v6634_v49 = vmul.f32 1.442695, %v6599_v24 }
 0x30b   :  { %6579 = vmax.xlane.f32.xlu1 %v6578_v4  ;;  %v6692_v58 = vsel %vm568_vm2, %v13677_v44, 0.0  ;;  %v6517_v7 = vpop.xlane.xlu0 %6516 }
 0x30c   :  { %v6601_v32 = vsub.f32 %v13462_v55, %v6517_v7 }
 0x30e   :  { %v6638_v21 = vmul.f32 1.442695, %v6601_v32 }
 0x30f   :  { %v6523_v4 = vpop.xlane.xlu0 %6522 }
 0x310   :  { %v6603_v63 = vsub.f32 %v13472_v56, %v6523_v4 }
 0x313   :  { %v6529_v31 = vpop.xlane.xlu0 %6528 }
 0x314   :  { %v6605_v60 = vsub.f32 %v13488_v42, %v6529_v31 }
 0x31b   :  { %v6535_v62 = vpop.xlane.xlu0 %6534 }
 0x31c   :  { %2963 = vrot.lane.b32.xlu1 %v13432_v53, %s11604_s28  ;;  %s11615_s28 = smov 52  }
 0x325   :  { %v13681_v3 = vpop.xlane.xlu0 %6540 }
 0x32d   :  { %v13684_v27 = vpop.xlane.xlu0 %6546 }
 0x338   :  { %v13687_v34 = vpop.xlane.xlu0 %6552 }
 0x340   :  { %6693 = vadd.xlane.f32.xlu1 %v6692_v58  ;;  %v13691_v25 = vpop.xlane.xlu0 %6558 }
 0x360   :  { %v6586_v41 = vpop.xlane.xlu1 %6585 }
 0x361   :  { %v6624_v43 = vsub.f32 %v13623_v37, %v6586_v41  ;;  %v13696_v41 = vpop.xlane.xlu0 %6564 }
 0x363   :  { %v6684_v58 = vmul.f32 1.442695, %v6624_v43  ;;  %v6642_v43 = vmul.f32 1.442695, %v6603_v63 }
 0x364   :  { %v6592_v38 = vpop.xlane.xlu1 %6591 }
 0x365   :  { %11435 = vpow2.f32 %v6684_v58  ;;  %v6626_v45 = vsub.f32 %v13631_v18, %v6592_v38  ;;  %v13700_v55 = vpop.xlane.xlu0 %6570 }
 0x366   :  { %11437 = vpow2.f32 %v6632_v5 }
 0x367   :  { %v6688_v9 = vmul.f32 1.442695, %v6626_v45  ;;  %v6646_v45 = vmul.f32 1.442695, %v6605_v60 }
 0x368   :  { %v6514_v61 = vpop.xlane.xlu1 %6513 }
 0x369   :  { %11439 = vpow2.f32 %v6688_v9  ;;  %v6600_v37 = vsub.f32 %v13458_v28, %v6514_v61  ;;  %v13706_v42 = vpop.xlane.xlu0 %6576  ;;  %v6609_v9 = vsub.f32 %v13516_v52, %v13681_v3 }
 0x36a   :  { %11441 = vpow2.f32 %v6634_v49  ;;  %v6607_v49 = vsub.f32 %v13504_v11, %v6535_v62 }
 0x36b   :  { %v6636_v38 = vmul.f32 1.442695, %v6600_v37  ;;  %v6611_v37 = vsub.f32 %v13524_v19, %v13684_v27  ;;  %v6615_v27 = vsub.f32 %v13571_v36, %v13691_v25 }
 0x36c   :  { %v6520_v18 = vpop.xlane.xlu1 %6519 }
 0x36d   :  { %11443 = vpow2.f32 %v6636_v38  ;;  %v6602_v24 = vsub.f32 %v13466_v17, %v6520_v18  ;;  %v13717_v11 = vpop.xlane.xlu0 %6582  ;;  %v6654_v38 = vmul.f32 1.442695, %v6609_v9  ;;  %v6658_v19 = vmul.f32 1.442695, %v6611_v37 }
 0x36e   :  { %11445 = vpow2.f32 %v6638_v21  ;;  %v6666_v25 = vmul.f32 1.442695, %v6615_v27 }
 0x36f   :  { %v6640_v7 = vmul.f32 1.442695, %v6602_v24 }
 0x370   :  { %v6526_v28 = vpop.xlane.xlu1 %6525 }
 0x371   :  { %11447 = vpow2.f32 %v6640_v7  ;;  %v6604_v56 = vsub.f32 %v13484_v10, %v6526_v28  ;;  %v6650_v10 = vmul.f32 1.442695, %v6607_v49  ;;  %v13738_v7 = vpop.xlane.xlu0 %6588 }
 0x372   :  { %v13703_v61 = vpop.eup %11435  ;;  %11449 = vpow2.f32 %v6642_v43 }
 0x373   :  { %v13708_v31 = vpop.eup %11437  ;;  %11451 = vpow2.f32 %v6646_v45  ;;  %v6644_v17 = vmul.f32 1.442695, %v6604_v56  ;;  %v6776_v4 = vsel %vm568_vm2, %v13703_v61, 0.0 }
 0x374   :  { %6777 = vadd.xlane.f32.xlu1 %v6776_v4  ;;  %v6532_v5 = vpop.xlane.xlu1 %6531  ;;  %v6698_v62 = vsel %vm568_vm2, %v13708_v31, 0.0 }
 0x375   :  { %v6606_v58 = vsub.f32 %v13498_v29, %v6532_v5  ;;  %11453 = vpow2.f32 %v6644_v17  ;;  %v13754_v9 = vpop.xlane.xlu0 %6594 }
 0x376   :  { %v13713_v32 = vpop.eup %11439 }
 0x377   :  { %14789 = vst [vmem:[#allocation26_spill] sm:$0xff] %v13713_v32  ;;  %v6648_v63 = vmul.f32 1.442695, %v6606_v58  ;;  %v6782_v21 = vsel %vm568_vm2, %v13713_v32, 0.0  ;;  %v13725_v29 = vpop.eup %11441 }
 0x378   :  { %6699 = vadd.xlane.f32.xlu1 %v6698_v62  ;;  %6783 = vadd.xlane.f32.xlu0 %v6782_v21  ;;  %v6538_v60 = vpop.xlane.xlu1 %6537  ;;  %v6701_v24 = vsel %vm568_vm2, %v13725_v29, 0.0 }
 0x379   :  { %11455 = vpow2.f32 %v6648_v63  ;;  %v6608_v3 = vsub.f32 %v13512_v2, %v6538_v60 }
 0x37a   :  { %v13728_v52 = vpop.eup %11443  ;;  %11457 = vpow2.f32 %v6650_v10  ;;  %v6613_v10 = vsub.f32 %v13541_v15, %v13687_v34 }
 0x37b   :  { %v6652_v18 = vmul.f32 1.442695, %v6608_v3  ;;  %v6704_v43 = vsel %vm568_vm2, %v13728_v52, 0.0  ;;  %v13736_v45 = vpop.eup %11445 }
 0x37c   :  { %6702 = vadd.xlane.f32.xlu0 %v6701_v24  ;;  %6705 = vadd.xlane.f32.xlu1 %v6704_v43  ;;  %v6544_v2 = vpop.xlane.xlu1 %6543  ;;  %v6707_v17 = vsel %vm568_vm2, %v13736_v45, 0.0  ;;  %v6662_v3 = vmul.f32 1.442695, %v6613_v10  ;;  %v6621_v43 = vsub.f32 %v13617_v16, %v13706_v42  ;;  %v6617_v16 = vsub.f32 %v13605_v50, %v13696_v41 }
 0x37d   :  { %11459 = vpow2.f32 %v6652_v18  ;;  %v6610_v28 = vsub.f32 %v13520_v22, %v6544_v2  ;;  %v6619_v50 = vsub.f32 %v13611_v46, %v13700_v55 }
 0x37e   :  { %v13741_v56 = vpop.eup %11447  ;;  %11461 = vpow2.f32 %v6654_v38  ;;  %v6678_v42 = vmul.f32 1.442695, %v6621_v43 }
 0x37f   :  { %v13743_v36 = vpop.eup %11449  ;;  %11463 = vpow2.f32 %v6658_v19  ;;  %v6656_v49 = vmul.f32 1.442695, %v6610_v28  ;;  %v6710_v4 = vsel %vm568_vm2, %v13741_v56, 0.0  ;;  %v6674_v55 = vmul.f32 1.442695, %v6619_v50 }
 0x380   :  { %v13749_v5 = vpop.eup %11451  ;;  %6708 = vadd.xlane.f32.xlu0 %v6707_v17  ;;  %6711 = vadd.xlane.f32.xlu1 %v6710_v4  ;;  %v6550_v58 = vpop.xlane.xlu1 %6549  ;;  %11465 = vpow2.f32 %v6666_v25  ;;  %v6713_v37 = vsel %vm568_vm2, %v13743_v36, 0.0 }
 0x381   :  { %v6612_v22 = vsub.f32 %v13534_v8, %v6550_v58  ;;  %11467 = vpow2.f32 %v6656_v49  ;;  %v6719_v63 = vsel %vm568_vm2, %v13749_v5, 0.0 }
 0x382   :  { %v13760_v21 = vpop.eup %11453 }
 0x383   :  { %v6660_v62 = vmul.f32 1.442695, %v6612_v22  ;;  %v6716_v27 = vsel %vm568_vm2, %v13760_v21, 0.0 }
 0x384   :  { %6714 = vadd.xlane.f32.xlu0 %v6713_v37  ;;  %6720 = vadd.xlane.f32.xlu1 %v6719_v63  ;;  %v6556_v60 = vpop.xlane.xlu1 %6555 }
 0x385   :  { %11469 = vpow2.f32 %v6660_v62  ;;  %v6614_v38 = vsub.f32 %v13552_v14, %v6556_v60  ;;  %v6670_v60 = vmul.f32 1.442695, %v6617_v16 }
 0x386   :  { %v13762_v8 = vpop.eup %11455  ;;  %v6697_v15 = vpop.xlane.xlu0 %6696 }
 0x387   :  { %v13764_v34 = vpop.eup %11457  ;;  %v6722_v19 = vsel %vm568_vm2, %v13762_v8, 0.0  ;;  %11471 = vrcp.f32 %v6697_v15  ;;  %v6664_v14 = vmul.f32 1.442695, %v6614_v38 }
 0x388   :  { %6717 = vadd.xlane.f32.xlu0 %v6716_v27  ;;  %6723 = vadd.xlane.f32.xlu1 %v6722_v19  ;;  %v6562_v18 = vpop.xlane.xlu1 %6561  ;;  %v6725_v2 = vsel %vm568_vm2, %v13764_v34, 0.0  ;;  %11473 = vpow2.f32 %v6662_v3  ;;  %v6627_v3 = vsub.f32 %v13641_v35, %v13754_v9 }
 0x389   :  { %v6616_v25 = vsub.f32 %v13583_v57, %v6562_v18  ;;  %11475 = vpow2.f32 %v6664_v14 }
 0x38a   :  { %v13771_v24 = vpop.eup %11459  ;;  %v6690_v43 = vmul.f32 1.442695, %v6627_v3 }
 0x38b   :  { %v13777_v28 = vpop.eup %11461  ;;  %v6728_v49 = vsel %vm568_vm2, %v13771_v24, 0.0  ;;  %v6668_v57 = vmul.f32 1.442695, %v6616_v25  ;;  %v14790_v25 = vcombine.high %v13407_v23, %v13411_v1 }
 0x38c   :  { %v13782_v17 = vpop.eup %11463  ;;  %6726 = vadd.xlane.f32.xlu0 %v6725_v2  ;;  %6729 = vadd.xlane.f32.xlu1 %v6728_v49  ;;  %v6568_v4 = vpop.xlane.xlu1 %6567  ;;  %v6731_v22 = vsel %vm568_vm2, %v13777_v28, 0.0 }
 0x38d   :  { %v6618_v58 = vsub.f32 %v13609_v26, %v6568_v4  ;;  %v13789_v10 = vpop.eup %11465  ;;  %v6737_v37 = vsel %vm568_vm2, %v13782_v17, 0.0 }
 0x38e   :  { %v13793_v63 = vpop.eup %11467  ;;  %v6749_v15 = vsel %vm568_vm2, %v13789_v10, 0.0 }
 0x38f   :  { %v6672_v62 = vmul.f32 1.442695, %v6618_v58  ;;  %v6734_v38 = vsel %vm568_vm2, %v13793_v63, 0.0 }
 0x390   :  { %6732 = vadd.xlane.f32.xlu0 %v6731_v22  ;;  %6738 = vadd.xlane.f32.xlu1 %v6737_v37  ;;  %v6574_v26 = vpop.xlane.xlu1 %6573  ;;  %v6625_v22 = vsub.f32 %v13635_v0, %v13738_v7 }
 0x391   :  { %11477 = vpow2.f32 %v6672_v62  ;;  %v6620_v35 = vsub.f32 %v13615_v54, %v6574_v26  ;;  %v6623_v54 = vsub.f32 %v13627_v13, %v13717_v11 }
 0x392   :  { %11479 = vpow2.f32 %v6678_v42  ;;  %v13797_v41 = vpop.eup %11469  ;;  %v6686_v37 = vmul.f32 1.442695, %v6625_v22 }
 0x393   :  { %11481 = vpow2.f32 %v6668_v57  ;;  %v6740_v2 = vsel %vm568_vm2, %v13797_v41, 0.0  ;;  %v6682_v16 = vmul.f32 1.442695, %v6623_v54 }
 0x394   :  { %v11472_v27 = vpop.eup %11471  ;;  %6750 = vadd.xlane.f32.xlu1 %v6749_v15  ;;  %6735 = vadd.xlane.f32.xlu0 %v6734_v38  ;;  %v6580_v19 = vpop.xlane.xlu1 %6579  ;;  %11483 = vpow2.f32 %v6670_v60 }
 0x395   :  { %v6622_v18 = vsub.f32 %v13621_v33, %v6580_v19  ;;  %v6791_v46 = vmul.f32 %v11472_v27, %v13660_v40  ;;  %v13811_v14 = vpop.eup %11473  ;;  %v14791_v40 = vmov 0.0   ;;  %v6676_v33 = vmul.f32 1.442695, %v6620_v35 }
 0x396   :  { %v6743_v49 = vsel %vm568_vm2, %v13811_v14, 0.0  ;;  %v13823_v4 = vpop.eup %11475 }
 0x397   :  { %v6680_v9 = vmul.f32 1.442695, %v6622_v18  ;;  %11203 = vmatmul.mubr.msk.f32.vlgmr.msra.gmra.mxu1 %vm568_vm2, %v6791_v46  ;;  %v6746_v13 = vsel %vm568_vm2, %v13823_v4, 0.0 }
 0x398   :  { %6741 = vadd.xlane.f32.xlu0 %v6740_v2  ;;  %11211 = vmatpush3.msra.mxu1 %v14790_v25 }
 0x399   :  { %11485 = vpow2.f32 %v6680_v9  ;;  %11212 = vmatprep.mubr.msk.f32.mxu1 %vm11598_vm0, %v14791_v40  ;;  %11220 = vmatprep.subr.mxu1 %v14791_v40  ;;  %v13871_v9 = vpop.permute.xlu1 %2963 }
 0x39a   :  { %11487 = vpow2.f32 %v6674_v55 }
 0x39b   :  { %11489 = vpow2.f32 %v6690_v43 }
 0x39c   :  { %6744 = vadd.xlane.f32.xlu0 %v6743_v49  ;;  %11491 = vpow2.f32 %v6676_v33  ;;  %v14794_v33 = vcombine.low %v13407_v23, %v13411_v1  ;;  %v3011_v49 = vcombine.low %v13470_v20, %v13468_v59 }
 0x39d   :  { %11493 = vpow2.f32 %v6682_v16  ;;  %v3028_v16 = vcombine.high %v13460_v47, %v13478_v6 }
 0x39e   :  { %v13825_v58 = vpop.eup %11477  ;;  %11495 = vpow2.f32 %v6686_v37  ;;  %v3019_v23 = vrot.slane %v3011_v49, %v12431_v39 }
 0x39f   :  { %v13827_v42 = vpop.eup %11479  ;;  %v6758_v11 = vsel %vm568_vm2, %v13825_v58, 0.0 }
 0x3a0   :  { %v13835_v57 = vpop.eup %11481  ;;  %6747 = vadd.xlane.f32.xlu0 %v6746_v13  ;;  %6759 = vadd.xlane.f32.xlu1 %v6758_v11  ;;  %v6767_v0 = vsel %vm568_vm2, %v13827_v42, 0.0  ;;  %v3042_v13 = vrot.slane %v3028_v16, %v12431_v39 }
 0x3a1   :  { %v13837_v62 = vpop.eup %11483  ;;  %v6752_v26 = vsel %vm568_vm2, %v13835_v57, 0.0 }
 0x3a2   :  { %v6755_v50 = vsel %vm568_vm2, %v13837_v62, 0.0 }
 0x3a4   :  { %6753 = vadd.xlane.f32.xlu0 %v6752_v26  ;;  %6768 = vadd.xlane.f32.xlu1 %v6767_v0  ;;  %v2945_v26 = vsel %vm568_vm2, %v13482_v51, %v13480_v12 }
 0x3a6   :  { %v13843_v7 = vpop.eup %11485 }
 0x3a7   :  { %v13845_v60 = vpop.eup %11487  ;;  %v6770_v3 = vsel %vm568_vm2, %v13843_v7, 0.0 }
 0x3a8   :  { %v13851_v15 = vpop.eup %11489  ;;  %6756 = vadd.xlane.f32.xlu0 %v6755_v50  ;;  %6771 = vadd.xlane.f32.xlu1 %v6770_v3  ;;  %v6761_v38 = vsel %vm568_vm2, %v13845_v60, 0.0  ;;  %v14796_v3 = vld [vmem:[#allocation7_spill] sm:$0xff] }
 0x3a9   :  { %14792 = vst [vmem:[#allocation27_spill] sm:$0xff] %v13851_v15  ;;  %v6785_v27 = vsel %vm568_vm2, %v13851_v15, 0.0  ;;  %v13857_v19 = vpop.eup %11491  ;;  %v14803_v15 = vld [vmem:[#allocation16_spill] sm:$0xff] }
 0x3aa   :  { %v6764_v18 = vsel %vm568_vm2, %v13857_v19, 0.0  ;;  %v13861_v46 = vpop.eup %11493 }
 0x3ab   :  { %v6773_v55 = vsel %vm568_vm2, %v13861_v46, 0.0  ;;  %v13865_v43 = vpop.eup %11495 }
 0x3ac   :  { %6762 = vadd.xlane.f32.xlu0 %v6761_v38  ;;  %6786 = vadd.xlane.f32.xlu1 %v6785_v27  ;;  %14793 = vst [vmem:[#allocation28_spill] sm:$0xff] %v13865_v43  ;;  %v6779_v35 = vsel %vm568_vm2, %v13865_v43, 0.0 }
 0x3b0   :  { %6765 = vadd.xlane.f32.xlu0 %v6764_v18 }
 0x3b4   :  { %6774 = vadd.xlane.f32.xlu0 %v6773_v55 }
 0x3b8   :  { %6780 = vadd.xlane.f32.xlu0 %v6779_v35 }
 0x3bd   :  { %2975 = vrot.lane.b32.xlu1 %v13432_v53, %s11606_s30 }
 0x3c9   :  { %v6694_v2 = vpop.xlane.xlu1 %6693 }
 0x3ca   :  { %11497 = vrcp.f32 %v6694_v2 }
 0x3ce   :  { %2969 = vrot.lane.b32.xlu0 %v13432_v53, %s11605_s29  ;;  %v3027_v53 = vcombine.low %v13460_v47, %v13478_v6  ;;  %v14795_v47 = vld [vmem:[#allocation9_spill] sm:$0xff]  ;;  %v3132_v6 = vcombine.high %v13476_v30, %v13486_v48 }
 0x3cf   :  { %v3116_v18 = vcombine.high %v14795_v47, %v2945_v26 }
 0x3d0   :  { %v3035_v1 = vrot.slane %v3027_v53, %v12431_v39  ;;  %v3146_v2 = vrot.slane %v3132_v6, %v12431_v39 }
 0x3d2   :  { %v3075_v11 = vcombine.low %v3019_v23, %v3035_v1  ;;  %v3076_v37 = vcombine.high %v3019_v23, %v3035_v1 }
 0x3d4   :  { %v3083_v38 = vrot.slane %v3075_v11, %v14796_v3  ;;  %v3090_v27 = vrot.slane %v3076_v37, %v14796_v3  ;;  %v14797_v37 = vld [vmem:[#allocation11_spill] sm:$0xff] }
 0x3d7   :  { %v11498_v25 = vpop.eup %11497 }
 0x3d8   :  { %v6789_v54 = vmul.f32 %v11498_v25, %v13677_v44  ;;  %v3012_v44 = vcombine.high %v13470_v20, %v13468_v59  ;;  %v3131_v59 = vcombine.low %v13476_v30, %v13486_v48  ;;  %v3115_v20 = vcombine.low %v14795_v47, %v2945_v26  ;;  %v14798_v26 = vld [vmem:[#allocation10_spill] sm:$0xff] }
 0x3d9   :  { %v10746_v25 = vcombine.low %v3083_v38, %v3090_v27  ;;  %v3130_v30 = vrot.slane %v3116_v18, %v12431_v39 }
 0x3da   :  { %11198 = vmatmul.mubr.msk.f32.vlgmr.msra.gmra.mxu0 %vm568_vm2, %v6789_v54  ;;  %v3026_v22 = vrot.slane %v3012_v44, %v12431_v39  ;;  %v3139_v51 = vrot.slane %v3131_v59, %v12431_v39  ;;  %v3123_v35 = vrot.slane %v3115_v20, %v12431_v39  ;;  %v10748_v54 = vcombine.high %v3083_v38, %v3090_v27  ;;  %v14800_v59 = vld [vmem:[#allocation12_spill] sm:$0xff] }
 0x3db   :  { %11206 = vmatpush3.msra.mxu0 %v14794_v33  ;;  %11207 = vmatprep.mubr.msk.f32.mxu0 %vm11598_vm0, %v14791_v40  ;;  %v3195_v16 = vcombine.low %v3130_v30, %v3146_v2  ;;  %v3196_v23 = vcombine.high %v3130_v30, %v3146_v2  ;;  %v3148_v38 = vcombine.high %v14798_v26, %v14797_v37 }
 0x3dc   :  { %11215 = vmatprep.subr.mxu0 %v14791_v40  ;;  %v3091_v0 = vcombine.low %v3026_v22, %v3042_v13  ;;  %v3092_v50 = vcombine.high %v3026_v22, %v3042_v13  ;;  %v3179_v53 = vcombine.low %v3123_v35, %v3139_v51  ;;  %v3180_v44 = vcombine.high %v3123_v35, %v3139_v51 }
 0x3dd   :  { %v3538_v13 = vrot.slane %v10746_v25, %v12431_v39  ;;  %v3554_v11 = vrot.slane %v10748_v54, %v12431_v39  ;;  %v3210_v51 = vrot.slane %v3196_v23, %v14796_v3 }
 0x3de   :  { %v3099_v55 = vrot.slane %v3091_v0, %v14796_v3  ;;  %v3106_v12 = vrot.slane %v3092_v50, %v14796_v3  ;;  %v3147_v0 = vcombine.low %v14798_v26, %v14797_v37  ;;  %v14799_v50 = vld [vmem:[#allocation13_spill] sm:$0xff]  ;;  %v3187_v27 = vrot.slane %v3179_v53, %v14796_v3 }
 0x3df   :  { %v3163_v47 = vcombine.low %v14800_v59, %v14799_v50  ;;  %v3194_v18 = vrot.slane %v3180_v44, %v14796_v3  ;;  %v3603_v25 = vcombine.low %v3538_v13, %v3554_v11  ;;  %v3604_v54 = vcombine.high %v3538_v13, %v3554_v11 }
 0x3e0   :  { %v10750_v33 = vcombine.low %v3099_v55, %v3106_v12  ;;  %v10752_v49 = vcombine.high %v3099_v55, %v3106_v12  ;;  %v3164_v55 = vcombine.high %v14800_v59, %v14799_v50  ;;  %v3203_v12 = vrot.slane %v3195_v16, %v14796_v3 }
 0x3e1   :  { %v3155_v30 = vrot.slane %v3147_v0, %v12431_v39  ;;  %v3162_v53 = vrot.slane %v3148_v38, %v12431_v39  ;;  %v10753_v44 = vcombine.low %v3187_v27, %v3194_v18  ;;  %v10755_v16 = vcombine.high %v3187_v27, %v3194_v18  ;;  %v14802_v38 = vld [vmem:[#allocation8_spill] sm:$0xff] }
 0x3e2   :  { %v3570_v20 = vrot.slane %v10750_v33, %v12431_v39  ;;  %v3586_v6 = vrot.slane %v10752_v49, %v12431_v39  ;;  %v3171_v33 = vrot.slane %v3163_v47, %v12431_v39  ;;  %v10757_v26 = vcombine.low %v3203_v12, %v3210_v51 }
 0x3e3   :  { %v13937_v59 = vrot.slane %v3603_v25, %v14796_v3  ;;  %v13940_v13 = vrot.slane %v3604_v54, %v14796_v3  ;;  %v10759_v11 = vcombine.high %v3203_v12, %v3210_v51  ;;  %v13953_v12 = vrot.slane %v10753_v44, %v12431_v39 }
 0x3e4   :  { %v3635_v49 = vcombine.low %v3570_v20, %v3586_v6  ;;  %v3636_v37 = vcombine.high %v3570_v20, %v3586_v6  ;;  %v3211_v0 = vcombine.low %v3155_v30, %v3171_v33  ;;  %v3212_v47 = vcombine.high %v3155_v30, %v3171_v33 }
 0x3e5   :  { %v13968_v44 = vrot.slane %v10759_v11, %v12431_v39 }
 0x3e6   :  { %v13947_v6 = vrot.slane %v3635_v49, %v14796_v3  ;;  %v13950_v25 = vrot.slane %v3636_v37, %v14796_v3  ;;  %v13963_v49 = vrot.slane %v10757_v26, %v12431_v39 }
 0x3e8   :  { %v3657_v11 = vcombine.low %v13940_v13, %v13950_v25 }
 0x3fd   :  { %v13912_v48 = vpop.xlane.xlu1 %6777 }
 0x401   :  { %v13914_v1 = vpop.xlane.xlu0 %6783  ;;  %v6700_v22 = vpop.xlane.xlu1 %6699 }
 0x402   :  { %11499 = vrcp.f32 %v6700_v22  ;;  %v3178_v22 = vrot.slane %v3164_v55, %v12431_v39  ;;  %v14804_v55 = vld [vmem:[#allocation15_spill] sm:$0xff] }
 0x403   :  { %v3267_v20 = vcombine.low %v14804_v55, %v14803_v15  ;;  %v3268_v54 = vcombine.high %v14804_v55, %v14803_v15 }
 0x404   :  { %v3227_v27 = vcombine.low %v3162_v53, %v3178_v22  ;;  %v3228_v18 = vcombine.high %v3162_v53, %v3178_v22  ;;  %v3219_v53 = vrot.slane %v3211_v0, %v14796_v3  ;;  %v3226_v22 = vrot.slane %v3212_v47, %v14796_v3 }
 0x405   :  { %v6703_v35 = vpop.xlane.xlu0 %6702  ;;  %v6706_v2 = vpop.xlane.xlu1 %6705  ;;  %v3275_v15 = vrot.slane %v3267_v20, %v12431_v39 }
 0x406   :  { %11501 = vrcp.f32 %v6703_v35  ;;  %v14801_v35 = vld [vmem:[#allocation14_spill] sm:$0xff]  ;;  %v3242_v0 = vrot.slane %v3228_v18, %v14796_v3  ;;  %v3755_v18 = vcombine.low %v13963_v49, %v13968_v44 }
 0x407   :  { %11503 = vrcp.f32 %v6706_v2  ;;  %v3251_v2 = vcombine.low %v14802_v38, %v14801_v35  ;;  %v3252_v51 = vcombine.high %v14802_v38, %v14801_v35  ;;  %v3235_v35 = vrot.slane %v3227_v27, %v14796_v3 }
 0x408   :  { %v3282_v38 = vrot.slane %v3268_v54, %v12431_v39  ;;  %v3658_v27 = vcombine.high %v13940_v13, %v13950_v25 }
 0x409   :  { %v6709_v23 = vpop.xlane.xlu0 %6708  ;;  %v6712_v50 = vpop.xlane.xlu1 %6711  ;;  %v3259_v37 = vrot.slane %v3251_v2, %v12431_v39  ;;  %v3266_v47 = vrot.slane %v3252_v51, %v12431_v39  ;;  %v10760_v43 = vcombine.high %v3235_v35, %v3242_v0 }
 0x40a   :  { %11505 = vrcp.f32 %v6709_v23  ;;  %v13960_v23 = vrot.slane %v10755_v16, %v12431_v39  ;;  %v3656_v16 = vcombine.high %v13937_v59, %v13947_v6 }
 0x40b   :  { %11507 = vrcp.f32 %v6712_v50  ;;  %v3655_v50 = vcombine.low %v13937_v59, %v13947_v6  ;;  %v10754_v6 = vcombine.low %v3219_v53, %v3226_v22  ;;  %v3315_v51 = vcombine.low %v3259_v37, %v3275_v15 }
 0x40c   :  { %v3723_v59 = vcombine.low %v13953_v12, %v13960_v23  ;;  %v3316_v32 = vcombine.high %v3259_v37, %v3275_v15  ;;  %v3331_v25 = vcombine.low %v3266_v47, %v3282_v38  ;;  %v3756_v15 = vcombine.high %v13963_v49, %v13968_v44 }
 0x40d   :  { %v6715_v30 = vpop.xlane.xlu0 %6714  ;;  %v6721_v33 = vpop.xlane.xlu1 %6720 }
 0x40e   :  { %11509 = vrcp.f32 %v6715_v30 }
 0x40f   :  { %v11500_v26 = vpop.eup %11499  ;;  %11511 = vrcp.f32 %v6721_v33  ;;  %v10756_v33 = vcombine.high %v3219_v53, %v3226_v22 }
 0x410   :  { %v6793_v20 = vmul.f32 %v11500_v26, %v13708_v31  ;;  %v3724_v31 = vcombine.high %v13953_v12, %v13960_v23  ;;  %v10758_v26 = vcombine.low %v3235_v35, %v3242_v0  ;;  %v3731_v12 = vrot.slane %v3723_v59, %v14796_v3 }
 0x411   :  { %v6718_v2 = vpop.xlane.xlu0 %6717  ;;  %v6724_v55 = vpop.xlane.xlu1 %6723  ;;  %v3763_v23 = vrot.slane %v3755_v18, %v14796_v3  ;;  %v3323_v35 = vrot.slane %v3315_v51, %v14796_v3  ;;  %v3330_v0 = vrot.slane %v3316_v32, %v14796_v3  ;;  %v3339_v32 = vrot.slane %v3331_v25, %v14796_v3 }
 0x412   :  { %11513 = vrcp.f32 %v6718_v2  ;;  %11208 = vmatmul.mubr.msk.f32.vlgmr.msra.gmra.mxu0 %vm568_vm2, %v6793_v20  ;;  %v3332_v2 = vcombine.high %v3266_v47, %v3282_v38  ;;  %v14015_v44 = vrot.slane %v10758_v26, %v12431_v39  ;;  %v14018_v38 = vrot.slane %v10760_v43, %v12431_v39 }
 0x413   :  { %v11502_v30 = vpop.eup %11501  ;;  %11515 = vrcp.f32 %v6724_v55  ;;  %11216 = vmatpush3.msra.mxu0 %v3655_v50  ;;  %11217 = vmatprep.mubr.msk.f32.mxu0 %vm11598_vm0, %v14791_v40  ;;  %v3738_v43 = vrot.slane %v3724_v31, %v14796_v3  ;;  %v3770_v59 = vrot.slane %v3756_v15, %v14796_v3  ;;  %v10761_v18 = vcombine.low %v3323_v35, %v3330_v0 }
 0x414   :  { %v11504_v54 = vpop.eup %11503  ;;  %v6795_v13 = vmul.f32 %v11502_v30, %v13725_v29  ;;  %11225 = vmatprep.subr.mxu0 %v14791_v40  ;;  %v14003_v29 = vrot.slane %v10754_v6, %v12431_v39  ;;  %v10763_v30 = vcombine.high %v3323_v35, %v3330_v0  ;;  %v3772_v15 = vcombine.high %v14015_v44, %v14018_v38 }
 0x415   :  { %v6727_v53 = vpop.xlane.xlu0 %6726  ;;  %v6730_v22 = vpop.xlane.xlu1 %6729  ;;  %v6797_v37 = vmul.f32 %v11504_v54, %v13728_v52  ;;  %v14009_v52 = vrot.slane %v10756_v33, %v12431_v39  ;;  %v3788_v33 = vcombine.high %v3731_v12, %v3763_v23 }
 0x416   :  { %11517 = vrcp.f32 %v6727_v53  ;;  %11213 = vmatmul.mubr.msk.f32.vlgmr.msra.gmra.mxu1 %vm568_vm2, %v6795_v13  ;;  %v14047_v53 = vrot.slane %v10763_v30, %v12431_v39 }
 0x417   :  { %v11506_v50 = vpop.eup %11505  ;;  %11218 = vmatmul.mubr.msk.f32.vlgmr.msra.gmra.mxu0 %vm568_vm2, %v6797_v37  ;;  %11221 = vmatpush3.msra.mxu1 %v3656_v16  ;;  %11519 = vrcp.f32 %v6730_v22  ;;  %v3346_v16 = vrot.slane %v3332_v2, %v14796_v3  ;;  %v3739_v51 = vcombine.low %v14003_v29, %v14009_v52  ;;  %v14044_v2 = vrot.slane %v10761_v18, %v12431_v39 }
 0x418   :  { %v11508_v47 = vpop.eup %11507  ;;  %11226 = vmatpush3.msra.mxu0 %v3657_v11  ;;  %11222 = vmatprep.mubr.msk.f32.mxu1 %vm11598_vm0, %v14791_v40  ;;  %v6799_v49 = vmul.f32 %v11506_v50, %v13736_v45  ;;  %v3787_v45 = vcombine.low %v3731_v12, %v3763_v23  ;;  %v3740_v22 = vcombine.high %v14003_v29, %v14009_v52 }
 0x419   :  { %11230 = vmatprep.subr.mxu1 %v14791_v40  ;;  %v6733_v55 = vpop.xlane.xlu0 %6732  ;;  %11227 = vmatprep.mubr.msk.f32.mxu0 %vm11598_vm0, %v14791_v40  ;;  %v6739_v11 = vpop.xlane.xlu1 %6738  ;;  %v6801_v20 = vmul.f32 %v11508_v47, %v13741_v56  ;;  %v10765_v54 = vcombine.low %v3339_v32, %v3346_v16  ;;  %v10767_v26 = vcombine.high %v3339_v32, %v3346_v16 }
 0x41a   :  { %11521 = vrcp.f32 %v6733_v55  ;;  %11235 = vmatprep.subr.mxu0 %v14791_v40  ;;  %11223 = vmatmul.mubr.msk.f32.vlgmr.msra.gmra.mxu1 %vm568_vm2, %v6799_v49  ;;  %v3790_v23 = vcombine.high %v3738_v43, %v3770_v59  ;;  %v3747_v29 = vrot.slane %v3739_v51, %v14796_v3  ;;  %v3859_v49 = vcombine.low %v14044_v2, %v14047_v53 }
 0x41b   :  { %v11510_v6 = vpop.eup %11509  ;;  %11228 = vmatmul.mubr.msk.f32.vlgmr.msra.gmra.mxu0 %vm568_vm2, %v6801_v20  ;;  %11231 = vmatpush3.msra.mxu1 %v3658_v27  ;;  %11523 = vrcp.f32 %v6739_v11  ;;  %v3771_v27 = vcombine.low %v14015_v44, %v14018_v38  ;;  %v14059_v35 = vrot.slane %v10765_v54, %v12431_v39  ;;  %v14062_v0 = vrot.slane %v10767_v26, %v12431_v39 }
 0x41c   :  { %11236 = vmatpush3.msra.mxu0 %v3787_v45  ;;  %11232 = vmatprep.mubr.msk.f32.mxu1 %vm11598_vm0, %v14791_v40  ;;  %v6803_v56 = vmul.f32 %v11510_v6, %v13743_v36  ;;  %v11512_v31 = vpop.eup %11511  ;;  %v3789_v36 = vcombine.low %v3738_v43, %v3770_v59  ;;  %v3786_v32 = vrot.slane %v3772_v15, %v14796_v3 }
 0x41d   :  { %11240 = vmatprep.subr.mxu1 %v14791_v40  ;;  %v6736_v13 = vpop.xlane.xlu0 %6735  ;;  %11237 = vmatprep.mubr.msk.f32.mxu0 %vm11598_vm0, %v14791_v40  ;;  %v6807_v12 = vmul.f32 %v11512_v31, %v13749_v5  ;;  %v3779_v52 = vrot.slane %v3771_v27, %v14796_v3  ;;  %v6751_v55 = vpop.xlane.xlu1 %6750  ;;  %v3891_v43 = vcombine.low %v14059_v35, %v14062_v0 }
 0x41e   :  { %11525 = vrcp.f32 %v6736_v13  ;;  %11233 = vmatmul.mubr.msk.f32.vlgmr.msra.gmra.mxu1 %vm568_vm2, %v6803_v56  ;;  %11245 = vmatprep.subr.mxu0 %v14791_v40  ;;  %v3860_v59 = vcombine.high %v14044_v2, %v14047_v53  ;;  %v3892_v26 = vcombine.high %v14059_v35, %v14062_v0 }
 0x41f   :  { %v11514_v25 = vpop.eup %11513  ;;  %11241 = vmatpush3.msra.mxu1 %v3788_v33  ;;  %11242 = vmatprep.mubr.msk.f32.mxu1 %vm11598_vm0, %v14791_v40  ;;  %v3791_v20 = vcombine.low %v3747_v29, %v3779_v52  ;;  %v3792_v45 = vcombine.high %v3747_v29, %v3779_v52  ;;  %v3899_v54 = vrot.slane %v3891_v43, %v14796_v3 }
 0x420   :  { %11250 = vmatprep.subr.mxu1 %v14791_v40  ;;  %v6805_v37 = vmul.f32 %v11514_v25, %v13760_v21  ;;  %v11516_v50 = vpop.eup %11515  ;;  %v3754_v21 = vrot.slane %v3740_v22, %v14796_v3  ;;  %v3874_v27 = vrot.slane %v3860_v59, %v14796_v3  ;;  %v3906_v53 = vrot.slane %v3892_v26, %v14796_v3 }
 0x421   :  { %v6742_v47 = vpop.xlane.xlu0 %6741  ;;  %v6809_v44 = vmul.f32 %v11516_v50, %v13762_v8 }
 0x422   :  { %11527 = vrcp.f32 %v6742_v47  ;;  %11238 = vmatmul.mubr.msk.f32.vlgmr.msra.gmra.mxu0 %vm568_vm2, %v6805_v37  ;;  %11243 = vmatmul.mubr.msk.f32.vlgmr.msra.gmra.mxu1 %vm568_vm2, %v6807_v12  ;;  %v3793_v30 = vcombine.low %v3754_v21, %v3786_v32  ;;  %v3794_v31 = vcombine.high %v3754_v21, %v3786_v32  ;;  %v3925_v12 = vcombine.low %v3874_v27, %v3906_v53 }
 0x423   :  { %v11518_v5 = vpop.eup %11517  ;;  %11246 = vmatpush3.msra.mxu0 %v3789_v36  ;;  %11251 = vmatpush3.msra.mxu1 %v3790_v23  ;;  %v3926_v0 = vcombine.high %v3874_v27, %v3906_v53 }
 0x424   :  { %11247 = vmatprep.mubr.msk.f32.mxu0 %vm11598_vm0, %v14791_v40  ;;  %11252 = vmatprep.mubr.msk.f32.mxu1 %vm11598_vm0, %v14791_v40  ;;  %v6811_v38 = vmul.f32 %v11518_v5, %v13764_v34  ;;  %v11520_v16 = vpop.eup %11519  ;;  %v3867_v34 = vrot.slane %v3859_v49, %v14796_v3  ;;  %v14805_v49 = vld [vmem:[#allocation17_spill] sm:$0xff] }
 0x425   :  { %v6745_v11 = vpop.xlane.xlu0 %6744  ;;  %11255 = vmatprep.subr.mxu0 %v14791_v40  ;;  %11260 = vmatprep.subr.mxu1 %v14791_v40  ;;  %v6813_v6 = vmul.f32 %v11520_v16, %v13771_v24 }
 0x426   :  { %11529 = vrcp.f32 %v6745_v11  ;;  %11248 = vmatmul.mubr.msk.f32.vlgmr.msra.gmra.mxu0 %vm568_vm2, %v6809_v44  ;;  %11253 = vmatmul.mubr.msk.f32.vlgmr.msra.gmra.mxu1 %vm568_vm2, %v6811_v38  ;;  %v3923_v25 = vcombine.low %v3867_v34, %v3899_v54  ;;  %v3924_v2 = vcombine.high %v3867_v34, %v3899_v54  ;;  %v14806_v44 = vld [vmem:[#allocation18_spill] sm:$0xff]  ;;  %v14809_v11 = vld [vmem:[#allocation19_spill] sm:$0xff]  ;;  %v14816_v54 = vld [vmem:[#allocation25_spill] sm:$0xff] }
 0x427   :  { %v11522_v8 = vpop.eup %11521  ;;  %11256 = vmatpush3.msra.mxu0 %v3791_v20  ;;  %11261 = vmatpush3.msra.mxu1 %v3792_v45  ;;  %11531 = vrcp.f32 %v6751_v55  ;;  %v14807_v38 = vcombine.low %v14805_v49, %v14806_v44  ;;  %v14808_v32 = vcombine.high %v14805_v49, %v14806_v44  ;;  %v14810_v20 = vld [vmem:[#allocation20_spill] sm:$0xff] }
 0x428   :  { %11257 = vmatprep.mubr.msk.f32.mxu0 %vm11598_vm0, %v14791_v40  ;;  %11262 = vmatprep.mubr.msk.f32.mxu1 %vm11598_vm0, %v14791_v40  ;;  %v6815_v18 = vmul.f32 %v11522_v8, %v13777_v28  ;;  %v11524_v56 = vpop.eup %11523  ;;  %v14811_v45 = vcombine.low %v14809_v11, %v14810_v20 }
 0x429   :  { %v6748_v33 = vpop.xlane.xlu0 %6747  ;;  %11265 = vmatprep.subr.mxu0 %v14791_v40  ;;  %11270 = vmatprep.subr.mxu1 %v14791_v40  ;;  %v6760_v51 = vpop.xlane.xlu1 %6759  ;;  %v6819_v13 = vmul.f32 %v11524_v56, %v13782_v17  ;;  %v14814_v56 = vld [vmem:[#allocation22_spill] sm:$0xff] }
 0x42a   :  { %11533 = vrcp.f32 %v6748_v33  ;;  %11258 = vmatmul.mubr.msk.f32.vlgmr.msra.gmra.mxu0 %vm568_vm2, %v6813_v6  ;;  %11263 = vmatmul.mubr.msk.f32.vlgmr.msra.gmra.mxu1 %vm568_vm2, %v6815_v18  ;;  %v14812_v18 = vcombine.high %v14809_v11, %v14810_v20 }
 0x42b   :  { %v11526_v24 = vpop.eup %11525  ;;  %11266 = vmatpush3.msra.mxu0 %v3793_v30  ;;  %11271 = vmatpush3.msra.mxu1 %v3794_v31  ;;  %v14813_v30 = vld [vmem:[#allocation21_spill] sm:$0xff] }
 0x42c   :  { %11267 = vmatprep.mubr.msk.f32.mxu0 %vm11598_vm0, %v14791_v40  ;;  %11272 = vmatprep.mubr.msk.f32.mxu1 %vm11598_vm0, %v14791_v40  ;;  %v6817_v28 = vmul.f32 %v11526_v24, %v13793_v63  ;;  %v14815_v33 = vcombine.low %v14813_v30, %v14814_v56 }
 0x42d   :  { %v6754_v36 = vpop.xlane.xlu0 %6753  ;;  %11275 = vmatprep.subr.mxu0 %v14791_v40  ;;  %11280 = vmatprep.subr.mxu1 %v14791_v40  ;;  %v6769_v22 = vpop.xlane.xlu1 %6768 }
 0x42e   :  { %11535 = vrcp.f32 %v6754_v36  ;;  %11268 = vmatmul.mubr.msk.f32.vlgmr.msra.gmra.mxu0 %vm568_vm2, %v6817_v28  ;;  %11273 = vmatmul.mubr.msk.f32.vlgmr.msra.gmra.mxu1 %vm568_vm2, %v6819_v13 }
 0x42f   :  { %v11528_v63 = vpop.eup %11527  ;;  %11276 = vmatpush3.msra.mxu0 %v3923_v25  ;;  %11281 = vmatpush3.msra.mxu1 %v3924_v2  ;;  %11537 = vrcp.f32 %v6760_v51 }
 0x430   :  { %11277 = vmatprep.mubr.msk.f32.mxu0 %vm11598_vm0, %v14791_v40  ;;  %11285 = vmatprep.subr.mxu0 %v14791_v40  ;;  %v6821_v17 = vmul.f32 %v11528_v63, %v13797_v41 }
 0x431   :  { %v6757_v37 = vpop.xlane.xlu0 %6756  ;;  %11282 = vmatprep.mubr.msk.f32.mxu1 %vm11598_vm0, %v14791_v40  ;;  %11290 = vmatprep.subr.mxu1 %v14791_v40  ;;  %v6772_v15 = vpop.xlane.xlu1 %6771 }
 0x432   :  { %11539 = vrcp.f32 %v6757_v37  ;;  %11278 = vmatmul.mubr.msk.f32.vlgmr.msra.gmra.mxu0 %vm568_vm2, %v6821_v17 }
 0x433   :  { %v11530_v23 = vpop.eup %11529  ;;  %11286 = vmatpush3.msra.mxu0 %v3925_v12  ;;  %11287 = vmatprep.mubr.msk.f32.mxu0 %vm11598_vm0, %v14791_v40  ;;  %v14818_v12 = vld [vmem:[#allocation23_spill] sm:$0xff] }
 0x434   :  { %v6823_v50 = vmul.f32 %v11530_v23, %v13811_v14  ;;  %11295 = vmatprep.subr.mxu0 %v14791_v40  ;;  %v11532_v41 = vpop.eup %11531  ;;  %v14819_v23 = vld [vmem:[#allocation24_spill] sm:$0xff] }
 0x435   :  { %v6763_v35 = vpop.xlane.xlu0 %6762  ;;  %v6827_v52 = vmul.f32 %v11532_v41, %v13789_v10  ;;  %v6787_v5 = vpop.xlane.xlu1 %6786 }
 0x436   :  { %11541 = vrcp.f32 %v6763_v35  ;;  %11283 = vmatmul.mubr.msk.f32.vlgmr.msra.gmra.mxu1 %vm568_vm2, %v6823_v50  ;;  %v14821_v35 = vcombine.high %v14818_v12, %v14819_v23 }
 0x437   :  { %v11534_v47 = vpop.eup %11533  ;;  %11291 = vmatpush3.msra.mxu1 %v3926_v0  ;;  %11292 = vmatprep.mubr.msk.f32.mxu1 %vm11598_vm0, %v14791_v40  ;;  %11543 = vrcp.f32 %v6769_v22 }
 0x438   :  { %11300 = vmatprep.subr.mxu1 %v14791_v40  ;;  %v6825_v29 = vmul.f32 %v11534_v47, %v13823_v4 }
 0x439   :  { %v6766_v14 = vpop.xlane.xlu0 %6765  ;;  %v2976_v43 = vpop.permute.xlu1 %2975 }
 0x43a   :  { %11545 = vrcp.f32 %v6766_v14  ;;  %11288 = vmatmul.mubr.msk.f32.vlgmr.msra.gmra.mxu0 %vm568_vm2, %v6825_v29  ;;  %11293 = vmatmul.mubr.msk.f32.vlgmr.msra.gmra.mxu1 %vm568_vm2, %v6827_v52  ;;  %v3435_v6 = vcombine.low %v13871_v9, %v2976_v43 }
 0x43b   :  { %v11536_v21 = vpop.eup %11535  ;;  %11547 = vrcp.f32 %v6772_v15  ;;  %11296 = vmatpush3.msra.mxu0 %v14807_v38  ;;  %11301 = vmatpush3.msra.mxu1 %v14808_v32  ;;  %v14820_v15 = vcombine.low %v14818_v12, %v14819_v23 }
 0x43c   :  { %11297 = vmatprep.mubr.msk.f32.mxu0 %vm11598_vm0, %v14791_v40  ;;  %11305 = vmatprep.subr.mxu0 %v14791_v40  ;;  %v6829_v10 = vmul.f32 %v11536_v21, %v13835_v57  ;;  %v11538_v4 = vpop.eup %11537  ;;  %v3443_v28 = vrot.slane %v3435_v6, %v12431_v39 }
 0x43d   :  { %v6775_v16 = vpop.xlane.xlu0 %6774  ;;  %11302 = vmatprep.mubr.msk.f32.mxu1 %vm11598_vm0, %v14791_v40  ;;  %11310 = vmatprep.subr.mxu1 %v14791_v40  ;;  %v6833_v8 = vmul.f32 %v11538_v4, %v13825_v58 }
 0x43e   :  { %11549 = vrcp.f32 %v6775_v16  ;;  %11298 = vmatmul.mubr.msk.f32.vlgmr.msra.gmra.mxu0 %vm568_vm2, %v6829_v10 }
 0x43f   :  { %v11540_v55 = vpop.eup %11539  ;;  %11306 = vmatpush3.msra.mxu0 %v14811_v45  ;;  %11307 = vmatprep.mubr.msk.f32.mxu0 %vm11598_vm0, %v14791_v40  ;;  %11551 = vrcp.f32 %v13912_v48 }
 0x440   :  { %11315 = vmatprep.subr.mxu0 %v14791_v40  ;;  %v6831_v57 = vmul.f32 %v11540_v55, %v13837_v62  ;;  %v3436_v62 = vcombine.high %v13871_v9, %v2976_v43 }
 0x441   :  { %v6781_v34 = vpop.xlane.xlu0 %6780 }
 0x442   :  { %11303 = vmatmul.mubr.msk.f32.vlgmr.msra.gmra.mxu1 %vm568_vm2, %v6831_v57  ;;  %11308 = vmatmul.mubr.msk.f32.vlgmr.msra.gmra.mxu0 %vm568_vm2, %v6833_v8  ;;  %11553 = vrcp.f32 %v6781_v34  ;;  %v3450_v48 = vrot.slane %v3436_v62, %v12431_v39  ;;  %v14822_v34 = vld [vmem:[#allocation28_spill] sm:$0xff] }
 0x443   :  { %v11542_v59 = vpop.eup %11541  ;;  %11311 = vmatpush3.msra.mxu1 %v14812_v18  ;;  %11316 = vmatpush3.msra.mxu0 %v14815_v33  ;;  %11555 = vrcp.f32 %v13914_v1 }
 0x444   :  { %11312 = vmatprep.mubr.msk.f32.mxu1 %vm11598_vm0, %v14791_v40  ;;  %11320 = vmatprep.subr.mxu1 %v14791_v40  ;;  %v6835_v58 = vmul.f32 %v11542_v59, %v13845_v60  ;;  %v11544_v31 = vpop.eup %11543  ;;  %v14817_v60 = vcombine.high %v14813_v30, %v14814_v56  ;;  %11557 = vrcp.f32 %v6787_v5 }
 0x445   :  { %v2970_v51 = vpop.permute.xlu0 %2969  ;;  %11317 = vmatprep.mubr.msk.f32.mxu0 %vm11598_vm0, %v14791_v40  ;;  %11325 = vmatprep.subr.mxu0 %v14791_v40  ;;  %v6839_v2 = vmul.f32 %v11544_v31, %v13827_v42 }
 0x446   :  { %v3419_v26 = vcombine.low %v14816_v54, %v2970_v51  ;;  %v3420_v9 = vcombine.high %v14816_v54, %v2970_v51  ;;  %11313 = vmatmul.mubr.msk.f32.vlgmr.msra.gmra.mxu1 %vm568_vm2, %v6835_v58  ;;  %v14824_v58 = vld [vmem:[#allocation27_spill] sm:$0xff] }
 0x447   :  { %v11546_v24 = vpop.eup %11545  ;;  %11321 = vmatpush3.msra.mxu1 %v14817_v60  ;;  %11322 = vmatprep.mubr.msk.f32.mxu1 %vm11598_vm0, %v14791_v40 }
 0x448   :  { %v11548_v13 = vpop.eup %11547  ;;  %v3427_v27 = vrot.slane %v3419_v26, %v12431_v39  ;;  %v3434_v36 = vrot.slane %v3420_v9, %v12431_v39  ;;  %11330 = vmatprep.subr.mxu1 %v14791_v40  ;;  %v6837_v25 = vmul.f32 %v11546_v24, %v13857_v19 }
 0x449   :  { %v6841_v19 = vmul.f32 %v11548_v13, %v13843_v7 }
 0x44a   :  { %v3483_v53 = vcombine.low %v3427_v27, %v3443_v28  ;;  %v3484_v22 = vcombine.high %v3427_v27, %v3443_v28  ;;  %v3499_v63 = vcombine.low %v3434_v36, %v3450_v48  ;;  %v3500_v17 = vcombine.high %v3434_v36, %v3450_v48  ;;  %11318 = vmatmul.mubr.msk.f32.vlgmr.msra.gmra.mxu0 %vm568_vm2, %v6837_v25 }
 0x44b   :  { %v11550_v37 = vpop.eup %11549  ;;  %11323 = vmatmul.mubr.msk.f32.vlgmr.msra.gmra.mxu1 %vm568_vm2, %v6839_v2  ;;  %11326 = vmatpush3.msra.mxu0 %v14820_v15 }
 0x44c   :  { %v3491_v1 = vrot.slane %v3483_v53, %v14796_v3  ;;  %v3498_v42 = vrot.slane %v3484_v22, %v14796_v3  ;;  %v3507_v50 = vrot.slane %v3499_v63, %v14796_v3  ;;  %v3514_v41 = vrot.slane %v3500_v17, %v14796_v3  ;;  %11331 = vmatpush3.msra.mxu1 %v14821_v35  ;;  %v11552_v10 = vpop.eup %11551 }
 0x44d   :  { %11327 = vmatprep.mubr.msk.f32.mxu0 %vm11598_vm0, %v14791_v40  ;;  %11332 = vmatprep.mubr.msk.f32.mxu1 %vm11598_vm0, %v14791_v40  ;;  %v6843_v7 = vmul.f32 %v11550_v37, %v13861_v46  ;;  %v6845_v8 = vmul.f32 %v11552_v10, %v13703_v61  ;;  %v14823_v61 = vld [vmem:[#allocation26_spill] sm:$0xff] }
 0x44e   :  { %v10770_v0 = vcombine.low %v3491_v1, %v3498_v42  ;;  %v10772_v47 = vcombine.high %v3491_v1, %v3498_v42  ;;  %v10774_v29 = vcombine.low %v3507_v50, %v3514_v41  ;;  %v10776_v52 = vcombine.high %v3507_v50, %v3514_v41  ;;  %11328 = vmatmul.mubr.msk.f32.vlgmr.msra.gmra.mxu0 %vm568_vm2, %v6841_v19 }
 0x44f   :  { %11333 = vmatmul.mubr.msk.f32.vlgmr.msra.gmra.mxu1 %vm568_vm2, %v6843_v7  ;;  %11335 = vmatprep.subr.mxu0 %v14791_v40  ;;  %v11554_v4 = vpop.eup %11553 }
 0x450   :  { %v3946_v14 = vrot.slane %v10770_v0, %v12431_v39  ;;  %v3962_v5 = vrot.slane %v10772_v47, %v12431_v39  ;;  %v3978_v21 = vrot.slane %v10774_v29, %v12431_v39  ;;  %v3994_v49 = vrot.slane %v10776_v52, %v12431_v39  ;;  %11340 = vmatprep.subr.mxu1 %v14791_v40  ;;  %v11556_v45 = vpop.eup %11555 }
 0x451   :  { %11337 = vmatprep.mubr.msk.f32.mxu0 %vm11598_vm0, %v14791_v40  ;;  %11342 = vmatprep.mubr.msk.f32.mxu1 %vm11598_vm0, %v14791_v40  ;;  %v6847_v59 = vmul.f32 %v11554_v4, %v14822_v34  ;;  %v11558_v18 = vpop.eup %11557  ;;  %v6849_v62 = vmul.f32 %v11556_v45, %v14823_v61 }
 0x452   :  { %v4011_v46 = vcombine.low %v3946_v14, %v3962_v5  ;;  %v4043_v44 = vcombine.low %v3978_v21, %v3994_v49  ;;  %v4012_v38 = vcombine.high %v3946_v14, %v3962_v5  ;;  %v4044_v32 = vcombine.high %v3978_v21, %v3994_v49 }
 0x453   :  { %v6851_v51 = vmul.f32 %v11558_v18, %v14824_v58 }
 0x454   :  { %v4019_v16 = vrot.slane %v4011_v46, %v14796_v3  ;;  %v4051_v55 = vrot.slane %v4043_v44, %v14796_v3  ;;  %v4026_v11 = vrot.slane %v4012_v38, %v14796_v3  ;;  %v4058_v20 = vrot.slane %v4044_v32, %v14796_v3 }
 0x456   :  { %v4063_v43 = vcombine.low %v4019_v16, %v4051_v55  ;;  %v4064_v57 = vcombine.high %v4019_v16, %v4051_v55  ;;  %v4065_v30 = vcombine.low %v4026_v11, %v4058_v20  ;;  %v4066_v56 = vcombine.high %v4026_v11, %v4058_v20 }
 0x457   :  { %v6994_v6 = vpop.f32.mrf.mxu1 }
 0x458   :  { %11336 = vmatpush3.msra.mxu0 %v4063_v43  ;;  %11341 = vmatpush3.msra.mxu1 %v4064_v57 }
 0x459   :  { %11338 = vmatmul.mubr.msk.f32.vlgmr.msra.gmra.mxu0 %vm568_vm2, %v6845_v8  ;;  %11343 = vmatmul.mubr.msk.f32.vlgmr.msra.gmra.mxu1 %vm568_vm2, %v6847_v59  ;;  %v11204_v33 = vpop.f32.mrf.mxu1 }
 0x45a   :  { %11345 = vmatprep.subr.mxu0 %v14791_v40  ;;  %11350 = vmatprep.subr.mxu1 %v14791_v40 }
 0x45b   :  { %11346 = vmatpush3.msra.mxu0 %v4065_v30  ;;  %11351 = vmatpush3.msra.mxu1 %v4066_v56 }
 0x45c   :  { %11347 = vmatprep.mubr.msk.f32.mxu0 %vm11598_vm0, %v14791_v40  ;;  %11352 = vmatprep.mubr.msk.f32.mxu1 %vm11598_vm0, %v14791_v40  ;;  %vm10419_vm0 = vcmask 883712  }
 0x45d   :  { %11348 = vmatmul.mubr.msk.f32.vlgmr.msra.gmra.mxu0 %vm568_vm2, %v6849_v62  ;;  %11353 = vmatmul.mubr.msk.f32.vlgmr.msra.gmra.mxu1 %vm568_vm2, %v6851_v51  ;;  %vm10422_vm2 = vcmask 982016  }
 0x49a   :  { %v6921_v31 = vpop.f32.mrf.mxu0 }
 0x49c   :  { %v11199_v54 = vpop.f32.mrf.mxu0 }
 0x4d2   :  { %v7067_v26 = vpop.f32.mrf.mxu0 }
 0x4d3   :  { %v9188_v9 = vcombine.low %v6921_v31, %v7067_v26  ;;  %v9189_v24 = vcombine.high %v6921_v31, %v7067_v26 }
 0x4d4   :  { %v11209_v28 = vpop.f32.mrf.mxu0 }
 0x4d5   :  { %v9196_v25 = vrot.slane %v9188_v9, %v12431_v39  ;;  %v9203_v2 = vrot.slane %v9189_v24, %v12431_v39 }
 0x4d6   :  { %v7140_v60 = vpop.f32.mrf.mxu1 }
 0x4d7   :  { %v9204_v13 = vcombine.low %v6994_v6, %v7140_v60  ;;  %v9205_v48 = vcombine.high %v6994_v6, %v7140_v60  ;;  %v7213_v27 = vpop.f32.mrf.mxu0 }
 0x4d8   :  { %v11214_v36 = vpop.f32.mrf.mxu1 }
 0x4d9   :  { %v9212_v40 = vrot.slane %v9204_v13, %v12431_v39  ;;  %v9219_v53 = vrot.slane %v9205_v48, %v12431_v39  ;;  %v11219_v22 = vpop.f32.mrf.mxu0 }
 0x4da   :  { %v7286_v63 = vpop.f32.mrf.mxu1 }
 0x4db   :  { %v9252_v17 = vcombine.low %v9196_v25, %v9212_v40  ;;  %v9253_v37 = vcombine.high %v9196_v25, %v9212_v40  ;;  %v9268_v12 = vcombine.low %v9203_v2, %v9219_v53  ;;  %v9269_v23 = vcombine.high %v9203_v2, %v9219_v53  ;;  %v7359_v15 = vpop.f32.mrf.mxu0 }
 0x4dc   :  { %v11224_v19 = vpop.f32.mrf.mxu1  ;;  %v9220_v7 = vcombine.low %v7213_v27, %v7359_v15  ;;  %v9221_v0 = vcombine.high %v7213_v27, %v7359_v15 }
 0x4dd   :  { %v9260_v1 = vrot.slane %v9252_v17, %v14796_v3  ;;  %v9267_v42 = vrot.slane %v9253_v37, %v14796_v3  ;;  %v9276_v50 = vrot.slane %v9268_v12, %v14796_v3  ;;  %v9283_v41 = vrot.slane %v9269_v23, %v14796_v3  ;;  %v11229_v35 = vpop.f32.mrf.mxu0 }
 0x4de   :  { %v7432_v47 = vpop.f32.mrf.mxu1  ;;  %v9228_v44 = vrot.slane %v9220_v7, %v12431_v39  ;;  %v9235_v38 = vrot.slane %v9221_v0, %v12431_v39  ;;  %v10471_v35 = vld [vmem:[%s14724_s7 + $0xf8] sm:$0xff] }
 0x4df   :  { %v10873_v29 = vcombine.low %v9260_v1, %v9267_v42  ;;  %v10875_v52 = vcombine.high %v9260_v1, %v9267_v42  ;;  %v10877_v14 = vcombine.low %v9276_v50, %v9283_v41  ;;  %v10879_v5 = vcombine.high %v9276_v50, %v9283_v41  ;;  %10507 = vmatprep.subr.mxu0 %v10471_v35  ;;  %v10464_v35 = vld [vmem:[%s14724_s7 + $0xc0] sm:$0xff] }
 0x4e0   :  { %v9236_v21 = vcombine.low %v7286_v63, %v7432_v47  ;;  %v9237_v49 = vcombine.high %v7286_v63, %v7432_v47  ;;  %v11234_v46 = vpop.f32.mrf.mxu1 }
 0x4e1   :  { %v9740_v55 = vrot.slane %v10873_v29, %v12431_v39  ;;  %v9756_v11 = vrot.slane %v10875_v52, %v12431_v39  ;;  %v9772_v20 = vrot.slane %v10877_v14, %v12431_v39  ;;  %v9788_v45 = vrot.slane %v10879_v5, %v12431_v39 }
 0x4e2   :  { %v9244_v32 = vrot.slane %v9236_v21, %v12431_v39  ;;  %v9251_v10 = vrot.slane %v9237_v49, %v12431_v39  ;;  %v7505_v4 = vpop.f32.mrf.mxu0  ;;  %v7578_v16 = vpop.f32.mrf.mxu1 }
 0x4e3   :  { %v9797_v24 = vcombine.high %v9740_v55, %v9756_v11  ;;  %v9829_v28 = vcombine.high %v9772_v20, %v9788_v45  ;;  %v9796_v60 = vcombine.low %v9740_v55, %v9756_v11  ;;  %v9828_v13 = vcombine.low %v9772_v20, %v9788_v45  ;;  %v10468_v55 = vld [vmem:[%s14724_s7 + $0xe0] sm:$0xff] }
 0x4e4   :  { %v9284_v43 = vcombine.low %v9228_v44, %v9244_v32  ;;  %v9285_v57 = vcombine.high %v9228_v44, %v9244_v32  ;;  %v9300_v8 = vcombine.low %v9235_v38, %v9251_v10  ;;  %v9301_v34 = vcombine.high %v9235_v38, %v9251_v10  ;;  %v11239_v59 = vpop.f32.mrf.mxu0  ;;  %v11244_v6 = vpop.f32.mrf.mxu1 }
 0x4e5   :  { %v14267_v1 = vrot.slane %v9797_v24, %v14796_v3  ;;  %v14270_v42 = vrot.slane %v9829_v28, %v14796_v3  ;;  %v14273_v50 = vrot.slane %v9796_v60, %v14796_v3  ;;  %v14276_v41 = vrot.slane %v9828_v13, %v14796_v3 }
 0x4e6   :  { %v9292_v18 = vrot.slane %v9284_v43, %v14796_v3  ;;  %v9299_v30 = vrot.slane %v9285_v57, %v14796_v3  ;;  %v14255_v56 = vrot.slane %v9300_v8, %v14796_v3  ;;  %v14258_v33 = vrot.slane %v9301_v34, %v14796_v3  ;;  %v7651_v61 = vpop.f32.mrf.mxu0  ;;  %v7724_v62 = vpop.f32.mrf.mxu1 }
 0x4e7   :  { %v9324_v58 = vcombine.low %v7505_v4, %v7651_v61  ;;  %v9325_v51 = vcombine.high %v7505_v4, %v7651_v61  ;;  %v9340_v31 = vcombine.low %v7578_v16, %v7724_v62  ;;  %v9341_v54 = vcombine.high %v7578_v16, %v7724_v62  ;;  %v10470_v4 = vld [vmem:[%s14724_s7 + $0xf0] sm:$0xff]  ;;  %v10469_v16 = vld [vmem:[%s14724_s7 + $0xe8] sm:$0xff] }
 0x4e8   :  { %v11249_v26 = vpop.f32.mrf.mxu0  ;;  %v11254_v9 = vpop.f32.mrf.mxu1  ;;  %v10874_v2 = vcombine.low %v9292_v18, %v9299_v30  ;;  %v10876_v40 = vcombine.high %v9292_v18, %v9299_v30  ;;  %v10878_v53 = vcombine.low %v14255_v56, %v14258_v33  ;;  %v10880_v21 = vcombine.high %v14255_v56, %v14258_v33  ;;  %10508 = vmatpush1.msra.mxu0 %v10470_v4 }
 0x4e9   :  { %v9332_v48 = vrot.slane %v9324_v58, %v12431_v39  ;;  %v9339_v27 = vrot.slane %v9325_v51, %v12431_v39  ;;  %v9348_v36 = vrot.slane %v9340_v31, %v12431_v39  ;;  %v9355_v25 = vrot.slane %v9341_v54, %v12431_v39  ;;  %10509 = vmatprep.subr.mxu0 %v10469_v16 }
 0x4ea   :  { %v7797_v22 = vpop.f32.mrf.mxu0  ;;  %v7870_v63 = vpop.f32.mrf.mxu1  ;;  %v14286_v52 = vrot.slane %v10874_v2, %v12431_v39  ;;  %v14289_v14 = vrot.slane %v10876_v40, %v12431_v39  ;;  %v14292_v5 = vrot.slane %v10878_v53, %v12431_v39  ;;  %10510 = vmatpush1.msra.mxu0 %v10468_v55  ;;  %v10466_v2 = vld [vmem:[%s14724_s7 + $0xd0] sm:$0xff]  ;;  %v10465_v40 = vld [vmem:[%s14724_s7 + $0xc8] sm:$0xff] }
 0x4eb   :  { %v9388_v17 = vcombine.low %v9332_v48, %v9348_v36  ;;  %v9389_v37 = vcombine.high %v9332_v48, %v9348_v36  ;;  %v9404_v12 = vcombine.low %v9339_v27, %v9355_v25  ;;  %v9405_v23 = vcombine.high %v9339_v27, %v9355_v25  ;;  %v10467_v25 = vld [vmem:[%s14724_s7 + $0xd8] sm:$0xff] }
 0x4ec   :  { %v11259_v15 = vpop.f32.mrf.mxu0  ;;  %v11264_v19 = vpop.f32.mrf.mxu1  ;;  %10511 = vmatprep.subr.mxu0 %v10467_v25 }
 0x4ed   :  { %v9396_v7 = vrot.slane %v9388_v17, %v14796_v3  ;;  %v9403_v0 = vrot.slane %v9389_v37, %v14796_v3  ;;  %v9412_v47 = vrot.slane %v9404_v12, %v14796_v3  ;;  %v9419_v29 = vrot.slane %v9405_v23, %v14796_v3  ;;  %10512 = vmatpush1.msra.mxu0 %v10466_v2 }
 0x4ee   :  { %v7943_v49 = vpop.f32.mrf.mxu0  ;;  %v8016_v46 = vpop.f32.mrf.mxu1  ;;  %v14337_v12 = vrot.slane %v10880_v21, %v12431_v39  ;;  %v9862_v19 = vcombine.low %v14267_v1, %v14270_v42  ;;  %10513 = vmatprep.subr.mxu0 %v10465_v40 }
 0x4ef   :  { %v10889_v44 = vcombine.low %v9396_v7, %v9403_v0  ;;  %v10891_v38 = vcombine.high %v9396_v7, %v9403_v0  ;;  %v10893_v32 = vcombine.low %v9412_v47, %v9419_v29  ;;  %v10895_v10 = vcombine.high %v9412_v47, %v9419_v29  ;;  %10514 = vmatpush1.msra.mxu0 %v10464_v35 }
 0x4f0   :  { %v9356_v11 = vcombine.low %v7797_v22, %v7943_v49  ;;  %v9357_v20 = vcombine.high %v7797_v22, %v7943_v49  ;;  %v9372_v45 = vcombine.low %v7870_v63, %v8016_v46  ;;  %v9373_v43 = vcombine.high %v7870_v63, %v8016_v46  ;;  %v11269_v57 = vpop.f32.mrf.mxu0  ;;  %v11274_v8 = vpop.f32.mrf.mxu1 }
 0x4f1   :  { %v10012_v34 = vrot.slane %v10889_v44, %v12431_v39  ;;  %v10028_v59 = vrot.slane %v10891_v38, %v12431_v39  ;;  %v10044_v6 = vrot.slane %v10893_v32, %v12431_v39  ;;  %v10060_v18 = vrot.slane %v10895_v10, %v12431_v39  ;;  %v10463_v38 = vld [vmem:[%s14724_s7 + $0xb8] sm:$0xff]  ;;  %v10462_v32 = vld [vmem:[%s14724_s7 + $0xb0] sm:$0xff] }
 0x4f2   :  { %v9364_v30 = vrot.slane %v9356_v11, %v12431_v39  ;;  %v9371_v56 = vrot.slane %v9357_v20, %v12431_v39  ;;  %v9380_v33 = vrot.slane %v9372_v45, %v12431_v39  ;;  %v9387_v61 = vrot.slane %v9373_v43, %v12431_v39  ;;  %v14313_v62 = vpop.f32.mrf.mxu0  ;;  %10515 = vmatprep.subr.mxu0 %v10463_v38 }
 0x4f3   :  { %v10069_v58 = vcombine.high %v10012_v34, %v10028_v59  ;;  %v10101_v51 = vcombine.high %v10044_v6, %v10060_v18  ;;  %v10068_v31 = vcombine.low %v10012_v34, %v10028_v59  ;;  %v10100_v54 = vcombine.low %v10044_v6, %v10060_v18  ;;  %v10461_v34 = vld [vmem:[%s14724_s7 + $0xa8] sm:$0xff]  ;;  %10516 = vmatpush1.msra.mxu0 %v10462_v32 }
 0x4f4   :  { %v9420_v26 = vcombine.low %v9364_v30, %v9380_v33  ;;  %v9421_v9 = vcombine.high %v9364_v30, %v9380_v33  ;;  %v9436_v24 = vcombine.low %v9371_v56, %v9387_v61  ;;  %v9437_v28 = vcombine.high %v9371_v56, %v9387_v61  ;;  %v11279_v60 = vpop.f32.mrf.mxu0  ;;  %v10460_v61 = vld [vmem:[%s14724_s7 + $0xa0] sm:$0xff]  ;;  %10517 = vmatprep.subr.mxu0 %v10461_v34 }
 0x4f5   :  { %v10083_v13 = vrot.slane %v10069_v58, %v14796_v3  ;;  %v10115_v48 = vrot.slane %v10101_v51, %v14796_v3  ;;  %v14318_v27 = vrot.slane %v10068_v31, %v14796_v3  ;;  %v14321_v36 = vrot.slane %v10100_v54, %v14796_v3  ;;  %v10459_v54 = vld [vmem:[%s14724_s7 + $0x98] sm:$0xff]  ;;  %10518 = vmatpush1.msra.mxu0 %v10460_v61 }
 0x4f6   :  { %v9428_v53 = vrot.slane %v9420_v26, %v14796_v3  ;;  %v9435_v22 = vrot.slane %v9421_v9, %v14796_v3  ;;  %v9444_v63 = vrot.slane %v9436_v24, %v14796_v3  ;;  %v9451_v17 = vrot.slane %v9437_v28, %v14796_v3  ;;  %v8162_v37 = vpop.f32.mrf.mxu1  ;;  %10519 = vmatprep.subr.mxu0 %v10459_v54 }
 0x4f7   :  { %v10135_v23 = vcombine.high %v10083_v13, %v10115_v48  ;;  %v10134_v15 = vcombine.low %v10083_v13, %v10115_v48  ;;  %v10133_v21 = vcombine.high %v14318_v27, %v14321_v36  ;;  %v9861_v46 = vcombine.high %v14273_v50, %v14276_v41  ;;  %v10458_v13 = vld [vmem:[%s14724_s7 + $0x90] sm:$0xff] }
 0x4f8   :  { %v10890_v7 = vcombine.low %v9428_v53, %v9435_v22  ;;  %v10892_v0 = vcombine.high %v9428_v53, %v9435_v22  ;;  %v10894_v47 = vcombine.low %v9444_v63, %v9451_v17  ;;  %v10896_v29 = vcombine.high %v9444_v63, %v9451_v17  ;;  %v11284_v49 = vpop.f32.mrf.mxu1  ;;  %v10457_v53 = vld [vmem:[%s14724_s7 + $0x88] sm:$0xff]  ;;  %10520 = vmatpush1.msra.mxu0 %v10458_v13 }
 0x4f9   :  { %10358 = vrot.lane.b32.xlu0 %v10135_v23, %s11609_s26  ;;  %10350 = vrot.lane.b32.xlu1 %v10134_v15, %s11610_s27  ;;  %v9863_v44 = vcombine.high %v14267_v1, %v14270_v42  ;;  %v9812_v56 = vcombine.low %v14286_v52, %v14289_v14  ;;  %v9844_v33 = vcombine.low %v14292_v5, %v14337_v12  ;;  %v10456_v15 = vld [vmem:[%s14724_s7 + $0x80] sm:$0xff]  ;;  %v10449_v13 = vld [vmem:[%s14724_s7 + $0x48] sm:$0xff] }
 0x4fa   :  { %v10019_v10 = vrot.slane %v10890_v7, %v12431_v39  ;;  %v10035_v4 = vrot.slane %v10892_v0, %v12431_v39  ;;  %v10051_v16 = vrot.slane %v10894_v47, %v12431_v39  ;;  %v10067_v55 = vrot.slane %v10896_v29, %v12431_v39  ;;  %v8235_v11 = vpop.f32.mrf.mxu0  ;;  %v8308_v20 = vpop.f32.mrf.mxu1  ;;  %v10455_v29 = vld [vmem:[%s14724_s7 + $0x78] sm:$0xff]  ;;  %10521 = vmatprep.subr.mxu0 %v10457_v53  ;;  %v10442_v1 = vld [vmem:[%s14724_s7 + $0x10] sm:$0xff] }
 0x4fb   :  { %v9460_v45 = vcombine.low %v14313_v62, %v8235_v11  ;;  %v9461_v43 = vcombine.high %v14313_v62, %v8235_v11  ;;  %v9476_v57 = vcombine.low %v8162_v37, %v8308_v20  ;;  %v9477_v8 = vcombine.high %v8162_v37, %v8308_v20  ;;  %10522 = vmatpush1.msra.mxu0 %v10456_v15 }
 0x4fc   :  { %v11289_v59 = vpop.f32.mrf.mxu0  ;;  %v11294_v6 = vpop.f32.mrf.mxu1  ;;  %v10084_v18 = vcombine.low %v10019_v10, %v10035_v4  ;;  %v10116_v30 = vcombine.low %v10051_v16, %v10067_v55  ;;  %v10085_v28 = vcombine.high %v10019_v10, %v10035_v4  ;;  %v10117_v60 = vcombine.high %v10051_v16, %v10067_v55  ;;  %v10454_v4 = vld [vmem:[%s14724_s7 + $0x70] sm:$0xff]  ;;  %10523 = vmatprep.subr.mxu0 %v10455_v29 }
 0x4fd   :  { %v9468_v62 = vrot.slane %v9460_v45, %v12431_v39  ;;  %v9475_v58 = vrot.slane %v9461_v43, %v12431_v39  ;;  %v9484_v51 = vrot.slane %v9476_v57, %v12431_v39  ;;  %v9491_v31 = vrot.slane %v9477_v8, %v12431_v39  ;;  %10342 = vrot.lane.b32.xlu1 %v10133_v21, %s11611_s15  ;;  %v10453_v45 = vld [vmem:[%s14724_s7 + $0x68] sm:$0xff] }
 0x4fe   :  { %v14382_v26 = vpop.f32.mrf.mxu0  ;;  %v10092_v9 = vrot.slane %v10084_v18, %v14796_v3  ;;  %v10124_v24 = vrot.slane %v10116_v30, %v14796_v3  ;;  %v14393_v17 = vrot.slane %v9812_v56, %v14796_v3  ;;  %v14396_v37 = vrot.slane %v9844_v33, %v14796_v3  ;;  %v10452_v18 = vld [vmem:[%s14724_s7 + $0x60] sm:$0xff]  ;;  %10524 = vmatpush1.msra.mxu0 %v10454_v4 }
 0x4ff   :  { %v9524_v48 = vcombine.low %v9468_v62, %v9484_v51  ;;  %v9525_v25 = vcombine.high %v9468_v62, %v9484_v51  ;;  %v9540_v2 = vcombine.low %v9475_v58, %v9491_v31  ;;  %v9541_v40 = vcombine.high %v9475_v58, %v9491_v31  ;;  %10525 = vmatprep.subr.mxu0 %v10453_v45 }
 0x500   :  { %v11299_v22 = vpop.f32.mrf.mxu0  ;;  %v10136_v63 = vcombine.low %v10092_v9, %v10124_v24  ;;  %v9813_v23 = vcombine.high %v14286_v52, %v14289_v14  ;;  %v14412_v38 = vrot.slane %v10085_v28, %v14796_v3  ;;  %v14415_v32 = vrot.slane %v10117_v60, %v14796_v3  ;;  %10526 = vmatpush1.msra.mxu0 %v10452_v18  ;;  %v10451_v28 = vld [vmem:[%s14724_s7 + $0x58] sm:$0xff]  ;;  %v10450_v60 = vld [vmem:[%s14724_s7 + $0x50] sm:$0xff] }
 0x501   :  { %v9532_v35 = vrot.slane %v9524_v48, %v14796_v3  ;;  %v9539_v7 = vrot.slane %v9525_v25, %v14796_v3  ;;  %v9548_v0 = vrot.slane %v9540_v2, %v14796_v3  ;;  %v9555_v47 = vrot.slane %v9541_v40, %v14796_v3  ;;  %10527 = vmatprep.subr.mxu0 %v10451_v28  ;;  %v10448_v22 = vld [vmem:[%s14724_s7 + $0x40] sm:$0xff] }
 0x502   :  { %10366 = vrot.lane.b32.xlu0 %v10136_v63, %s11612_s22  ;;  %v8454_v49 = vpop.f32.mrf.mxu1  ;;  %v8527_v21 = vpop.f32.mrf.mxu0  ;;  %v9845_v10 = vcombine.high %v14292_v5, %v14337_v12  ;;  %v10137_v59 = vcombine.high %v10092_v9, %v10124_v24  ;;  %v9865_v6 = vcombine.high %v14393_v17, %v14396_v37  ;;  %v10138_v51 = vcombine.low %v14412_v38, %v14415_v32 }
 0x503   :  { %v10881_v16 = vcombine.low %v9532_v35, %v9539_v7  ;;  %v10883_v55 = vcombine.high %v9532_v35, %v9539_v7  ;;  %v10885_v11 = vcombine.low %v9548_v0, %v9555_v47  ;;  %v10887_v20 = vcombine.high %v9548_v0, %v9555_v47  ;;  %10528 = vmatpush1.msra.mxu0 %v10450_v60 }
 0x504   :  { %v9492_v43 = vcombine.low %v14382_v26, %v8527_v21  ;;  %v9493_v57 = vcombine.high %v14382_v26, %v8527_v21  ;;  %v11304_v8 = vpop.f32.mrf.mxu1  ;;  %v11309_v34 = vpop.f32.mrf.mxu0  ;;  %v9864_v31 = vcombine.low %v14393_v17, %v14396_v37  ;;  %v9860_v53 = vcombine.low %v14273_v50, %v14276_v41  ;;  %10529 = vmatprep.subr.mxu0 %v10449_v13  ;;  %v10482_v17 = vld [vmem:[%s14724_s7 + $0x150] sm:$0xff] }
 0x505   :  { %v9876_v30 = vrot.slane %v10881_v16, %v12431_v39  ;;  %v9892_v56 = vrot.slane %v10883_v55, %v12431_v39  ;;  %v9908_v33 = vrot.slane %v10885_v11, %v12431_v39  ;;  %v9924_v61 = vrot.slane %v10887_v20, %v12431_v39  ;;  %10530 = vmatpush1.msra.mxu0 %v10448_v22  ;;  %v10447_v20 = vld [vmem:[%s14724_s7 + $0x38] sm:$0xff] }
 0x506   :  { %v9500_v62 = vrot.slane %v9492_v43, %v12431_v39  ;;  %10374 = vrot.lane.b32.xlu0 %v10137_v59, %s11613_s12  ;;  %v8600_v58 = vpop.f32.mrf.mxu1  ;;  %v9507_v48 = vrot.slane %v9493_v57, %v12431_v39  ;;  %v10139_v47 = vcombine.high %v14412_v38, %v14415_v32  ;;  %v10446_v38 = vld [vmem:[%s14724_s7 + $0x30] sm:$0xff]  ;;  %v10445_v32 = vld [vmem:[%s14724_s7 + $0x28] sm:$0xff]  ;;  %10531 = vmatprep.subr.mxu0 %v10447_v20  ;;  %v10444_v59 = vld [vmem:[%s14724_s7 + $0x20] sm:$0xff] }
 0x507   :  { %v9508_v54 = vcombine.low %v8454_v49, %v8600_v58  ;;  %v9509_v26 = vcombine.high %v8454_v49, %v8600_v58  ;;  %v9933_v9 = vcombine.high %v9876_v30, %v9892_v56  ;;  %v9965_v24 = vcombine.high %v9908_v33, %v9924_v61  ;;  %10532 = vmatpush1.msra.mxu0 %v10446_v38 }
 0x508   :  { %v11314_v25 = vpop.f32.mrf.mxu1  ;;  %v9932_v2 = vcombine.low %v9876_v30, %v9892_v56  ;;  %v9964_v40 = vcombine.low %v9908_v33, %v9924_v61  ;;  %10533 = vmatprep.subr.mxu0 %v10445_v32 }
 0x509   :  { %v9516_v63 = vrot.slane %v9508_v54, %v12431_v39  ;;  %v9523_v15 = vrot.slane %v9509_v26, %v12431_v39  ;;  %v9947_v35 = vrot.slane %v9933_v9, %v14796_v3  ;;  %v9979_v7 = vrot.slane %v9965_v24, %v14796_v3  ;;  %v10443_v26 = vld [vmem:[%s14724_s7 + $0x18] sm:$0xff]  ;;  %10534 = vmatpush1.msra.mxu0 %v10444_v59 }
 0x50a   :  { %10382 = vrot.lane.b32.xlu0 %v10138_v51, %s11614_s18  ;;  %v8673_v0 = vpop.f32.mrf.mxu0  ;;  %v14465_v29 = vrot.slane %v9932_v2, %v14796_v3  ;;  %v14468_v49 = vrot.slane %v9964_v40, %v14796_v3  ;;  %10535 = vmatprep.subr.mxu0 %v10443_v26 }
 0x50b   :  { %v9556_v21 = vcombine.low %v9500_v62, %v9516_v63  ;;  %v9557_v4 = vcombine.high %v9500_v62, %v9516_v63  ;;  %v9572_v16 = vcombine.low %v9507_v48, %v9523_v15  ;;  %v9573_v55 = vcombine.high %v9507_v48, %v9523_v15  ;;  %v8746_v11 = vpop.f32.mrf.mxu1  ;;  %v10441_v15 = vld [vmem:[%s14724_s7 + $0x8] sm:$0xff]  ;;  %10536 = vmatpush1.msra.mxu0 %v10442_v1 }
 0x50c   :  { %v11319_v45 = vpop.f32.mrf.mxu0  ;;  %v9998_v43 = vcombine.low %v9947_v35, %v9979_v7  ;;  %v9997_v57 = vcombine.high %v14465_v29, %v14468_v49  ;;  %v9999_v8 = vcombine.high %v9947_v35, %v9979_v7  ;;  %v9996_v34 = vcombine.low %v14465_v29, %v14468_v49  ;;  %10537 = vmatprep.subr.mxu0 %v10441_v15  ;;  %v10481_v1 = vld [vmem:[%s14724_s7 + $0x148] sm:$0xff] }
 0x50d   :  { %v9564_v18 = vrot.slane %v9556_v21, %v14796_v3  ;;  %v9571_v30 = vrot.slane %v9557_v4, %v14796_v3  ;;  %v9580_v56 = vrot.slane %v9572_v16, %v14796_v3  ;;  %v9587_v33 = vrot.slane %v9573_v55, %v14796_v3  ;;  %v11324_v61 = vpop.f32.mrf.mxu1  ;;  %v10440_v21 = vld [vmem:[%s14724_s7] sm:$0xff] }
 0x50e   :  { %10390 = vrot.lane.b32.xlu0 %v10139_v47, %s11615_s28  ;;  %v8819_v62 = vpop.f32.mrf.mxu0  ;;  %v11396_v58 = vpack.i.bf16 %v9998_v43, %v9862_v19  ;;  %v11391_v51 = vpack.i.bf16 %v9997_v57, %v9861_v46  ;;  %v11401_v54 = vpack.i.bf16 %v9999_v8, %v9863_v44  ;;  %v10487_v43 = vld [vmem:[%s14724_s7 + $0x178] sm:$0xff]  ;;  %10538 = vmatpush1.msra.mxu0 %v10440_v21 }
 0x50f   :  { %v10882_v9 = vcombine.low %v9564_v18, %v9571_v30  ;;  %v10884_v24 = vcombine.high %v9564_v18, %v9571_v30  ;;  %v10886_v28 = vcombine.low %v9580_v56, %v9587_v33  ;;  %v10888_v60 = vcombine.high %v9580_v56, %v9587_v33  ;;  %v8892_v13 = vpop.f32.mrf.mxu1  ;;  %v10486_v30 = vld [vmem:[%s14724_s7 + $0x170] sm:$0xff]  ;;  %10555 = vmatprep.subr.mxu0 %v10487_v43 }
 0x510   :  { %v9596_v19 = vcombine.low %v8673_v0, %v8819_v62  ;;  %v9597_v48 = vcombine.high %v8673_v0, %v8819_v62  ;;  %v9612_v25 = vcombine.low %v8746_v11, %v8892_v13  ;;  %v9613_v2 = vcombine.high %v8746_v11, %v8892_v13  ;;  %11397 = vrot.lane.b32.xlu1 %v11396_v58, %s11616_s3  ;;  %v11329_v46 = vpop.f32.mrf.mxu0  ;;  %v10485_v58 = vld [vmem:[%s14724_s7 + $0x168] sm:$0xff]  ;;  %s11622_s3 = smov 84  }
 0x511   :  { %v9883_v42 = vrot.slane %v10882_v9, %v12431_v39  ;;  %v9899_v44 = vrot.slane %v10884_v24, %v12431_v39  ;;  %v9915_v40 = vrot.slane %v10886_v28, %v12431_v39  ;;  %v9931_v22 = vrot.slane %v10888_v60, %v12431_v39  ;;  %v11334_v63 = vpop.f32.mrf.mxu1  ;;  %10556 = vmatpush2.msra.mxu0 %v10486_v30 }
 0x512   :  { %v9604_v35 = vrot.slane %v9596_v19, %v12431_v39  ;;  %v9611_v7 = vrot.slane %v9597_v48, %v12431_v39  ;;  %v9620_v0 = vrot.slane %v9612_v25, %v12431_v39  ;;  %v9627_v47 = vrot.slane %v9613_v2, %v12431_v39  ;;  %11392 = vrot.lane.b32.xlu0 %v11391_v51, %s11617_s16 }
 0x513   :  { %v9948_v4 = vcombine.low %v9883_v42, %v9899_v44  ;;  %v9980_v16 = vcombine.low %v9915_v40, %v9931_v22  ;;  %v9949_v55 = vcombine.high %v9883_v42, %v9899_v44  ;;  %v9981_v11 = vcombine.high %v9915_v40, %v9931_v22  ;;  %10557 = vmatprep.subr.mxu0 %v10485_v58  ;;  %v10477_v58 = vld [vmem:[%s14724_s7 + $0x128] sm:$0xff] }
 0x514   :  { %v9660_v20 = vcombine.low %v9604_v35, %v9620_v0  ;;  %v9661_v38 = vcombine.high %v9604_v35, %v9620_v0  ;;  %v9676_v32 = vcombine.low %v9611_v7, %v9627_v47  ;;  %v9677_v45 = vcombine.high %v9611_v7, %v9627_v47  ;;  %v10480_v47 = vld [vmem:[%s14724_s7 + $0x140] sm:$0xff] }
 0x515   :  { %v9956_v57 = vrot.slane %v9948_v4, %v14796_v3  ;;  %v9988_v8 = vrot.slane %v9980_v16, %v14796_v3  ;;  %v14526_v59 = vrot.slane %v9949_v55, %v14796_v3  ;;  %v14529_v18 = vrot.slane %v9981_v11, %v14796_v3  ;;  %v10479_v11 = vld [vmem:[%s14724_s7 + $0x138] sm:$0xff] }
 0x516   :  { %v9668_v56 = vrot.slane %v9660_v20, %v14796_v3  ;;  %v9675_v33 = vrot.slane %v9661_v38, %v14796_v3  ;;  %v9684_v61 = vrot.slane %v9676_v32, %v14796_v3  ;;  %v9691_v62 = vrot.slane %v9677_v45, %v14796_v3  ;;  %11402 = vrot.lane.b32.xlu0 %v11401_v54, %s11618_s21  ;;  %v10484_v54 = vld [vmem:[%s14724_s7 + $0x160] sm:$0xff] }
 0x517   :  { %v10001_v51 = vcombine.high %v9956_v57, %v9988_v8  ;;  %v10000_v26 = vcombine.low %v9956_v57, %v9988_v8  ;;  %v14545_v9 = vrot.slane %v9813_v23, %v14796_v3  ;;  %v14551_v24 = vrot.slane %v9845_v10, %v14796_v3  ;;  %v10483_v23 = vld [vmem:[%s14724_s7 + $0x158] sm:$0xff]  ;;  %10558 = vmatpush2.msra.mxu0 %v10484_v54  ;;  %v10478_v8 = vld [vmem:[%s14724_s7 + $0x130] sm:$0xff]  ;;  %v10476_v54 = vld [vmem:[%s14724_s7 + $0x120] sm:$0xff] }
 0x518   :  { %v10897_v28 = vcombine.low %v9668_v56, %v9675_v33  ;;  %v10899_v60 = vcombine.high %v9668_v56, %v9675_v33  ;;  %v10901_v13 = vcombine.low %v9684_v61, %v9691_v62  ;;  %v10903_v19 = vcombine.high %v9684_v61, %v9691_v62  ;;  %10559 = vmatprep.subr.mxu0 %v10483_v23 }
 0x519   :  { %v8965_v48 = vpop.f32.mrf.mxu0  ;;  %v9038_v52 = vpop.f32.mrf.mxu1  ;;  %v11411_v14 = vpack.i.bf16 %v10001_v51, %v9865_v6  ;;  %v11406_v5 = vpack.i.bf16 %v10000_v26, %v9864_v31  ;;  %v10002_v12 = vcombine.low %v14526_v59, %v14529_v18  ;;  %v9866_v46 = vcombine.low %v14545_v9, %v14551_v24  ;;  %10560 = vmatpush2.msra.mxu0 %v10482_v17 }
 0x51a   :  { %v10148_v10 = vrot.slane %v10897_v28, %v12431_v39  ;;  %v10164_v25 = vrot.slane %v10899_v60, %v12431_v39  ;;  %v10180_v2 = vrot.slane %v10901_v13, %v12431_v39  ;;  %v10196_v6 = vrot.slane %v10903_v19, %v12431_v39  ;;  %10561 = vmatprep.subr.mxu0 %v10481_v1  ;;  %v10475_v60 = vld [vmem:[%s14724_s7 + $0x118] sm:$0xff] }
 0x51b   :  { %11412 = vrot.lane.b32.xlu0 %v11411_v14, %s11619_s6  ;;  %11407 = vrot.lane.b32.xlu1 %v11406_v5, %s11620_s1  ;;  %v11339_v37 = vpop.f32.mrf.mxu0  ;;  %v11344_v31 = vpop.f32.mrf.mxu1  ;;  %v11416_v35 = vpack.i.bf16 %v10002_v12, %v9866_v46  ;;  %v9867_v7 = vcombine.high %v14545_v9, %v14551_v24  ;;  %v10003_v0 = vcombine.high %v14526_v59, %v14529_v18  ;;  %v10474_v14 = vld [vmem:[%s14724_s7 + $0x110] sm:$0xff] }
 0x51c   :  { %v10205_v42 = vcombine.high %v10148_v10, %v10164_v25  ;;  %v10237_v44 = vcombine.high %v10180_v2, %v10196_v6  ;;  %v10204_v40 = vcombine.low %v10148_v10, %v10164_v25  ;;  %v10236_v22 = vcombine.low %v10180_v2, %v10196_v6  ;;  %10562 = vmatpush2.msra.mxu0 %v10480_v47  ;;  %v10472_v25 = vld [vmem:[%s14724_s7 + $0x100] sm:$0xff] }
 0x51d   :  { %v9111_v63 = vpop.f32.mrf.mxu0  ;;  %v9184_v15 = vpop.f32.mrf.mxu1  ;;  %v11421_v61 = vpack.i.bf16 %v10003_v0, %v9867_v7  ;;  %10563 = vmatprep.subr.mxu0 %v10479_v11  ;;  %v10132_v28 = vcombine.low %v14318_v27, %v14321_v36  ;;  %v10473_v27 = vld [vmem:[%s14724_s7 + $0x108] sm:$0xff] }
 0x51e   :  { %v9628_v21 = vcombine.low %v8965_v48, %v9111_v63  ;;  %v9629_v4 = vcombine.high %v8965_v48, %v9111_v63  ;;  %v9644_v16 = vcombine.low %v9038_v52, %v9184_v15  ;;  %v9645_v55 = vcombine.high %v9038_v52, %v9184_v15  ;;  %10564 = vmatpush2.msra.mxu0 %v10478_v8 }
 0x51f   :  { %11417 = vrot.lane.b32.xlu1 %v11416_v35, %s11621_s20  ;;  %v11349_v20 = vpop.f32.mrf.mxu0  ;;  %v11354_v38 = vpop.f32.mrf.mxu1  ;;  %v10219_v32 = vrot.slane %v10205_v42, %v14796_v3  ;;  %v10251_v45 = vrot.slane %v10237_v44, %v14796_v3  ;;  %v14592_v43 = vrot.slane %v10204_v40, %v14796_v3  ;;  %v14595_v57 = vrot.slane %v10236_v22, %v14796_v3 }
 0x520   :  { %v9636_v59 = vrot.slane %v9628_v21, %v12431_v39  ;;  %v9643_v18 = vrot.slane %v9629_v4, %v12431_v39  ;;  %v9652_v30 = vrot.slane %v9644_v16, %v12431_v39  ;;  %v9659_v56 = vrot.slane %v9645_v55, %v12431_v39  ;;  %10565 = vmatprep.subr.mxu0 %v10477_v58 }
 0x521   :  { %v10270_v33 = vcombine.low %v10219_v32, %v10251_v45  ;;  %v10268_v62 = vcombine.low %v14592_v43, %v14595_v57  ;;  %10566 = vmatpush2.msra.mxu0 %v10476_v54  ;;  %v10271_v31 = vcombine.high %v10219_v32, %v10251_v45 }
 0x522   :  { %v9692_v51 = vcombine.low %v9636_v59, %v9652_v30  ;;  %v9693_v26 = vcombine.high %v9636_v59, %v9652_v30  ;;  %v9708_v9 = vcombine.low %v9643_v18, %v9659_v56  ;;  %v9709_v24 = vcombine.high %v9643_v18, %v9659_v56  ;;  %10567 = vmatprep.subr.mxu0 %v10475_v60 }
 0x523   :  { %10352 = vrot.lane.b32.xlu0 %v10270_v33, %s11610_s27  ;;  %11422 = vrot.lane.b32.xlu1 %v11421_v61, %s11622_s3  ;;  %v11426_v5 = vpack.i.bf16 %v10268_v62, %v10132_v28 }
 0x524   :  { %v9700_v13 = vrot.slane %v9692_v51, %v14796_v3  ;;  %v9707_v19 = vrot.slane %v9693_v26, %v14796_v3  ;;  %v9716_v48 = vrot.slane %v9708_v9, %v14796_v3  ;;  %v9723_v52 = vrot.slane %v9709_v24, %v14796_v3  ;;  %10568 = vmatpush2.msra.mxu0 %v10474_v14 }
 0x525   :  { %10569 = vmatprep.subr.mxu0 %v10473_v27 }
 0x526   :  { %v10898_v36 = vcombine.low %v9700_v13, %v9707_v19  ;;  %v10900_v12 = vcombine.high %v9700_v13, %v9707_v19  ;;  %v10902_v23 = vcombine.low %v9716_v48, %v9723_v52  ;;  %v10904_v10 = vcombine.high %v9716_v48, %v9723_v52  ;;  %10570 = vmatpush2.msra.mxu0 %v10472_v25 }
 0x527   :  { %11427 = vrot.lane.b32.xlu1 %v11426_v5, %s11623_s4 }
 0x528   :  { %v10155_v2 = vrot.slane %v10898_v36, %v12431_v39  ;;  %v10171_v6 = vrot.slane %v10900_v12, %v12431_v39  ;;  %v10187_v17 = vrot.slane %v10902_v23, %v12431_v39  ;;  %v10203_v37 = vrot.slane %v10904_v10, %v12431_v39 }
 0x529   :  { %v10269_v39 = vcombine.high %v14592_v43, %v14595_v57 }
 0x52a   :  { %v10220_v46 = vcombine.low %v10155_v2, %v10171_v6  ;;  %v10252_v1 = vcombine.low %v10187_v17, %v10203_v37  ;;  %v10221_v42 = vcombine.high %v10155_v2, %v10171_v6  ;;  %v10253_v44 = vcombine.high %v10187_v17, %v10203_v37 }
 0x52b   :  { %10360 = vrot.lane.b32.xlu1 %v10271_v31, %s11609_s26 }
 0x52c   :  { %v10228_v40 = vrot.slane %v10220_v46, %v14796_v3  ;;  %v10260_v22 = vrot.slane %v10252_v1, %v14796_v3  ;;  %v10235_v35 = vrot.slane %v10221_v42, %v14796_v3  ;;  %v10267_v7 = vrot.slane %v10253_v44, %v14796_v3 }
 0x52e   :  { %v10273_v63 = vcombine.high %v10228_v40, %v10260_v22  ;;  %v10272_v15 = vcombine.low %v10228_v40, %v10260_v22  ;;  %v10274_v0 = vcombine.low %v10235_v35, %v10267_v7  ;;  %v10275_v47 = vcombine.high %v10235_v35, %v10267_v7 }
 0x530   :  { %10376 = vrot.lane.b32.xlu0 %v10273_v63, %s11613_s12  ;;  %10368 = vrot.lane.b32.xlu1 %v10272_v15, %s11612_s22 }
 0x534   :  { %10344 = vrot.lane.b32.xlu0 %v10269_v39, %s11611_s15  ;;  %10384 = vrot.lane.b32.xlu1 %v10274_v0, %s11614_s18 }
 0x538   :  { %10392 = vrot.lane.b32.xlu1 %v10275_v47, %s11615_s28 }
 0x56b   :  { %v10359_v21 = vpop.permute.xlu0 %10358  ;;  %v10351_v3 = vpop.permute.xlu1 %10350 }
 0x56c   :  { %v10426_v11 = vsel %vm10425_vm3, %v10351_v3, %v10359_v21 }
 0x56f   :  { %v10343_v57 = vpop.permute.xlu1 %10342 }
 0x574   :  { %v10367_v4 = vpop.permute.xlu0 %10366 }
 0x575   :  { %v10429_v20 = vsel %vm10428_vm4, %v10426_v11, %v10367_v4  ;;  %v14825_v11 = vld [vmem:[#allocation5_spill] sm:$0xff] }
 0x578   :  { %v10375_v16 = vpop.permute.xlu0 %10374 }
 0x579   :  { %v10432_v38 = vsel %vm10431_vm5, %v10429_v20, %v10375_v16 }
 0x57c   :  { %v10383_v55 = vpop.permute.xlu0 %10382 }
 0x57d   :  { %v10435_v32 = vsel %vm10434_vm6, %v10432_v38, %v10383_v55  ;;  %v10488_v55 = vld [vmem:[%s14725_s8] sm:$0x3]  ;;  %v14826_v38 = vld [vmem:[#allocation6_spill] sm:$0xff] }
 0x57e   :  { %v10493_v20 = vrot.slane %v10488_v55, %v14825_v11 }
 0x580   :  { %v10391_v45 = vpop.permute.xlu0 %10390 }
 0x581   :  { %v10438_v43 = vsel %vm10437_vm7, %v10435_v32, %v10391_v45  ;;  %v10497_v32 = vrot.slane %v10488_v55, %v14826_v38 }
 0x582   :  { %10905 = vmatprep.mubr.msk.f32.mxu0 %vm10500_vm8, %v10438_v43  ;;  %v11398_v59 = vpop.permute.xlu1 %11397 }
 0x583   :  { %v11399_v58 = vunpack.i.l.bf16 %v11398_v59  ;;  %v11400_v10 = vunpack.i.h.bf16 %v11398_v59  ;;  %v11564_v59 = vld [vmem:[%s14717_s0] sm:$0xff] }
 0x584   :  { %v11393_v8 = vpop.permute.xlu0 %11392 }
 0x585   :  { %v11394_v18 = vunpack.i.l.bf16 %v11393_v8 }
 0x587   :  { %v10396_v33 = vsel %vm4067_vm1, %v9860_v53, %v11394_v18  ;;  %v11395_v53 = vunpack.i.h.bf16 %v11393_v8 }
 0x588   :  { %v11403_v56 = vpop.permute.xlu0 %11402  ;;  %v10399_v9 = vsel %vm10398_vm9, %v10396_v33, %v11399_v58 }
 0x589   :  { %v11404_v61 = vunpack.i.l.bf16 %v11403_v56  ;;  %v10397_v27 = vsel %vm4067_vm1, %v9996_v34, %v11395_v53  ;;  %v11405_v36 = vunpack.i.h.bf16 %v11403_v56 }
 0x58a   :  { %v10400_v17 = vsel %vm10398_vm9, %v10397_v27, %v11400_v10 }
 0x58b   :  { %v10402_v24 = vsel %vm10401_vm10, %v10399_v9, %v11404_v61  ;;  %v10403_v37 = vsel %vm10401_vm10, %v10400_v17, %v11405_v36 }
 0x58d   :  { %v11408_v30 = vpop.permute.xlu1 %11407  ;;  %v11413_v51 = vpop.permute.xlu0 %11412 }
 0x58e   :  { %v11409_v26 = vunpack.i.l.bf16 %v11408_v30  ;;  %v11414_v54 = vunpack.i.l.bf16 %v11413_v51  ;;  %v11410_v25 = vunpack.i.h.bf16 %v11408_v30  ;;  %v11415_v31 = vunpack.i.h.bf16 %v11413_v51  ;;  %v11565_v30 = vld [vmem:[%s14717_s0 + $0x8] sm:$0xff] }
 0x590   :  { %v10405_v60 = vsel %vm10404_vm11, %v10402_v24, %v11409_v26  ;;  %v10406_v46 = vsel %vm10404_vm11, %v10403_v37, %v11410_v25  ;;  %v11566_v26 = vld [vmem:[%s14717_s0 + $0x10] sm:$0xff]  ;;  %v11567_v24 = vld [vmem:[%s14717_s0 + $0x18] sm:$0xff] }
 0x591   :  { %v11418_v62 = vpop.permute.xlu1 %11417  ;;  %v10408_v13 = vsel %vm10407_vm12, %v10405_v60, %v11414_v54  ;;  %v10409_v44 = vsel %vm10407_vm12, %v10406_v46, %v11415_v31  ;;  %v14827_v60 = vlaneseq }
 0x592   :  { %v11419_v50 = vunpack.i.l.bf16 %v11418_v62  ;;  %v11420_v29 = vunpack.i.h.bf16 %v11418_v62 }
 0x594   :  { %v10411_v48 = vsel %vm10410_vm13, %v10408_v13, %v11419_v50  ;;  %v10412_v22 = vsel %vm10410_vm13, %v10409_v44, %v11420_v29  ;;  %v10597_v50 = vand.u32 127, %v14827_v60  ;;  %v10629_v29 = vld [vmem:[%s14726_s9] sm:$0x3]  ;;  %s11624_s9 = smov [#allocation2]  }
 0x595   :  { %v11423_v28 = vpop.permute.xlu1 %11422  ;;  %v10353_v2 = vpop.permute.xlu0 %10352  ;;  %v10638_v44 = vrot.slane %v10629_v29, %v14826_v38 }
 0x596   :  { %v11424_v41 = vunpack.i.l.bf16 %v11423_v28  ;;  %v11425_v1 = vunpack.i.h.bf16 %v11423_v28 }
 0x598   :  { %v10414_v14 = vsel %vm10413_vm14, %v10411_v48, %v11424_v41  ;;  %v10415_v7 = vsel %vm10413_vm14, %v10412_v22, %v11425_v1  ;;  %v10598_v41 = vadd.s32 128, %v10597_v50  ;;  %v10645_v1 = vld [vmem:[%s14727_s10] sm:$0x3]  ;;  %s10670_s10 = sshll.u32 %s11624_s9, 4  ;;  %s10671_s10 = int_to_ptr.vmem [resolvable:$true] %s10670_s10 }
 0x599   :  { %v11428_v19 = vpop.permute.xlu1 %11427  ;;  %s11568_s25 = scalar_lea.vmem %s10671_s10, 512  ;;  %p11573_p1 = scmp.lt.s32.totalorder %s10671_s10, %s10671_s10 }
 0x59a   :  { %v11429_v52 = vunpack.i.l.bf16 %v11428_v19  ;;  %v11430_v42 = vunpack.i.h.bf16 %v11428_v19  ;;  %vm10600_vm1 = vcmp.lt.s32.totalorder %v10598_v41, 192  ;;  %p11569_p0 = scmp.ne.s32.totalorder %s10671_s10, %s11568_s25  ;;  %p11574_p2 = scmp.lt.s32.totalorder %s11568_s25, %s11568_s25 }
 0x59c   :  { %v10417_v5 = vsel %vm10416_vm15, %v10414_v14, %v11429_v52  ;;  %v10418_v39 = vsel %vm10416_vm15, %v10415_v7, %v11430_v42  ;;  %v10634_v42 = vrot.slane %v10629_v29, %v14825_v11  ;;  %v10654_v7 = vrot.slane %v10645_v1, %v14826_v38  ;;  %p11575_p3 = por %p11574_p2, %p11573_p1 }
 0x59d   :  { %v10361_v12 = vpop.permute.xlu1 %10360  ;;  %v10420_v23 = vsel %vm10419_vm0, %v10417_v5, %v10343_v57 }
 0x59e   :  { %v10423_v6 = vsel %vm10422_vm2, %v10420_v23, %v10351_v3  ;;  %v10427_v40 = vsel %vm10425_vm3, %v10353_v2, %v10361_v12  ;;  %p11576_p4 = pnand %p11575_p3, %p11569_p0 }
 0x59f   :  { %10572 = vmatmul.mubr.f32.vlgmr.msra.gmra.mxu0 %v10423_v6 }
 0x5a2   :  { %v10377_v49 = vpop.permute.xlu0 %10376  ;;  %v10369_v34 = vpop.permute.xlu1 %10368 }
 0x5a3   :  { %v10430_v63 = vsel %vm10428_vm4, %v10427_v40, %v10369_v34 }
 0x5a4   :  { %v10433_v47 = vsel %vm10431_vm5, %v10430_v63, %v10377_v49  ;;  %v10650_v63 = vrot.slane %v10645_v1, %v14825_v11 }
 0x5a6   :  { %v10345_v15 = vpop.permute.xlu0 %10344  ;;  %v10385_v35 = vpop.permute.xlu1 %10384 }
 0x5a7   :  { %v10421_v0 = vsel %vm10419_vm0, %v10418_v39, %v10345_v15  ;;  %v10436_v21 = vsel %vm10434_vm6, %v10433_v47, %v10385_v35 }
 0x5a8   :  { %v10424_v3 = vsel %vm10422_vm2, %v10421_v0, %v10353_v2 }
 0x5aa   :  { %v10393_v4 = vpop.permute.xlu1 %10392 }
 0x5ab   :  { %v10439_v16 = vsel %vm10437_vm7, %v10436_v21, %v10393_v4 }
 0x5ac   :  { %10906 = vmatprep.mubr.msk.f32.mxu0 %vm10500_vm8, %v10439_v16 }
 0x5ad   :  { %10578 = vmatmul.mubr.f32.gmra.mxu0 %v10424_v3 }
 0x65f   :  { %v10573_v45 = vpop.f32.mrf.mxu0 }
 0x660   :  { %v10574_v43 = vadd.f32 %v10573_v45, %v10493_v20 }
 0x661   :  { %v10575_v57 = vpop.f32.mrf.mxu0 }
 0x662   :  { %v10576_v8 = vadd.f32 %v10575_v57, %v10497_v32  ;;  %v10584_v18 = vadd.f32 %v11564_v59, %v10574_v43 }
 0x664   :  { %v10585_v56 = vadd.f32 %v11565_v30, %v10576_v8 }
 0x666   :  { %v10588_v33 = vadd.f32 %v10585_v56, %v10584_v18 }
 0x668   :  { %10589 = vadd.xlane.f32.xlu0 %v10588_v33 }
 0x66d   :  { %v10579_v61 = vpop.f32.mrf.mxu0 }
 0x66e   :  { %v10580_v62 = vadd.f32 %v10579_v61, %v10493_v20 }
 0x66f   :  { %v10581_v58 = vpop.f32.mrf.mxu0 }
 0x670   :  { %v10582_v51 = vadd.f32 %v10581_v58, %v10497_v32  ;;  %v10586_v9 = vadd.f32 %v11566_v26, %v10580_v62 }
 0x672   :  { %v10587_v54 = vadd.f32 %v11567_v24, %v10582_v51 }
 0x674   :  { %v10591_v28 = vadd.f32 %v10587_v54, %v10586_v9 }
 0x676   :  { %10592 = vadd.xlane.f32.xlu1 %v10591_v28 }
 0x6f1   :  { %v10590_v53 = vpop.xlane.xlu0 %10589 }
 0x6f2   :  { %v10594_v13 = vmul.f32 0.0052083335, %v10590_v53 }
 0x6f4   :  { %v10601_v19 = vsub.f32 %v10584_v18, %v10594_v13  ;;  %v10602_v48 = vsub.f32 %v10585_v56, %v10594_v13 }
 0x6f6   :  { %v10606_v52 = vsel %vm10600_vm1, %v10602_v48, 0.0  ;;  %v10609_v14 = vmul.f32 %v10601_v19, %v10601_v19 }
 0x6f7   :  { %v10610_v5 = vmul.f32 %v10606_v52, %v10606_v52 }
 0x6f9   :  { %v10613_v27 = vadd.f32 %v10610_v5, %v10609_v14 }
 0x6fb   :  { %10614 = vadd.xlane.f32.xlu0 %v10613_v27 }
 0x6ff   :  { %v10593_v36 = vpop.xlane.xlu1 %10592 }
 0x700   :  { %v10595_v12 = vmul.f32 0.0052083335, %v10593_v36 }
 0x702   :  { %v10603_v23 = vsub.f32 %v10586_v9, %v10595_v12  ;;  %v10604_v10 = vsub.f32 %v10587_v54, %v10595_v12 }
 0x704   :  { %v10608_v25 = vsel %vm10600_vm1, %v10604_v10, 0.0  ;;  %v10611_v2 = vmul.f32 %v10603_v23, %v10603_v23 }
 0x705   :  { %v10612_v6 = vmul.f32 %v10608_v25, %v10608_v25 }
 0x707   :  { %v10616_v17 = vadd.f32 %v10612_v6, %v10611_v2 }
 0x709   :  { %10617 = vadd.xlane.f32.xlu0 %v10616_v17 }
 0x784   :  { %v10615_v37 = vpop.xlane.xlu0 %10614 }
 0x785   :  { %v10619_v31 = vmul.f32 0.0052083335, %v10615_v37 }
 0x787   :  { %v10621_v46 = vadd.f32 1e-12, %v10619_v31 }
 0x789   :  { %11559 = vrsqrt.f32 %v10621_v46 }
 0x792   :  { %v10618_v49 = vpop.xlane.xlu0 %10617 }
 0x793   :  { %v10620_v34 = vmul.f32 0.0052083335, %v10618_v49 }
 0x795   :  { %v10622_v40 = vadd.f32 1e-12, %v10620_v34 }
 0x796   :  { %v11560_v22 = vpop.eup %11559 }
 0x797   :  { %v10625_v15 = vmul.f32 %v11560_v22, %v10601_v19  ;;  %v10626_v35 = vmul.f32 %v11560_v22, %v10602_v48  ;;  %11561 = vrsqrt.f32 %v10622_v40 }
 0x799   :  { %v10641_v39 = vmul.f32 %v10634_v42, %v10625_v15  ;;  %v10642_v0 = vmul.f32 %v10638_v44, %v10626_v35 }
 0x79b   :  { %v10657_v47 = vadd.f32 %v10650_v63, %v10641_v39  ;;  %v10658_v21 = vadd.f32 %v10654_v7, %v10642_v0 }
 0x79d   :  { %10661 = vst [vmem:[#allocation2] sm:$0xff] %v10657_v47  ;;  %10662 = vst [vmem:[#allocation2 + $0x8] sm:$0xff] %v10658_v21 }
 0x7a4   :  { %v11562_v4 = vpop.eup %11561 }
 0x7a5   :  { %v10627_v16 = vmul.f32 %v11562_v4, %v10603_v23  ;;  %v10628_v3 = vmul.f32 %v11562_v4, %v10604_v10 }
 0x7a7   :  { %v10643_v55 = vmul.f32 %v10634_v42, %v10627_v16  ;;  %v10644_v20 = vmul.f32 %v10638_v44, %v10628_v3 }
 0x7a9   :  { %v10659_v32 = vadd.f32 %v10650_v63, %v10643_v55  ;;  %v10660_v11 = vadd.f32 %v10654_v7, %v10644_v20 }
 0x7ab   :  { %10663 = vst [vmem:[#allocation2 + $0x10] sm:$0xff] %v10659_v32  ;;  %10664 = vst [vmem:[#allocation2 + $0x18] sm:$0xff] %v10660_v11 }
 0x7ac   :  { %11579 = shalt.err (!%p11576_p4)
}
 0x7ad   :  { %s11625_s29 = smov 256  }
 0x7ae   :  { %10676 = dma.vmem_to_hbm [thread:$0]  %s10671_s10, 512, %s14728_s11, [#allocation3], %s11625_s29, %s11625_s29, %s11612_s22  }
 0x7af   :  { %11588 = dma.done.wait [#allocation3], 512  }
 0x7b0   :  { %11589 = vsyncadd [#allocation3], 4294966784 }
 0x7b1   :  { %10680 = vsyncpa [#allocation3], 1 }

</bundles_post_ra>
